<compile_context>
chip_gen: v6e
topology: v6e:2x2x1
jax: 0.10.0
libtpu: 0.0.40
codegen_flags: <defaults>
</compile_context>

<pallas_src>
import math

import jax
import jax.numpy as jnp
from jax.experimental import pallas as pl
from jax.experimental.pallas import tpu as pltpu

DIM = 256
HEADS = 8
HEAD_DIM = DIM // HEADS
FFN_DIM = 4 * DIM
LN_EPS = 1e-5
NEG_INF = -1e9


def _layernorm(x, gamma, beta):
    mu = jnp.mean(x, axis=-1, keepdims=True)
    var = jnp.mean((x - mu) ** 2, axis=-1, keepdims=True)
    return (x - mu) * jax.lax.rsqrt(var + LN_EPS) * gamma + beta


def _gelu(x):
    # TODO(synk): PyTorch nn.GELU() defaults to the exact erf form; the tanh
    # approximation is used here (no guaranteed Mosaic erf lowering), ~1e-3 err.
    c = math.sqrt(2.0 / math.pi)
    return 0.5 * x * (1.0 + jnp.tanh(c * (x + 0.044715 * x * x * x)))


def _mm(x, w):
    """bf16 x bf16 matmul with f32 accumulation (shared precision policy)."""
    return jnp.dot(x.astype(jnp.bfloat16), w.astype(jnp.bfloat16),
                   preferred_element_type=jnp.float32)


def decoder_kernel(enc_ref, maskb_ref, mmqp_ref,
                   wq_ref, wkv_ref, bkv_ref, wo_ref, bo_ref,
                   ln1w_ref, ln1b_ref, w1_ref, b1_ref, w2_ref, b2_ref,
                   ln2w_ref, ln2b_ref,
                   out_ref):
    S = enc_ref.shape[1]
    M = mmqp_ref.shape[0]
    L = M * S

    enc = enc_ref[0]                    # (S, D)  f32
    mbias = maskb_ref[0]                # (1, S)  additive mask (0 / -1e9)
    mmqp = mmqp_ref[...]                # (M, D)  f32 = mm_query @ Wq + bq

    # Factorized query projection: q(s, m) = enc[s] @ Wq + mmqp[m]
    qe = _mm(enc, wq_ref[...])                                        # (S, D)
    # Rows are modality-major: l = m*S + s (the wrapper reorders to (S, M)).
    q = jnp.concatenate([qe + mmqp[m:m + 1, :] for m in range(M)], axis=0)

    # Fused K/V projection: single (S, D) @ (D, 2D) matmul.
    kv = _mm(enc, wkv_ref[...]) + bkv_ref[...]                        # (S, 2D)
    k = kv[:, :DIM]
    v = kv[:, DIM:]

    # Multi-head cross attention.  Each head's output is accumulated directly
    # against the matching rows of Wo (no lane-axis concat of head outputs).
    # TODO(synk): for production sizes (S >= 128, large B) pack several batch
    # elements per grid step and make the score tiles lane-dense.
    scale = 1.0 / math.sqrt(HEAD_DIM)
    attn = jnp.zeros((L, DIM), jnp.float32)
    for h in range(HEADS):
        lo, hi = h * HEAD_DIM, (h + 1) * HEAD_DIM
        qh = q[:, lo:hi]                                              # (L, hd)
        kh = k[:, lo:hi]                                              # (S, hd)
        vh = v[:, lo:hi]                                              # (S, hd)
        s = jax.lax.dot_general(qh, kh, (((1,), (1,)), ((), ())),
                                preferred_element_type=jnp.float32)   # (L, S)
        s = s * scale + mbias
        s = s - jnp.max(s, axis=-1, keepdims=True)
        e = jnp.exp(s)
        p = e * pl.reciprocal(jnp.sum(e, axis=-1, keepdims=True), approx=True)
        oh = jnp.dot(p, vh, preferred_element_type=jnp.float32)       # (L, hd)
        attn = attn + _mm(oh, wo_ref[lo:hi, :])                       # (L, D)
    attn = attn + bo_ref[...]

    # norm_1
    x = _layernorm(attn, ln1w_ref[...], ln1b_ref[...])

    # FFN (Linear -> GELU -> Linear); dropout = identity (eval mode).
    h1 = _gelu(_mm(x, w1_ref[...]) + b1_ref[...])
    h2 = _mm(h1, w2_ref[...]) + b2_ref[...]

    # residual + norm_2
    y = _layernorm(h2 + x, ln2w_ref[...], ln2b_ref[...])
    out_ref[0] = y.astype(out_ref.dtype)


def make_params(key, modalities, neighbors):
    ks = jax.random.split(key, 16)

    def w(k, shape, scale=0.02, dtype=jnp.bfloat16):
        return (jax.random.normal(k, shape, jnp.float32) * scale).astype(dtype)

    params = {
        "modal_emb": w(ks[0], (modalities, DIM), 0.1, jnp.float32),
        "agent_emb": w(ks[1], (neighbors + 1, DIM), 0.1, jnp.float32),
        # Projections stored already transposed: y = x @ W + b.
        # Big matrices are bf16 (halves HBM/VMEM traffic, native MXU path);
        # biases and LayerNorm parameters stay f32.
        "wq": w(ks[2], (DIM, DIM)),
        "bq": w(ks[3], (1, DIM), dtype=jnp.float32),
        "wkv": w(ks[4], (DIM, 2 * DIM)),          # fused [Wk | Wv]
        "bkv": w(ks[5], (1, 2 * DIM), dtype=jnp.float32),
        "wo": w(ks[6], (DIM, DIM)),
        "bo": w(ks[7], (1, DIM), dtype=jnp.float32),
        "ln1w": jnp.ones((1, DIM), jnp.float32),
        "ln1b": jnp.zeros((1, DIM), jnp.float32),
        "w1": w(ks[8], (DIM, FFN_DIM)),
        "b1": w(ks[9], (1, FFN_DIM), dtype=jnp.float32),
        "w2": w(ks[10], (FFN_DIM, DIM)),
        "b2": w(ks[11], (1, DIM), dtype=jnp.float32),
        "ln2w": jnp.ones((1, DIM), jnp.float32),
        "ln2b": jnp.zeros((1, DIM), jnp.float32),
    }
    return params


def initial_decoder_forward(agent_id, encoding, mask, params, modalities):
    B, S, dim = encoding.shape
    assert dim == DIM
    M = modalities
    L = M * S

    # --- tiny plain-JAX prep; no (B, L, D) query tensor is materialized ---
    mm_query = params["modal_emb"] + params["agent_emb"][agent_id][None, :]    # (M, D)
    mmq_proj = _mm(mm_query, params["wq"]) + params["bq"]                      # (M, D)
    mask_bias = jnp.where(mask, NEG_INF, 0.0).astype(jnp.float32)[:, None, :]  # (B, 1, S)

    weight_names = ["wq", "wkv", "bkv", "wo", "bo", "ln1w", "ln1b",
                    "w1", "b1", "w2", "b2", "ln2w", "ln2b"]
    weight_args = [params[n] for n in weight_names]

    in_specs = [
        pl.BlockSpec((1, S, DIM), lambda b: (b, 0, 0)),   # encoding
        pl.BlockSpec((1, 1, S), lambda b: (b, 0, 0)),     # additive mask bias
        pl.BlockSpec((M, DIM), lambda b: (0, 0)),         # mmq_proj (shared)
    ] + [pl.BlockSpec(wa.shape, lambda b: (0, 0)) for wa in weight_args]

    out = pl.pallas_call(
        decoder_kernel,
        out_shape=jax.ShapeDtypeStruct((B, L, DIM), jnp.float32),
        grid=(B,),
        in_specs=in_specs,
        out_specs=pl.BlockSpec((1, L, DIM), lambda b: (b, 0, 0)),
        compiler_params=pltpu.CompilerParams(
            dimension_semantics=("parallel",),       # >=2 steps: both v7x TCs busy
            vmem_limit_bytes=32 * 1024 * 1024,       # within v7x's 64 MiB physical VMEM
        ),
    )(encoding, mask_bias, mmq_proj, *weight_args)

    # Kernel rows are modality-major (l = m*S + s); reorder to (B, S, M, D).
    return out.reshape(B, M, S, DIM).transpose(0, 2, 1, 3)


def reference_forward(agent_id, encoding, mask, params, modalities):
    """Pure-JAX reference mirroring the PyTorch forward (same bf16-weight
    matmul precision policy as the kernel) for validation."""
    B, S, dim = encoding.shape
    M = modalities
    L = S * M
    mm_query = params["modal_emb"] + params["agent_emb"][agent_id][None, :]
    query = (encoding[:, :, None, :] + mm_query[None, None, :, :]).reshape(B, L, dim)
    mbias = jnp.where(mask, NEG_INF, 0.0)[:, None, :]                     # (B, 1, S)

    wk, wv = params["wkv"][:, :DIM], params["wkv"][:, DIM:]
    bk, bv = params["bkv"][:, :DIM], params["bkv"][:, DIM:]
    q = _mm(query, params["wq"]) + params["bq"]
    k = _mm(encoding, wk) + bk
    v = _mm(encoding, wv) + bv
    qh = q.reshape(B, L, HEADS, HEAD_DIM).transpose(0, 2, 1, 3)
    kh = k.reshape(B, S, HEADS, HEAD_DIM).transpose(0, 2, 1, 3)
    vh = v.reshape(B, S, HEADS, HEAD_DIM).transpose(0, 2, 1, 3)
    s = jnp.einsum("bhld,bhsd->bhls", qh, kh) / math.sqrt(HEAD_DIM)
    s = s + mbias[:, None, :, :]
    p = jax.nn.softmax(s, axis=-1)
    o = jnp.einsum("bhls,bhsd->bhld", p, vh).transpose(0, 2, 1, 3).reshape(B, L, dim)
    o = _mm(o, params["wo"]) + params["bo"]

    x = _layernorm(o, params["ln1w"], params["ln1b"])
    h1 = _gelu(_mm(x, params["w1"]) + params["b1"])
    h2 = _mm(h1, params["w2"]) + params["b2"]
    y = _layernorm(h2 + x, params["ln2w"], params["ln2b"])
    return y.reshape(B, S, M, dim)


if __name__ == "__main__":
    modalities, neighbors, future_len = 3, 5, 8   # future_len unused: predictor not in forward
    B, S = 2, 8
    agent_id = 0

    key = jax.random.PRNGKey(0)
    kp, ke = jax.random.split(key)
    params = make_params(kp, modalities, neighbors)
    encoding = jax.random.normal(ke, (B, S, DIM), jnp.float32)
    # key_padding_mask: True = masked.  Batch 0: none masked, batch 1: last 2 masked.
    lengths = jnp.array([S, S - 2])
    mask = jnp.arange(S)[None, :] >= lengths[:, None]

    out = initial_decoder_forward(agent_id, encoding, mask, params, modalities)
    out = jax.block_until_ready(out)
    assert out.shape == (B, S, modalities, DIM)

    ref = reference_forward(agent_id, encoding, mask, params, modalities)
    # bf16 matmul inputs + approx softmax reciprocal + factorized Q projection
    # => compare against the matched-precision reference at ~1e-2.
    assert jnp.allclose(out, ref, atol=1e-2, rtol=1e-2), "mismatch vs pure-JAX reference"

    print("KERNEL_OK")
</pallas_src>

<mosaic_0001>
module attributes {stable_mosaic.version = 11 : i64} {
  func.func @decoder_kernel(%arg0: i32, %arg1: memref<1x8x256xf32, #tpu.memory_space<vmem>>, %arg2: memref<1x1x8xf32, #tpu.memory_space<vmem>>, %arg3: memref<3x256xf32, #tpu.memory_space<vmem>>, %arg4: memref<256x256xbf16, #tpu.memory_space<vmem>>, %arg5: memref<256x512xbf16, #tpu.memory_space<vmem>>, %arg6: memref<1x512xf32, #tpu.memory_space<vmem>>, %arg7: memref<256x256xbf16, #tpu.memory_space<vmem>>, %arg8: memref<1x256xf32, #tpu.memory_space<vmem>>, %arg9: memref<1x256xf32, #tpu.memory_space<vmem>>, %arg10: memref<1x256xf32, #tpu.memory_space<vmem>>, %arg11: memref<256x1024xbf16, #tpu.memory_space<vmem>>, %arg12: memref<1x1024xf32, #tpu.memory_space<vmem>>, %arg13: memref<1024x256xbf16, #tpu.memory_space<vmem>>, %arg14: memref<1x256xf32, #tpu.memory_space<vmem>>, %arg15: memref<1x256xf32, #tpu.memory_space<vmem>>, %arg16: memref<1x256xf32, #tpu.memory_space<vmem>>, %arg17: memref<1x24x256xf32, #tpu.memory_space<vmem>>) attributes {dimension_semantics = [#tpu.dimension_semantics<parallel>], iteration_bounds = array<i64: 2>, scalar_prefetch = 0 : i64, scratch_operands = 0 : i64, tpu.core_type = #tpu.core_type<tc>, window_params = [{transform_indices = @transform_0, window_bounds = array<i64: 1, 8, 256>}, {transform_indices = @transform_1, window_bounds = array<i64: 1, 1, 8>}, {pipeline_mode = #tpu.pipeline_mode<synchronous>, transform_indices = @transform_2, window_bounds = array<i64: 3, 256>}, {pipeline_mode = #tpu.pipeline_mode<synchronous>, transform_indices = @transform_3, window_bounds = array<i64: 256, 256>}, {pipeline_mode = #tpu.pipeline_mode<synchronous>, transform_indices = @transform_4, window_bounds = array<i64: 256, 512>}, {pipeline_mode = #tpu.pipeline_mode<synchronous>, transform_indices = @transform_5, window_bounds = array<i64: 1, 512>}, {pipeline_mode = #tpu.pipeline_mode<synchronous>, transform_indices = @transform_6, window_bounds = array<i64: 256, 256>}, {pipeline_mode = #tpu.pipeline_mode<synchronous>, transform_indices = @transform_7, window_bounds = array<i64: 1, 256>}, {pipeline_mode = #tpu.pipeline_mode<synchronous>, transform_indices = @transform_8, window_bounds = array<i64: 1, 256>}, {pipeline_mode = #tpu.pipeline_mode<synchronous>, transform_indices = @transform_9, window_bounds = array<i64: 1, 256>}, {pipeline_mode = #tpu.pipeline_mode<synchronous>, transform_indices = @transform_10, window_bounds = array<i64: 256, 1024>}, {pipeline_mode = #tpu.pipeline_mode<synchronous>, transform_indices = @transform_11, window_bounds = array<i64: 1, 1024>}, {pipeline_mode = #tpu.pipeline_mode<synchronous>, transform_indices = @transform_12, window_bounds = array<i64: 1024, 256>}, {pipeline_mode = #tpu.pipeline_mode<synchronous>, transform_indices = @transform_13, window_bounds = array<i64: 1, 256>}, {pipeline_mode = #tpu.pipeline_mode<synchronous>, transform_indices = @transform_14, window_bounds = array<i64: 1, 256>}, {pipeline_mode = #tpu.pipeline_mode<synchronous>, transform_indices = @transform_15, window_bounds = array<i64: 1, 256>}, {transform_indices = @transform_16, window_bounds = array<i64: 1, 24, 256>}]} {
    %c0 = arith.constant 0 : index
    %c0_0 = arith.constant 0 : index
    %c0_1 = arith.constant 0 : index
    %0 = vector.load %arg1[%c0, %c0_0, %c0_1] : memref<1x8x256xf32, #tpu.memory_space<vmem>>, vector<1x8x256xf32>
    %1 = vector.shape_cast %0 : vector<1x8x256xf32> to vector<8x256xf32>
    %c0_2 = arith.constant 0 : index
    %c0_3 = arith.constant 0 : index
    %c0_4 = arith.constant 0 : index
    %2 = vector.load %arg2[%c0_2, %c0_3, %c0_4] : memref<1x1x8xf32, #tpu.memory_space<vmem>>, vector<1x1x8xf32>
    %3 = vector.shape_cast %2 : vector<1x1x8xf32> to vector<1x8xf32>
    %c0_5 = arith.constant 0 : index
    %c0_6 = arith.constant 0 : index
    %4 = vector.load %arg3[%c0_5, %c0_6] : memref<3x256xf32, #tpu.memory_space<vmem>>, vector<3x256xf32>
    %c0_7 = arith.constant 0 : index
    %c0_8 = arith.constant 0 : index
    %5 = vector.load %arg4[%c0_7, %c0_8] : memref<256x256xbf16, #tpu.memory_space<vmem>>, vector<256x256xbf16>
    %6 = arith.truncf %1 : vector<8x256xf32> to vector<8x256xbf16>
    %cst = arith.constant dense<0.000000e+00> : vector<8x256xf32>
    %7 = tpu.matmul %6, %5, %cst {dimension_numbers = #tpu.dot_dimension_numbers<[1], [0], [0], [1], [0, 0, 1, 1], [], []>} : vector<8x256xbf16>, vector<256x256xbf16>, vector<8x256xf32> -> vector<8x256xf32>
    %8 = vector.extract_strided_slice %4 {offsets = [0, 0], sizes = [1, 256], strides = [1, 1]} : vector<3x256xf32> to vector<1x256xf32>
    %9 = vector.broadcast %8 : vector<1x256xf32> to vector<8x256xf32>
    %10 = arith.addf %7, %9 : vector<8x256xf32>
    %11 = vector.extract_strided_slice %4 {offsets = [1, 0], sizes = [1, 256], strides = [1, 1]} : vector<3x256xf32> to vector<1x256xf32>
    %12 = vector.broadcast %11 : vector<1x256xf32> to vector<8x256xf32>
    %13 = arith.addf %7, %12 : vector<8x256xf32>
    %14 = vector.extract_strided_slice %4 {offsets = [2, 0], sizes = [1, 256], strides = [1, 1]} : vector<3x256xf32> to vector<1x256xf32>
    %15 = vector.broadcast %14 : vector<1x256xf32> to vector<8x256xf32>
    %16 = arith.addf %7, %15 : vector<8x256xf32>
    %17 = tpu.concatenate %10, %13, %16 in 0 : vector<8x256xf32>, vector<8x256xf32>, vector<8x256xf32> -> vector<24x256xf32>
    %c0_9 = arith.constant 0 : index
    %c0_10 = arith.constant 0 : index
    %18 = vector.load %arg5[%c0_9, %c0_10] : memref<256x512xbf16, #tpu.memory_space<vmem>>, vector<256x512xbf16>
    %19 = arith.truncf %1 : vector<8x256xf32> to vector<8x256xbf16>
    %cst_11 = arith.constant dense<0.000000e+00> : vector<8x512xf32>
    %20 = tpu.matmul %19, %18, %cst_11 {dimension_numbers = #tpu.dot_dimension_numbers<[1], [0], [0], [1], [0, 0, 1, 1], [], []>} : vector<8x256xbf16>, vector<256x512xbf16>, vector<8x512xf32> -> vector<8x512xf32>
    %c0_12 = arith.constant 0 : index
    %c0_13 = arith.constant 0 : index
    %21 = vector.load %arg6[%c0_12, %c0_13] : memref<1x512xf32, #tpu.memory_space<vmem>>, vector<1x512xf32>
    %22 = vector.broadcast %21 : vector<1x512xf32> to vector<8x512xf32>
    %23 = arith.addf %20, %22 : vector<8x512xf32>
    %24 = vector.extract_strided_slice %23 {offsets = [0, 0], sizes = [8, 256], strides = [1, 1]} : vector<8x512xf32> to vector<8x256xf32>
    %25 = vector.extract_strided_slice %23 {offsets = [0, 256], sizes = [8, 256], strides = [1, 1]} : vector<8x512xf32> to vector<8x256xf32>
    %cst_14 = arith.constant 0.000000e+00 : f32
    %26 = vector.broadcast %cst_14 : f32 to vector<24x256xf32>
    %27 = vector.extract_strided_slice %17 {offsets = [0, 0], sizes = [24, 32], strides = [1, 1]} : vector<24x256xf32> to vector<24x32xf32>
    %28 = vector.extract_strided_slice %24 {offsets = [0, 0], sizes = [8, 32], strides = [1, 1]} : vector<8x256xf32> to vector<8x32xf32>
    %29 = vector.extract_strided_slice %25 {offsets = [0, 0], sizes = [8, 32], strides = [1, 1]} : vector<8x256xf32> to vector<8x32xf32>
    %cst_15 = arith.constant dense<0.000000e+00> : vector<24x8xf32>
    %30 = tpu.matmul %27, %28, %cst_15 {dimension_numbers = #tpu.dot_dimension_numbers<[1], [1], [0], [0], [0, 0, 1, 0], [], []>} : vector<24x32xf32>, vector<8x32xf32>, vector<24x8xf32> -> vector<24x8xf32>
    %cst_16 = arith.constant 0.176776692 : f32
    %31 = vector.broadcast %cst_16 : f32 to vector<24x8xf32>
    %32 = arith.mulf %30, %31 : vector<24x8xf32>
    %33 = vector.broadcast %3 : vector<1x8xf32> to vector<24x8xf32>
    %34 = arith.addf %32, %33 : vector<24x8xf32>
    %cst_17 = arith.constant dense<0xFF800000> : vector<24xf32>
    %35 = vector.multi_reduction <maximumf>, %34, %cst_17 [1] : vector<24x8xf32> to vector<24xf32>
    %36 = vector.shape_cast %35 : vector<24xf32> to vector<24x1xf32>
    %37 = vector.broadcast %36 : vector<24x1xf32> to vector<24x8xf32>
    %38 = arith.subf %34, %37 : vector<24x8xf32>
    %39 = math.exp %38 : vector<24x8xf32>
    %cst_18 = arith.constant dense<0.000000e+00> : vector<24xf32>
    %40 = vector.multi_reduction <add>, %39, %cst_18 [1] : vector<24x8xf32> to vector<24xf32>
    %41 = vector.shape_cast %40 : vector<24xf32> to vector<24x1xf32>
    %42 = tpu.reciprocal %41 {approx = true} : vector<24x1xf32> -> vector<24x1xf32>
    %43 = vector.broadcast %42 : vector<24x1xf32> to vector<24x8xf32>
    %44 = arith.mulf %39, %43 : vector<24x8xf32>
    %cst_19 = arith.constant dense<0.000000e+00> : vector<24x32xf32>
    %45 = tpu.matmul %44, %29, %cst_19 {dimension_numbers = #tpu.dot_dimension_numbers<[1], [0], [0], [1], [0, 0, 1, 1], [], []>} : vector<24x8xf32>, vector<8x32xf32>, vector<24x32xf32> -> vector<24x32xf32>
    %c0_20 = arith.constant 0 : index
    %c0_21 = arith.constant 0 : index
    %46 = vector.load %arg7[%c0_20, %c0_21] : memref<256x256xbf16, #tpu.memory_space<vmem>>, vector<32x256xbf16>
    %47 = arith.truncf %45 : vector<24x32xf32> to vector<24x32xbf16>
    %cst_22 = arith.constant dense<0.000000e+00> : vector<24x256xf32>
    %48 = tpu.matmul %47, %46, %cst_22 {dimension_numbers = #tpu.dot_dimension_numbers<[1], [0], [0], [1], [0, 0, 1, 1], [], []>} : vector<24x32xbf16>, vector<32x256xbf16>, vector<24x256xf32> -> vector<24x256xf32>
    %49 = arith.addf %26, %48 : vector<24x256xf32>
    %50 = vector.extract_strided_slice %17 {offsets = [0, 32], sizes = [24, 32], strides = [1, 1]} : vector<24x256xf32> to vector<24x32xf32>
    %51 = vector.extract_strided_slice %24 {offsets = [0, 32], sizes = [8, 32], strides = [1, 1]} : vector<8x256xf32> to vector<8x32xf32>
    %52 = vector.extract_strided_slice %25 {offsets = [0, 32], sizes = [8, 32], strides = [1, 1]} : vector<8x256xf32> to vector<8x32xf32>
    %cst_23 = arith.constant dense<0.000000e+00> : vector<24x8xf32>
    %53 = tpu.matmul %50, %51, %cst_23 {dimension_numbers = #tpu.dot_dimension_numbers<[1], [1], [0], [0], [0, 0, 1, 0], [], []>} : vector<24x32xf32>, vector<8x32xf32>, vector<24x8xf32> -> vector<24x8xf32>
    %cst_24 = arith.constant 0.176776692 : f32
    %54 = vector.broadcast %cst_24 : f32 to vector<24x8xf32>
    %55 = arith.mulf %53, %54 : vector<24x8xf32>
    %56 = vector.broadcast %3 : vector<1x8xf32> to vector<24x8xf32>
    %57 = arith.addf %55, %56 : vector<24x8xf32>
    %cst_25 = arith.constant dense<0xFF800000> : vector<24xf32>
    %58 = vector.multi_reduction <maximumf>, %57, %cst_25 [1] : vector<24x8xf32> to vector<24xf32>
    %59 = vector.shape_cast %58 : vector<24xf32> to vector<24x1xf32>
    %60 = vector.broadcast %59 : vector<24x1xf32> to vector<24x8xf32>
    %61 = arith.subf %57, %60 : vector<24x8xf32>
    %62 = math.exp %61 : vector<24x8xf32>
    %cst_26 = arith.constant dense<0.000000e+00> : vector<24xf32>
    %63 = vector.multi_reduction <add>, %62, %cst_26 [1] : vector<24x8xf32> to vector<24xf32>
    %64 = vector.shape_cast %63 : vector<24xf32> to vector<24x1xf32>
    %65 = tpu.reciprocal %64 {approx = true} : vector<24x1xf32> -> vector<24x1xf32>
    %66 = vector.broadcast %65 : vector<24x1xf32> to vector<24x8xf32>
    %67 = arith.mulf %62, %66 : vector<24x8xf32>
    %cst_27 = arith.constant dense<0.000000e+00> : vector<24x32xf32>
    %68 = tpu.matmul %67, %52, %cst_27 {dimension_numbers = #tpu.dot_dimension_numbers<[1], [0], [0], [1], [0, 0, 1, 1], [], []>} : vector<24x8xf32>, vector<8x32xf32>, vector<24x32xf32> -> vector<24x32xf32>
    %c32 = arith.constant 32 : index
    %c0_28 = arith.constant 0 : index
    %69 = vector.load %arg7[%c32, %c0_28] : memref<256x256xbf16, #tpu.memory_space<vmem>>, vector<32x256xbf16>
    %70 = arith.truncf %68 : vector<24x32xf32> to vector<24x32xbf16>
    %cst_29 = arith.constant dense<0.000000e+00> : vector<24x256xf32>
    %71 = tpu.matmul %70, %69, %cst_29 {dimension_numbers = #tpu.dot_dimension_numbers<[1], [0], [0], [1], [0, 0, 1, 1], [], []>} : vector<24x32xbf16>, vector<32x256xbf16>, vector<24x256xf32> -> vector<24x256xf32>
    %72 = arith.addf %49, %71 : vector<24x256xf32>
    %73 = vector.extract_strided_slice %17 {offsets = [0, 64], sizes = [24, 32], strides = [1, 1]} : vector<24x256xf32> to vector<24x32xf32>
    %74 = vector.extract_strided_slice %24 {offsets = [0, 64], sizes = [8, 32], strides = [1, 1]} : vector<8x256xf32> to vector<8x32xf32>
    %75 = vector.extract_strided_slice %25 {offsets = [0, 64], sizes = [8, 32], strides = [1, 1]} : vector<8x256xf32> to vector<8x32xf32>
    %cst_30 = arith.constant dense<0.000000e+00> : vector<24x8xf32>
    %76 = tpu.matmul %73, %74, %cst_30 {dimension_numbers = #tpu.dot_dimension_numbers<[1], [1], [0], [0], [0, 0, 1, 0], [], []>} : vector<24x32xf32>, vector<8x32xf32>, vector<24x8xf32> -> vector<24x8xf32>
    %cst_31 = arith.constant 0.176776692 : f32
    %77 = vector.broadcast %cst_31 : f32 to vector<24x8xf32>
    %78 = arith.mulf %76, %77 : vector<24x8xf32>
    %79 = vector.broadcast %3 : vector<1x8xf32> to vector<24x8xf32>
    %80 = arith.addf %78, %79 : vector<24x8xf32>
    %cst_32 = arith.constant dense<0xFF800000> : vector<24xf32>
    %81 = vector.multi_reduction <maximumf>, %80, %cst_32 [1] : vector<24x8xf32> to vector<24xf32>
    %82 = vector.shape_cast %81 : vector<24xf32> to vector<24x1xf32>
    %83 = vector.broadcast %82 : vector<24x1xf32> to vector<24x8xf32>
    %84 = arith.subf %80, %83 : vector<24x8xf32>
    %85 = math.exp %84 : vector<24x8xf32>
    %cst_33 = arith.constant dense<0.000000e+00> : vector<24xf32>
    %86 = vector.multi_reduction <add>, %85, %cst_33 [1] : vector<24x8xf32> to vector<24xf32>
    %87 = vector.shape_cast %86 : vector<24xf32> to vector<24x1xf32>
    %88 = tpu.reciprocal %87 {approx = true} : vector<24x1xf32> -> vector<24x1xf32>
    %89 = vector.broadcast %88 : vector<24x1xf32> to vector<24x8xf32>
    %90 = arith.mulf %85, %89 : vector<24x8xf32>
    %cst_34 = arith.constant dense<0.000000e+00> : vector<24x32xf32>
    %91 = tpu.matmul %90, %75, %cst_34 {dimension_numbers = #tpu.dot_dimension_numbers<[1], [0], [0], [1], [0, 0, 1, 1], [], []>} : vector<24x8xf32>, vector<8x32xf32>, vector<24x32xf32> -> vector<24x32xf32>
    %c64 = arith.constant 64 : index
    %c0_35 = arith.constant 0 : index
    %92 = vector.load %arg7[%c64, %c0_35] : memref<256x256xbf16, #tpu.memory_space<vmem>>, vector<32x256xbf16>
    %93 = arith.truncf %91 : vector<24x32xf32> to vector<24x32xbf16>
    %cst_36 = arith.constant dense<0.000000e+00> : vector<24x256xf32>
    %94 = tpu.matmul %93, %92, %cst_36 {dimension_numbers = #tpu.dot_dimension_numbers<[1], [0], [0], [1], [0, 0, 1, 1], [], []>} : vector<24x32xbf16>, vector<32x256xbf16>, vector<24x256xf32> -> vector<24x256xf32>
    %95 = arith.addf %72, %94 : vector<24x256xf32>
    %96 = vector.extract_strided_slice %17 {offsets = [0, 96], sizes = [24, 32], strides = [1, 1]} : vector<24x256xf32> to vector<24x32xf32>
    %97 = vector.extract_strided_slice %24 {offsets = [0, 96], sizes = [8, 32], strides = [1, 1]} : vector<8x256xf32> to vector<8x32xf32>
    %98 = vector.extract_strided_slice %25 {offsets = [0, 96], sizes = [8, 32], strides = [1, 1]} : vector<8x256xf32> to vector<8x32xf32>
    %cst_37 = arith.constant dense<0.000000e+00> : vector<24x8xf32>
    %99 = tpu.matmul %96, %97, %cst_37 {dimension_numbers = #tpu.dot_dimension_numbers<[1], [1], [0], [0], [0, 0, 1, 0], [], []>} : vector<24x32xf32>, vector<8x32xf32>, vector<24x8xf32> -> vector<24x8xf32>
    %cst_38 = arith.constant 0.176776692 : f32
    %100 = vector.broadcast %cst_38 : f32 to vector<24x8xf32>
    %101 = arith.mulf %99, %100 : vector<24x8xf32>
    %102 = vector.broadcast %3 : vector<1x8xf32> to vector<24x8xf32>
    %103 = arith.addf %101, %102 : vector<24x8xf32>
    %cst_39 = arith.constant dense<0xFF800000> : vector<24xf32>
    %104 = vector.multi_reduction <maximumf>, %103, %cst_39 [1] : vector<24x8xf32> to vector<24xf32>
    %105 = vector.shape_cast %104 : vector<24xf32> to vector<24x1xf32>
    %106 = vector.broadcast %105 : vector<24x1xf32> to vector<24x8xf32>
    %107 = arith.subf %103, %106 : vector<24x8xf32>
    %108 = math.exp %107 : vector<24x8xf32>
    %cst_40 = arith.constant dense<0.000000e+00> : vector<24xf32>
    %109 = vector.multi_reduction <add>, %108, %cst_40 [1] : vector<24x8xf32> to vector<24xf32>
    %110 = vector.shape_cast %109 : vector<24xf32> to vector<24x1xf32>
    %111 = tpu.reciprocal %110 {approx = true} : vector<24x1xf32> -> vector<24x1xf32>
    %112 = vector.broadcast %111 : vector<24x1xf32> to vector<24x8xf32>
    %113 = arith.mulf %108, %112 : vector<24x8xf32>
    %cst_41 = arith.constant dense<0.000000e+00> : vector<24x32xf32>
    %114 = tpu.matmul %113, %98, %cst_41 {dimension_numbers = #tpu.dot_dimension_numbers<[1], [0], [0], [1], [0, 0, 1, 1], [], []>} : vector<24x8xf32>, vector<8x32xf32>, vector<24x32xf32> -> vector<24x32xf32>
    %c96 = arith.constant 96 : index
    %c0_42 = arith.constant 0 : index
    %115 = vector.load %arg7[%c96, %c0_42] : memref<256x256xbf16, #tpu.memory_space<vmem>>, vector<32x256xbf16>
    %116 = arith.truncf %114 : vector<24x32xf32> to vector<24x32xbf16>
    %cst_43 = arith.constant dense<0.000000e+00> : vector<24x256xf32>
    %117 = tpu.matmul %116, %115, %cst_43 {dimension_numbers = #tpu.dot_dimension_numbers<[1], [0], [0], [1], [0, 0, 1, 1], [], []>} : vector<24x32xbf16>, vector<32x256xbf16>, vector<24x256xf32> -> vector<24x256xf32>
    %118 = arith.addf %95, %117 : vector<24x256xf32>
    %119 = vector.extract_strided_slice %17 {offsets = [0, 128], sizes = [24, 32], strides = [1, 1]} : vector<24x256xf32> to vector<24x32xf32>
    %120 = vector.extract_strided_slice %24 {offsets = [0, 128], sizes = [8, 32], strides = [1, 1]} : vector<8x256xf32> to vector<8x32xf32>
    %121 = vector.extract_strided_slice %25 {offsets = [0, 128], sizes = [8, 32], strides = [1, 1]} : vector<8x256xf32> to vector<8x32xf32>
    %cst_44 = arith.constant dense<0.000000e+00> : vector<24x8xf32>
    %122 = tpu.matmul %119, %120, %cst_44 {dimension_numbers = #tpu.dot_dimension_numbers<[1], [1], [0], [0], [0, 0, 1, 0], [], []>} : vector<24x32xf32>, vector<8x32xf32>, vector<24x8xf32> -> vector<24x8xf32>
    %cst_45 = arith.constant 0.176776692 : f32
    %123 = vector.broadcast %cst_45 : f32 to vector<24x8xf32>
    %124 = arith.mulf %122, %123 : vector<24x8xf32>
    %125 = vector.broadcast %3 : vector<1x8xf32> to vector<24x8xf32>
    %126 = arith.addf %124, %125 : vector<24x8xf32>
    %cst_46 = arith.constant dense<0xFF800000> : vector<24xf32>
    %127 = vector.multi_reduction <maximumf>, %126, %cst_46 [1] : vector<24x8xf32> to vector<24xf32>
    %128 = vector.shape_cast %127 : vector<24xf32> to vector<24x1xf32>
    %129 = vector.broadcast %128 : vector<24x1xf32> to vector<24x8xf32>
    %130 = arith.subf %126, %129 : vector<24x8xf32>
    %131 = math.exp %130 : vector<24x8xf32>
    %cst_47 = arith.constant dense<0.000000e+00> : vector<24xf32>
    %132 = vector.multi_reduction <add>, %131, %cst_47 [1] : vector<24x8xf32> to vector<24xf32>
    %133 = vector.shape_cast %132 : vector<24xf32> to vector<24x1xf32>
    %134 = tpu.reciprocal %133 {approx = true} : vector<24x1xf32> -> vector<24x1xf32>
    %135 = vector.broadcast %134 : vector<24x1xf32> to vector<24x8xf32>
    %136 = arith.mulf %131, %135 : vector<24x8xf32>
    %cst_48 = arith.constant dense<0.000000e+00> : vector<24x32xf32>
    %137 = tpu.matmul %136, %121, %cst_48 {dimension_numbers = #tpu.dot_dimension_numbers<[1], [0], [0], [1], [0, 0, 1, 1], [], []>} : vector<24x8xf32>, vector<8x32xf32>, vector<24x32xf32> -> vector<24x32xf32>
    %c128 = arith.constant 128 : index
    %c0_49 = arith.constant 0 : index
    %138 = vector.load %arg7[%c128, %c0_49] : memref<256x256xbf16, #tpu.memory_space<vmem>>, vector<32x256xbf16>
    %139 = arith.truncf %137 : vector<24x32xf32> to vector<24x32xbf16>
    %cst_50 = arith.constant dense<0.000000e+00> : vector<24x256xf32>
    %140 = tpu.matmul %139, %138, %cst_50 {dimension_numbers = #tpu.dot_dimension_numbers<[1], [0], [0], [1], [0, 0, 1, 1], [], []>} : vector<24x32xbf16>, vector<32x256xbf16>, vector<24x256xf32> -> vector<24x256xf32>
    %141 = arith.addf %118, %140 : vector<24x256xf32>
    %142 = vector.extract_strided_slice %17 {offsets = [0, 160], sizes = [24, 32], strides = [1, 1]} : vector<24x256xf32> to vector<24x32xf32>
    %143 = vector.extract_strided_slice %24 {offsets = [0, 160], sizes = [8, 32], strides = [1, 1]} : vector<8x256xf32> to vector<8x32xf32>
    %144 = vector.extract_strided_slice %25 {offsets = [0, 160], sizes = [8, 32], strides = [1, 1]} : vector<8x256xf32> to vector<8x32xf32>
    %cst_51 = arith.constant dense<0.000000e+00> : vector<24x8xf32>
    %145 = tpu.matmul %142, %143, %cst_51 {dimension_numbers = #tpu.dot_dimension_numbers<[1], [1], [0], [0], [0, 0, 1, 0], [], []>} : vector<24x32xf32>, vector<8x32xf32>, vector<24x8xf32> -> vector<24x8xf32>
    %cst_52 = arith.constant 0.176776692 : f32
    %146 = vector.broadcast %cst_52 : f32 to vector<24x8xf32>
    %147 = arith.mulf %145, %146 : vector<24x8xf32>
    %148 = vector.broadcast %3 : vector<1x8xf32> to vector<24x8xf32>
    %149 = arith.addf %147, %148 : vector<24x8xf32>
    %cst_53 = arith.constant dense<0xFF800000> : vector<24xf32>
    %150 = vector.multi_reduction <maximumf>, %149, %cst_53 [1] : vector<24x8xf32> to vector<24xf32>
    %151 = vector.shape_cast %150 : vector<24xf32> to vector<24x1xf32>
    %152 = vector.broadcast %151 : vector<24x1xf32> to vector<24x8xf32>
    %153 = arith.subf %149, %152 : vector<24x8xf32>
    %154 = math.exp %153 : vector<24x8xf32>
    %cst_54 = arith.constant dense<0.000000e+00> : vector<24xf32>
    %155 = vector.multi_reduction <add>, %154, %cst_54 [1] : vector<24x8xf32> to vector<24xf32>
    %156 = vector.shape_cast %155 : vector<24xf32> to vector<24x1xf32>
    %157 = tpu.reciprocal %156 {approx = true} : vector<24x1xf32> -> vector<24x1xf32>
    %158 = vector.broadcast %157 : vector<24x1xf32> to vector<24x8xf32>
    %159 = arith.mulf %154, %158 : vector<24x8xf32>
    %cst_55 = arith.constant dense<0.000000e+00> : vector<24x32xf32>
    %160 = tpu.matmul %159, %144, %cst_55 {dimension_numbers = #tpu.dot_dimension_numbers<[1], [0], [0], [1], [0, 0, 1, 1], [], []>} : vector<24x8xf32>, vector<8x32xf32>, vector<24x32xf32> -> vector<24x32xf32>
    %c160 = arith.constant 160 : index
    %c0_56 = arith.constant 0 : index
    %161 = vector.load %arg7[%c160, %c0_56] : memref<256x256xbf16, #tpu.memory_space<vmem>>, vector<32x256xbf16>
    %162 = arith.truncf %160 : vector<24x32xf32> to vector<24x32xbf16>
    %cst_57 = arith.constant dense<0.000000e+00> : vector<24x256xf32>
    %163 = tpu.matmul %162, %161, %cst_57 {dimension_numbers = #tpu.dot_dimension_numbers<[1], [0], [0], [1], [0, 0, 1, 1], [], []>} : vector<24x32xbf16>, vector<32x256xbf16>, vector<24x256xf32> -> vector<24x256xf32>
    %164 = arith.addf %141, %163 : vector<24x256xf32>
    %165 = vector.extract_strided_slice %17 {offsets = [0, 192], sizes = [24, 32], strides = [1, 1]} : vector<24x256xf32> to vector<24x32xf32>
    %166 = vector.extract_strided_slice %24 {offsets = [0, 192], sizes = [8, 32], strides = [1, 1]} : vector<8x256xf32> to vector<8x32xf32>
    %167 = vector.extract_strided_slice %25 {offsets = [0, 192], sizes = [8, 32], strides = [1, 1]} : vector<8x256xf32> to vector<8x32xf32>
    %cst_58 = arith.constant dense<0.000000e+00> : vector<24x8xf32>
    %168 = tpu.matmul %165, %166, %cst_58 {dimension_numbers = #tpu.dot_dimension_numbers<[1], [1], [0], [0], [0, 0, 1, 0], [], []>} : vector<24x32xf32>, vector<8x32xf32>, vector<24x8xf32> -> vector<24x8xf32>
    %cst_59 = arith.constant 0.176776692 : f32
    %169 = vector.broadcast %cst_59 : f32 to vector<24x8xf32>
    %170 = arith.mulf %168, %169 : vector<24x8xf32>
    %171 = vector.broadcast %3 : vector<1x8xf32> to vector<24x8xf32>
    %172 = arith.addf %170, %171 : vector<24x8xf32>
    %cst_60 = arith.constant dense<0xFF800000> : vector<24xf32>
    %173 = vector.multi_reduction <maximumf>, %172, %cst_60 [1] : vector<24x8xf32> to vector<24xf32>
    %174 = vector.shape_cast %173 : vector<24xf32> to vector<24x1xf32>
    %175 = vector.broadcast %174 : vector<24x1xf32> to vector<24x8xf32>
    %176 = arith.subf %172, %175 : vector<24x8xf32>
    %177 = math.exp %176 : vector<24x8xf32>
    %cst_61 = arith.constant dense<0.000000e+00> : vector<24xf32>
    %178 = vector.multi_reduction <add>, %177, %cst_61 [1] : vector<24x8xf32> to vector<24xf32>
    %179 = vector.shape_cast %178 : vector<24xf32> to vector<24x1xf32>
    %180 = tpu.reciprocal %179 {approx = true} : vector<24x1xf32> -> vector<24x1xf32>
    %181 = vector.broadcast %180 : vector<24x1xf32> to vector<24x8xf32>
    %182 = arith.mulf %177, %181 : vector<24x8xf32>
    %cst_62 = arith.constant dense<0.000000e+00> : vector<24x32xf32>
    %183 = tpu.matmul %182, %167, %cst_62 {dimension_numbers = #tpu.dot_dimension_numbers<[1], [0], [0], [1], [0, 0, 1, 1], [], []>} : vector<24x8xf32>, vector<8x32xf32>, vector<24x32xf32> -> vector<24x32xf32>
    %c192 = arith.constant 192 : index
    %c0_63 = arith.constant 0 : index
    %184 = vector.load %arg7[%c192, %c0_63] : memref<256x256xbf16, #tpu.memory_space<vmem>>, vector<32x256xbf16>
    %185 = arith.truncf %183 : vector<24x32xf32> to vector<24x32xbf16>
    %cst_64 = arith.constant dense<0.000000e+00> : vector<24x256xf32>
    %186 = tpu.matmul %185, %184, %cst_64 {dimension_numbers = #tpu.dot_dimension_numbers<[1], [0], [0], [1], [0, 0, 1, 1], [], []>} : vector<24x32xbf16>, vector<32x256xbf16>, vector<24x256xf32> -> vector<24x256xf32>
    %187 = arith.addf %164, %186 : vector<24x256xf32>
    %188 = vector.extract_strided_slice %17 {offsets = [0, 224], sizes = [24, 32], strides = [1, 1]} : vector<24x256xf32> to vector<24x32xf32>
    %189 = vector.extract_strided_slice %24 {offsets = [0, 224], sizes = [8, 32], strides = [1, 1]} : vector<8x256xf32> to vector<8x32xf32>
    %190 = vector.extract_strided_slice %25 {offsets = [0, 224], sizes = [8, 32], strides = [1, 1]} : vector<8x256xf32> to vector<8x32xf32>
    %cst_65 = arith.constant dense<0.000000e+00> : vector<24x8xf32>
    %191 = tpu.matmul %188, %189, %cst_65 {dimension_numbers = #tpu.dot_dimension_numbers<[1], [1], [0], [0], [0, 0, 1, 0], [], []>} : vector<24x32xf32>, vector<8x32xf32>, vector<24x8xf32> -> vector<24x8xf32>
    %cst_66 = arith.constant 0.176776692 : f32
    %192 = vector.broadcast %cst_66 : f32 to vector<24x8xf32>
    %193 = arith.mulf %191, %192 : vector<24x8xf32>
    %194 = vector.broadcast %3 : vector<1x8xf32> to vector<24x8xf32>
    %195 = arith.addf %193, %194 : vector<24x8xf32>
    %cst_67 = arith.constant dense<0xFF800000> : vector<24xf32>
    %196 = vector.multi_reduction <maximumf>, %195, %cst_67 [1] : vector<24x8xf32> to vector<24xf32>
    %197 = vector.shape_cast %196 : vector<24xf32> to vector<24x1xf32>
    %198 = vector.broadcast %197 : vector<24x1xf32> to vector<24x8xf32>
    %199 = arith.subf %195, %198 : vector<24x8xf32>
    %200 = math.exp %199 : vector<24x8xf32>
    %cst_68 = arith.constant dense<0.000000e+00> : vector<24xf32>
    %201 = vector.multi_reduction <add>, %200, %cst_68 [1] : vector<24x8xf32> to vector<24xf32>
    %202 = vector.shape_cast %201 : vector<24xf32> to vector<24x1xf32>
    %203 = tpu.reciprocal %202 {approx = true} : vector<24x1xf32> -> vector<24x1xf32>
    %204 = vector.broadcast %203 : vector<24x1xf32> to vector<24x8xf32>
    %205 = arith.mulf %200, %204 : vector<24x8xf32>
    %cst_69 = arith.constant dense<0.000000e+00> : vector<24x32xf32>
    %206 = tpu.matmul %205, %190, %cst_69 {dimension_numbers = #tpu.dot_dimension_numbers<[1], [0], [0], [1], [0, 0, 1, 1], [], []>} : vector<24x8xf32>, vector<8x32xf32>, vector<24x32xf32> -> vector<24x32xf32>
    %c224 = arith.constant 224 : index
    %c0_70 = arith.constant 0 : index
    %207 = vector.load %arg7[%c224, %c0_70] : memref<256x256xbf16, #tpu.memory_space<vmem>>, vector<32x256xbf16>
    %208 = arith.truncf %206 : vector<24x32xf32> to vector<24x32xbf16>
    %cst_71 = arith.constant dense<0.000000e+00> : vector<24x256xf32>
    %209 = tpu.matmul %208, %207, %cst_71 {dimension_numbers = #tpu.dot_dimension_numbers<[1], [0], [0], [1], [0, 0, 1, 1], [], []>} : vector<24x32xbf16>, vector<32x256xbf16>, vector<24x256xf32> -> vector<24x256xf32>
    %210 = arith.addf %187, %209 : vector<24x256xf32>
    %c0_72 = arith.constant 0 : index
    %c0_73 = arith.constant 0 : index
    %211 = vector.load %arg8[%c0_72, %c0_73] : memref<1x256xf32, #tpu.memory_space<vmem>>, vector<1x256xf32>
    %212 = vector.broadcast %211 : vector<1x256xf32> to vector<24x256xf32>
    %213 = arith.addf %210, %212 : vector<24x256xf32>
    %c0_74 = arith.constant 0 : index
    %c0_75 = arith.constant 0 : index
    %214 = vector.load %arg9[%c0_74, %c0_75] : memref<1x256xf32, #tpu.memory_space<vmem>>, vector<1x256xf32>
    %c0_76 = arith.constant 0 : index
    %c0_77 = arith.constant 0 : index
    %215 = vector.load %arg10[%c0_76, %c0_77] : memref<1x256xf32, #tpu.memory_space<vmem>>, vector<1x256xf32>
    %cst_78 = arith.constant dense<0.000000e+00> : vector<24xf32>
    %216 = vector.multi_reduction <add>, %213, %cst_78 [1] : vector<24x256xf32> to vector<24xf32>
    %217 = vector.shape_cast %216 : vector<24xf32> to vector<24x1xf32>
    %cst_79 = arith.constant 2.560000e+02 : f32
    %218 = vector.broadcast %cst_79 : f32 to vector<24x1xf32>
    %219 = arith.divf %217, %218 : vector<24x1xf32>
    %220 = vector.broadcast %219 : vector<24x1xf32> to vector<24x256xf32>
    %221 = arith.subf %213, %220 : vector<24x256xf32>
    %222 = arith.mulf %221, %221 : vector<24x256xf32>
    %cst_80 = arith.constant dense<0.000000e+00> : vector<24xf32>
    %223 = vector.multi_reduction <add>, %222, %cst_80 [1] : vector<24x256xf32> to vector<24xf32>
    %224 = vector.shape_cast %223 : vector<24xf32> to vector<24x1xf32>
    %cst_81 = arith.constant 2.560000e+02 : f32
    %225 = vector.broadcast %cst_81 : f32 to vector<24x1xf32>
    %226 = arith.divf %224, %225 : vector<24x1xf32>
    %227 = vector.broadcast %219 : vector<24x1xf32> to vector<24x256xf32>
    %228 = arith.subf %213, %227 : vector<24x256xf32>
    %cst_82 = arith.constant 9.99999974E-6 : f32
    %229 = vector.broadcast %cst_82 : f32 to vector<24x1xf32>
    %230 = arith.addf %226, %229 : vector<24x1xf32>
    %231 = math.rsqrt %230 : vector<24x1xf32>
    %232 = vector.broadcast %231 : vector<24x1xf32> to vector<24x256xf32>
    %233 = arith.mulf %228, %232 : vector<24x256xf32>
    %234 = vector.broadcast %214 : vector<1x256xf32> to vector<24x256xf32>
    %235 = arith.mulf %233, %234 : vector<24x256xf32>
    %236 = vector.broadcast %215 : vector<1x256xf32> to vector<24x256xf32>
    %237 = arith.addf %235, %236 : vector<24x256xf32>
    %c0_83 = arith.constant 0 : index
    %c0_84 = arith.constant 0 : index
    %238 = vector.load %arg11[%c0_83, %c0_84] : memref<256x1024xbf16, #tpu.memory_space<vmem>>, vector<256x1024xbf16>
    %239 = arith.truncf %237 : vector<24x256xf32> to vector<24x256xbf16>
    %cst_85 = arith.constant dense<0.000000e+00> : vector<24x1024xf32>
    %240 = tpu.matmul %239, %238, %cst_85 {dimension_numbers = #tpu.dot_dimension_numbers<[1], [0], [0], [1], [0, 0, 1, 1], [], []>} : vector<24x256xbf16>, vector<256x1024xbf16>, vector<24x1024xf32> -> vector<24x1024xf32>
    %c0_86 = arith.constant 0 : index
    %c0_87 = arith.constant 0 : index
    %241 = vector.load %arg12[%c0_86, %c0_87] : memref<1x1024xf32, #tpu.memory_space<vmem>>, vector<1x1024xf32>
    %242 = vector.broadcast %241 : vector<1x1024xf32> to vector<24x1024xf32>
    %243 = arith.addf %240, %242 : vector<24x1024xf32>
    %cst_88 = arith.constant 5.000000e-01 : f32
    %244 = vector.broadcast %cst_88 : f32 to vector<24x1024xf32>
    %245 = arith.mulf %244, %243 : vector<24x1024xf32>
    %cst_89 = arith.constant 4.471500e-02 : f32
    %246 = vector.broadcast %cst_89 : f32 to vector<24x1024xf32>
    %247 = arith.mulf %246, %243 : vector<24x1024xf32>
    %248 = arith.mulf %247, %243 : vector<24x1024xf32>
    %249 = arith.mulf %248, %243 : vector<24x1024xf32>
    %250 = arith.addf %243, %249 : vector<24x1024xf32>
    %cst_90 = arith.constant 0.797884583 : f32
    %251 = vector.broadcast %cst_90 : f32 to vector<24x1024xf32>
    %252 = arith.mulf %251, %250 : vector<24x1024xf32>
    %253 = math.tanh %252 : vector<24x1024xf32>
    %cst_91 = arith.constant 1.000000e+00 : f32
    %254 = vector.broadcast %cst_91 : f32 to vector<24x1024xf32>
    %255 = arith.addf %254, %253 : vector<24x1024xf32>
    %256 = arith.mulf %245, %255 : vector<24x1024xf32>
    %c0_92 = arith.constant 0 : index
    %c0_93 = arith.constant 0 : index
    %257 = vector.load %arg13[%c0_92, %c0_93] : memref<1024x256xbf16, #tpu.memory_space<vmem>>, vector<1024x256xbf16>
    %258 = arith.truncf %256 : vector<24x1024xf32> to vector<24x1024xbf16>
    %cst_94 = arith.constant dense<0.000000e+00> : vector<24x256xf32>
    %259 = tpu.matmul %258, %257, %cst_94 {dimension_numbers = #tpu.dot_dimension_numbers<[1], [0], [0], [1], [0, 0, 1, 1], [], []>} : vector<24x1024xbf16>, vector<1024x256xbf16>, vector<24x256xf32> -> vector<24x256xf32>
    %c0_95 = arith.constant 0 : index
    %c0_96 = arith.constant 0 : index
    %260 = vector.load %arg14[%c0_95, %c0_96] : memref<1x256xf32, #tpu.memory_space<vmem>>, vector<1x256xf32>
    %261 = vector.broadcast %260 : vector<1x256xf32> to vector<24x256xf32>
    %262 = arith.addf %259, %261 : vector<24x256xf32>
    %263 = arith.addf %262, %237 : vector<24x256xf32>
    %c0_97 = arith.constant 0 : index
    %c0_98 = arith.constant 0 : index
    %264 = vector.load %arg15[%c0_97, %c0_98] : memref<1x256xf32, #tpu.memory_space<vmem>>, vector<1x256xf32>
    %c0_99 = arith.constant 0 : index
    %c0_100 = arith.constant 0 : index
    %265 = vector.load %arg16[%c0_99, %c0_100] : memref<1x256xf32, #tpu.memory_space<vmem>>, vector<1x256xf32>
    %cst_101 = arith.constant dense<0.000000e+00> : vector<24xf32>
    %266 = vector.multi_reduction <add>, %263, %cst_101 [1] : vector<24x256xf32> to vector<24xf32>
    %267 = vector.shape_cast %266 : vector<24xf32> to vector<24x1xf32>
    %cst_102 = arith.constant 2.560000e+02 : f32
    %268 = vector.broadcast %cst_102 : f32 to vector<24x1xf32>
    %269 = arith.divf %267, %268 : vector<24x1xf32>
    %270 = vector.broadcast %269 : vector<24x1xf32> to vector<24x256xf32>
    %271 = arith.subf %263, %270 : vector<24x256xf32>
    %272 = arith.mulf %271, %271 : vector<24x256xf32>
    %cst_103 = arith.constant dense<0.000000e+00> : vector<24xf32>
    %273 = vector.multi_reduction <add>, %272, %cst_103 [1] : vector<24x256xf32> to vector<24xf32>
    %274 = vector.shape_cast %273 : vector<24xf32> to vector<24x1xf32>
    %cst_104 = arith.constant 2.560000e+02 : f32
    %275 = vector.broadcast %cst_104 : f32 to vector<24x1xf32>
    %276 = arith.divf %274, %275 : vector<24x1xf32>
    %277 = vector.broadcast %269 : vector<24x1xf32> to vector<24x256xf32>
    %278 = arith.subf %263, %277 : vector<24x256xf32>
    %cst_105 = arith.constant 9.99999974E-6 : f32
    %279 = vector.broadcast %cst_105 : f32 to vector<24x1xf32>
    %280 = arith.addf %276, %279 : vector<24x1xf32>
    %281 = math.rsqrt %280 : vector<24x1xf32>
    %282 = vector.broadcast %281 : vector<24x1xf32> to vector<24x256xf32>
    %283 = arith.mulf %278, %282 : vector<24x256xf32>
    %284 = vector.broadcast %264 : vector<1x256xf32> to vector<24x256xf32>
    %285 = arith.mulf %283, %284 : vector<24x256xf32>
    %286 = vector.broadcast %265 : vector<1x256xf32> to vector<24x256xf32>
    %287 = arith.addf %285, %286 : vector<24x256xf32>
    %c0_106 = arith.constant 0 : index
    %c0_107 = arith.constant 0 : index
    %c0_108 = arith.constant 0 : index
    %288 = vector.load %arg17[%c0_106, %c0_107, %c0_108] : memref<1x24x256xf32, #tpu.memory_space<vmem>>, vector<1x24x256xf32>
    %289 = vector.shape_cast %288 : vector<1x24x256xf32> to vector<24x256xf32>
    %290 = vector.shape_cast %287 : vector<24x256xf32> to vector<1x24x256xf32>
    tpu.vector_store %arg17[%c0_106, %c0_107, %c0_108], %290 {strides = array<i32>} : memref<1x24x256xf32, #tpu.memory_space<vmem>>, vector<1x24x256xf32>,
    return
  }
  func.func @transform_0(%arg0: i32) -> (i32, i32, i32) {
    %c0_i32 = arith.constant 0 : i32
    %c0_i32_0 = arith.constant 0 : i32
    %c0_i32_1 = arith.constant 0 : i32
    return %arg0, %c0_i32, %c0_i32_0 : i32, i32, i32
  }
  func.func @transform_1(%arg0: i32) -> (i32, i32, i32) {
    %c0_i32 = arith.constant 0 : i32
    %c0_i32_0 = arith.constant 0 : i32
    %c0_i32_1 = arith.constant 0 : i32
    return %arg0, %c0_i32, %c0_i32_0 : i32, i32, i32
  }
  func.func @transform_2(%arg0: i32) -> (i32, i32) {
    %c0_i32 = arith.constant 0 : i32
    %c0_i32_0 = arith.constant 0 : i32
    %c0_i32_1 = arith.constant 0 : i32
    return %c0_i32, %c0_i32_0 : i32, i32
  }
  func.func @transform_3(%arg0: i32) -> (i32, i32) {
    %c0_i32 = arith.constant 0 : i32
    %c0_i32_0 = arith.constant 0 : i32
    %c0_i32_1 = arith.constant 0 : i32
    return %c0_i32, %c0_i32_0 : i32, i32
  }
  func.func @transform_4(%arg0: i32) -> (i32, i32) {
    %c0_i32 = arith.constant 0 : i32
    %c0_i32_0 = arith.constant 0 : i32
    %c0_i32_1 = arith.constant 0 : i32
    return %c0_i32, %c0_i32_0 : i32, i32
  }
  func.func @transform_5(%arg0: i32) -> (i32, i32) {
    %c0_i32 = arith.constant 0 : i32
    %c0_i32_0 = arith.constant 0 : i32
    %c0_i32_1 = arith.constant 0 : i32
    return %c0_i32, %c0_i32_0 : i32, i32
  }
  func.func @transform_6(%arg0: i32) -> (i32, i32) {
    %c0_i32 = arith.constant 0 : i32
    %c0_i32_0 = arith.constant 0 : i32
    %c0_i32_1 = arith.constant 0 : i32
    return %c0_i32, %c0_i32_0 : i32, i32
  }
  func.func @transform_7(%arg0: i32) -> (i32, i32) {
    %c0_i32 = arith.constant 0 : i32
    %c0_i32_0 = arith.constant 0 : i32
    %c0_i32_1 = arith.constant 0 : i32
    return %c0_i32, %c0_i32_0 : i32, i32
  }
  func.func @transform_8(%arg0: i32) -> (i32, i32) {
    %c0_i32 = arith.constant 0 : i32
    %c0_i32_0 = arith.constant 0 : i32
    %c0_i32_1 = arith.constant 0 : i32
    return %c0_i32, %c0_i32_0 : i32, i32
  }
  func.func @transform_9(%arg0: i32) -> (i32, i32) {
    %c0_i32 = arith.constant 0 : i32
    %c0_i32_0 = arith.constant 0 : i32
    %c0_i32_1 = arith.constant 0 : i32
    return %c0_i32, %c0_i32_0 : i32, i32
  }
  func.func @transform_10(%arg0: i32) -> (i32, i32) {
    %c0_i32 = arith.constant 0 : i32
    %c0_i32_0 = arith.constant 0 : i32
    %c0_i32_1 = arith.constant 0 : i32
    return %c0_i32, %c0_i32_0 : i32, i32
  }
  func.func @transform_11(%arg0: i32) -> (i32, i32) {
    %c0_i32 = arith.constant 0 : i32
    %c0_i32_0 = arith.constant 0 : i32
    %c0_i32_1 = arith.constant 0 : i32
    return %c0_i32, %c0_i32_0 : i32, i32
  }
  func.func @transform_12(%arg0: i32) -> (i32, i32) {
    %c0_i32 = arith.constant 0 : i32
    %c0_i32_0 = arith.constant 0 : i32
    %c0_i32_1 = arith.constant 0 : i32
    return %c0_i32, %c0_i32_0 : i32, i32
  }
  func.func @transform_13(%arg0: i32) -> (i32, i32) {
    %c0_i32 = arith.constant 0 : i32
    %c0_i32_0 = arith.constant 0 : i32
    %c0_i32_1 = arith.constant 0 : i32
    return %c0_i32, %c0_i32_0 : i32, i32
  }
  func.func @transform_14(%arg0: i32) -> (i32, i32) {
    %c0_i32 = arith.constant 0 : i32
    %c0_i32_0 = arith.constant 0 : i32
    %c0_i32_1 = arith.constant 0 : i32
    return %c0_i32, %c0_i32_0 : i32, i32
  }
  func.func @transform_15(%arg0: i32) -> (i32, i32) {
    %c0_i32 = arith.constant 0 : i32
    %c0_i32_0 = arith.constant 0 : i32
    %c0_i32_1 = arith.constant 0 : i32
    return %c0_i32, %c0_i32_0 : i32, i32
  }
  func.func @transform_16(%arg0: i32) -> (i32, i32, i32) {
    %c0_i32 = arith.constant 0 : i32
    %c0_i32_0 = arith.constant 0 : i32
    %c0_i32_1 = arith.constant 0 : i32
    return %arg0, %c0_i32, %c0_i32_0 : i32, i32, i32
  }
}

</mosaic_0001>

<bundles_post_ra>
// kernel: tpu_custom_call.1
= control target key start
LH: loop header
LB: loop body
LE: loop exit
PB: predicated region body
PF: predicated region fallthrough
CT: control target
= control target key end

     0   :  { %s9596_s0 = inlined_call_operand.hbm [shape: f32[2,8,256], index: 0, kind: input, shape index: {}]   ;;  %s9597_s1 = inlined_call_operand.hbm [shape: f32[2,1,8], index: 1, kind: input, shape index: {}]   ;;  %s9598_s2 = inlined_call_operand.hbm [shape: f32[3,256], index: 2, kind: input, shape index: {}]   ;;  %s9599_s3 = inlined_call_operand.hbm [shape: bf16[256,256], index: 3, kind: input, shape index: {}]   ;;  %s9600_s4 = inlined_call_operand.hbm [shape: bf16[256,512], index: 4, kind: input, shape index: {}]   ;;  %s9601_s5 = inlined_call_operand.vmem [shape: f32[1,512], index: 5, kind: input, shape index: {}]   ;;  %s9602_s6 = inlined_call_operand.hbm [shape: bf16[256,256], index: 6, kind: input, shape index: {}]   ;;  %s9603_s7 = inlined_call_operand.vmem [shape: f32[1,256], index: 7, kind: input, shape index: {}]   ;;  %s9604_s8 = inlined_call_operand.vmem [shape: f32[1,256], index: 8, kind: input, shape index: {}]   ;;  %s9605_s9 = inlined_call_operand.hbm [shape: f32[1,256], index: 9, kind: input, shape index: {}]   ;;  %s9606_s10 = inlined_call_operand.hbm [shape: bf16[256,1024], index: 10, kind: input, shape index: {}]   ;;  %s9607_s11 = inlined_call_operand.vmem [shape: f32[1,1024], index: 11, kind: input, shape index: {}]   ;;  %s9608_s12 = inlined_call_operand.hbm [shape: bf16[1024,256], index: 12, kind: input, shape index: {}]   ;;  %s9609_s13 = inlined_call_operand.vmem [shape: f32[1,256], index: 13, kind: input, shape index: {}]   ;;  %s9610_s14 = inlined_call_operand.vmem [shape: f32[1,256], index: 14, kind: input, shape index: {}]   ;;  %s9611_s15 = inlined_call_operand.vmem [shape: f32[1,256], index: 15, kind: input, shape index: {}]   ;;  %s9612_s16 = inlined_call_operand.hbm [shape: f32[2,24,256], index: 16, kind: output, shape index: {}]  }
   0x1   :  { %9624 = sst [smem:[#allocation28_spill]] %s9596_s0 }
   0x2   :  { %9625 = sst [smem:[#allocation29_spill]] %s9598_s2 }
   0x3   :  { %9626 = sst [smem:[#allocation30_spill]] %s9599_s3 }
   0x4   :  { %9627 = sst [smem:[#allocation31_spill]] %s9600_s4 }
   0x5   :  { %9628 = sst [smem:[#allocation32_spill]] %s9602_s6 }
   0x6   :  { %9629 = sst [smem:[#allocation33_spill]] %s9605_s9 }
   0x7   :  { %9630 = sst [smem:[#allocation34_spill]] %s9606_s10 }
   0x8   :  { %9631 = sst [smem:[#allocation35_spill]] %s9608_s12 }
   0x9   :  { %9632 = sst [smem:[#allocation36_spill]] %s9612_s16 }
   0xa   :  { %21 = vsyncpa [#allocation3], 0 }
   0xb   :  { %23 = vsyncpa [#allocation3 + $0x1], 0 }
   0xc   :  { %24 = vsyncpa [#allocation6], 0 }
   0xd   :  { %26 = vsyncpa [#allocation6 + $0x1], 0 }
   0xe   :  { %27 = vsyncpa [#allocation9], 0 }
   0xf   :  { %28 = vsyncpa [#allocation12], 0 }
  0x10   :  { %29 = vsyncpa [#allocation15], 0 }
  0x11   :  { %30 = vsyncpa [#allocation4], 0 }
  0x12   :  { %32 = vsyncpa [#allocation4 + $0x1], 0  ;;  %s8413_s21 = smov 0   ;;  %s8415_s22 = smov 0  }
  0x13   :  { %s8417_s23 = smov 0   ;;  %s8419_s24 = smov 0  }
  0x14 LB: > { %9633 = sst [smem:[#allocation25_spill]] %s8298_s23  ;;  %s8304_s25 = smov [#allocation7]   ;;  %s8302_s24 = sphi %s8419_s24, %s9669_s24   ;;  %s8298_s23 = sphi %s8417_s23, %s9674_s23   ;;  %s8294_s22 = sphi %s8415_s22, %s9673_s22   ;;  %s8290_s21 = sphi %s8413_s21, %s9672_s21  }
  0x15   : > { %s428_s26 = sshll.u32 %s8304_s25, 4  ;;  %s8434_s27 = sadd.s32 4294967295, %s8302_s24   ;;  %s429_s26 = int_to_ptr.vmem [resolvable:$true] %s428_s26 }
  0x16   : > { %p6577_p0 = scmp.ge.s32.totalorder %s8302_s24, 1  ;;  %p9617_p1 = scmp.eq.s32.totalorder %s8434_s27, 0 }
  0x17   : > { %p415_p2 = scmp.lt.s32.totalorder %s8302_s24, 3  ;;  %s8305_s29 = smov [#allocation8]  }
  0x18   : > { %s438_s30 = sshll.u32 %s8305_s29, 4  ;;  %s8306_s17 = smov [#allocation11]   ;;  %s8446_s30 = int_to_ptr.vmem [resolvable:$true] %s438_s30 }
  0x19   : > { %p8439_p3 = pnand %p6577_p0, %p415_p2  ;;  %s467_s18 = sshll.u32 %s8306_s17, 4  ;;  %s8454_s18 = int_to_ptr.vmem [resolvable:$true] %s467_s18 }
  0x1a   : > { %s7991_s20 = scalar_lea.vmem %s429_s26, 128  ;;  %p7999_p11 = scmp.lt.s32.totalorder %s429_s26, %s429_s26 }
  0x1b   : > { %s9634_s28 = scalar_select %p8439_p3, 1, 0 }
  0x1c   : > { %p7336_p5 = pneg %p8439_p3  ;;  %p7992_p8 = scmp.ne.s32.totalorder %s429_s26, %s7991_s20 }
  0x1d   : > { %p8000_p12 = scmp.lt.s32.totalorder %s7991_s20, %s7991_s20 }
  0x1e   : > { %p8450_p6 = pnand %p7336_p5, %p9617_p1 }
  0x1f   : > { %p8001_p13 = por %p8000_p12, %p7999_p11 }
  0x20   : > { %p8458_p7 = pneg %p8450_p6 }
  0x22   : > { %p7994_p9 = pnand %p7992_p8, %p8458_p7 }
  0x24   : > { %p7995_p10 = pneg %p7994_p9 }
  0x26   : > { %p8002_p0 = pnand %p8001_p13, %p7995_p10 }
  0x28   : > { %8005 = shalt.err (!%p8002_p0)
}
  0x29   : > { %s9637_s2 = sld [smem:[#allocation29_spill]]  ;;  %s8017_s17 = scalar_lea.vmem %s8446_s30, 4096 }
  0x2a   : > { %p8018_p2 = scmp.ne.s32.totalorder %s8446_s30, %s8017_s17  ;;  %p8025_p9 = scmp.lt.s32.totalorder %s8446_s30, %s8446_s30 }
  0x2b   : > { %p8026_p11 = scmp.lt.s32.totalorder %s8017_s17, %s8017_s17 }
  0x2c   : > { %p8020_p5 = pnand %p8018_p2, %p8458_p7 }
  0x2d   : > { %p8027_p10 = por %p8026_p11, %p8025_p9 }
  0x2e   : > { %p8021_p8 = pneg %p8020_p5 }
  0x2f   : > { %7339 = dma.hbm_to_vmem [thread:$0]  (!%p8450_p6), %s9637_s2, 128, %s429_s26, [#allocation6]  }
  0x30   : > { %p8028_p12 = pnand %p8027_p10, %p8021_p8 }
  0x32   : > { %8031 = shalt.err (!%p8028_p12)
}
  0x33   : > { %s9615_s20 = smov 128   ;;  %s9616_s25 = smov 8  }
  0x34   : > { %s9638_s3 = sld [smem:[#allocation30_spill]]  ;;  %s8043_s17 = scalar_lea.vmem %s8454_s18, 4096 }
  0x35   : > { %p8044_p13 = scmp.ne.s32.totalorder %s8454_s18, %s8043_s17  ;;  %p8051_p5 = scmp.lt.s32.totalorder %s8454_s18, %s8454_s18 }
  0x36   : > { %p8052_p8 = scmp.lt.s32.totalorder %s8043_s17, %s8043_s17 }
  0x37   : > { %p8046_p0 = pnand %p8044_p13, %p8458_p7 }
  0x38   : > { %p8053_p9 = por %p8052_p8, %p8051_p5 }
  0x39   : > { %p8047_p2 = pneg %p8046_p0 }
  0x3a   : > { %7342 = dma.hbm_to_vmem [thread:$0]  (!%p8450_p6), %s9638_s3, 4096, %s8446_s30, [#allocation9], %s9615_s20, %s9615_s20, %s9616_s25  }
  0x3b   : > { %p8054_p11 = pnand %p8053_p9, %p8047_p2 }
  0x3d   : > { %8057 = shalt.err (!%p8054_p11)
}
  0x3e   : > { %s9639_s6 = sld [smem:[#allocation32_spill]]  ;;  %s8309_s30 = smov [#allocation14]  }
  0x3f   : > { %s497_s29 = sshll.u32 %s8309_s30, 4  ;;  %s498_s29 = int_to_ptr.vmem [resolvable:$true] %s497_s29 }
  0x40   : > { %s8069_s3 = scalar_lea.vmem %s498_s29, 16384  ;;  %p8077_p0 = scmp.lt.s32.totalorder %s498_s29, %s498_s29 }
  0x41   : > { %p8070_p10 = scmp.ne.s32.totalorder %s498_s29, %s8069_s3  ;;  %p8078_p2 = scmp.lt.s32.totalorder %s8069_s3, %s8069_s3 }
  0x43   : > { %p8072_p12 = pnand %p8070_p10, %p8458_p7  ;;  %p8079_p5 = por %p8078_p2, %p8077_p0 }
  0x44   : > { %7348 = dma.hbm_to_vmem [thread:$0]  (!%p8450_p6), %s9639_s6, 4096, %s8454_s18, [#allocation12], %s9615_s20, %s9615_s20, %s9616_s25  }
  0x45   : > { %p8073_p13 = pneg %p8072_p12 }
  0x47   : > { %p8080_p8 = pnand %p8079_p5, %p8073_p13 }
  0x49   : > { %8083 = shalt.err (!%p8080_p8)
}
  0x4a   : > { %s8310_s17 = smov 512   ;;  %s8311_s16 = smov 32  }
  0x4b   : > { %s9640_s10 = sld [smem:[#allocation34_spill]]  ;;  %s8312_s26 = smov [#allocation10]  }
  0x4c   : > { %s451_s30 = sshll.u32 %s8312_s26, 4  ;;  %s452_s30 = int_to_ptr.vmem [resolvable:$true] %s451_s30 }
  0x4d   : > { %s8095_s20 = scalar_lea.vmem %s452_s30, 8192  ;;  %p8103_p12 = scmp.lt.s32.totalorder %s452_s30, %s452_s30 }
  0x4e   : > { %p8096_p9 = scmp.ne.s32.totalorder %s452_s30, %s8095_s20  ;;  %p8104_p13 = scmp.lt.s32.totalorder %s8095_s20, %s8095_s20 }
  0x50   : > { %p8098_p11 = pnand %p8096_p9, %p8458_p7  ;;  %p8105_p0 = por %p8104_p13, %p8103_p12 }
  0x51   : > { %7354 = dma.hbm_to_vmem [thread:$0]  (!%p8450_p6), %s9640_s10, 16384, %s498_s29, [#allocation15], %s8310_s17, %s8310_s17, %s8311_s16  }
  0x52   : > { %p8099_p10 = pneg %p8098_p11 }
  0x54   : > { %p8106_p2 = pnand %p8105_p0, %p8099_p10 }
  0x56   : > { %8109 = shalt.err (!%p8106_p2)
}
  0x57   : > { %s8313_s3 = smov 256   ;;  %s8314_s25 = smov 16  }
  0x58   : > { %s9641_s4 = sld [smem:[#allocation31_spill]]  ;;  %s8315_s29 = smov [#allocation13]  }
  0x59   : > { %s487_s17 = sshll.u32 %s8315_s29, 4  ;;  %s8316_s18 = smov [#allocation16]   ;;  %s488_s17 = int_to_ptr.vmem [resolvable:$true] %s487_s17 }
  0x5a   : > { %s513_s26 = sshll.u32 %s8316_s18, 4  ;;  %s8121_s6 = scalar_lea.vmem %s488_s17, 32  ;;  %s514_s26 = int_to_ptr.vmem [resolvable:$true] %s513_s26 }
  0x5b   : > { %p8122_p5 = scmp.ne.s32.totalorder %s488_s17, %s8121_s6  ;;  %p8129_p11 = scmp.lt.s32.totalorder %s488_s17, %s488_s17 }
  0x5c   : > { %p8130_p10 = scmp.lt.s32.totalorder %s8121_s6, %s8121_s6 }
  0x5d   : > { %p8124_p8 = pnand %p8122_p5, %p8458_p7 }
  0x5e   : > { %7345 = dma.hbm_to_vmem [thread:$0]  (!%p8450_p6), %s9641_s4, 8192, %s452_s30, [#allocation9], %s8313_s3, %s8313_s3, %s8314_s25  }
  0x5f   : > { %p8125_p9 = pneg %p8124_p8  ;;  %p8131_p12 = por %p8130_p10, %p8129_p11 }
  0x61   : > { %p8132_p13 = pnand %p8131_p12, %p8125_p9 }
  0x63   : > { %8135 = shalt.err (!%p8132_p13)
}
  0x64   : > { %s9642_s9 = sld [smem:[#allocation33_spill]]  ;;  %s8147_s25 = scalar_lea.vmem %s514_s26, 16384 }
  0x65   : > { %p8148_p0 = scmp.ne.s32.totalorder %s514_s26, %s8147_s25  ;;  %p8155_p5 = scmp.lt.s32.totalorder %s514_s26, %s514_s26 }
  0x66   : > { %p8156_p8 = scmp.lt.s32.totalorder %s8147_s25, %s8147_s25 }
  0x67   : > { %p8150_p2 = pnand %p8148_p0, %p8458_p7 }
  0x68   : > { %p8157_p1 = por %p8156_p8, %p8155_p5 }
  0x69   : > { %p8151_p4 = pneg %p8150_p2 }
  0x6a   : > { %7351 = dma.hbm_to_vmem [thread:$0]  (!%p8450_p6), %s9642_s9, 32, %s488_s17, [#allocation12]  }
  0x6b   : > { %p8158_p3 = pnand %p8157_p1, %p8151_p4 }
  0x6d   : > { %8161 = shalt.err (!%p8158_p3)
}
  0x6e   : > { %s9643_s6 = smov 8   ;;  %s9644_s30 = smov 128  }
  0x6f   : > { %s9645_s12 = sld [smem:[#allocation35_spill]]  ;;  %s6576_s0 = sadd.s32 4294967294, %s8302_s24  }
  0x70   : > { %s8532_s19 = sadd.s32 1, %s8302_s24   ;;  %s45_s29 = sadd.s32 1, %s8298_s23 }
  0x71   : > { %9646 = sst [smem:[#allocation26_spill]] %s8532_s19  ;;  %s42_s17 = ssub.s32 %s8302_s24, %s8532_s19 }
  0x72   : > { %p52_p1 = scmp.ne.s32.totalorder %s8298_s23, %s8294_s22  ;;  %p43_p3 = scmp.eq.s32.totalorder %s42_s17, 0 }
  0x73   : > { %p53_p4 = scmp.eq.s32.totalorder %s8302_s24, 0  ;;  %p58_p7 = scmp.ne.s32.totalorder %s8294_s22, %s8290_s21 }
  0x74   : > { %p402_p9 = scmp.eq.s32.totalorder %s8434_s27, 1  ;;  %p9648_p10 = scmp.eq.s32.totalorder %s8434_s27, 0 }
  0x75   : > { %7357 = dma.hbm_to_vmem [thread:$0]  (!%p8450_p6), %s9645_s12, 16384, %s514_s26, [#allocation15], %s9644_s30, %s9644_s30, %s9643_s6  }
  0x76   : > { %s8544_s18 = scalar_select %p43_p3, %s8298_s23, %s45_s29  }
  0x77   : > { %p54_p11 = por %p53_p4, %p52_p1  ;;  %p8548_p12 = por %p9648_p10, %p58_p7 }
  0x78   : > { %9647 = sst [smem:[#allocation27_spill]] %s8544_s18  ;;  %p8552_p6 = por %p402_p9, %p52_p1 }
  0x79   : > { %s9649_s26 = scalar_select %p8548_p12, 1, 0 }
  0x7a   : > { %s9650_s20 = scalar_select %p8552_p6, 1, 0 }
  0x7b   : > { %p408_p13 = scmp.eq.s32.totalorder %s6576_s0, 1  ;;  %p7376_p0 = scmp.lt.s32.totalorder %s8302_s24, 2 }
  0x7c   : > { %s8558_s2 = sand.u32 1, %s8298_s23   ;;  %s7059_s30 = sshll.u32 %s8302_s24, 8 }
  0x7d   : > { %p8560_p2 = por %p408_p13, %p58_p7  ;;  %s6586_s6 = sshll.u32 %s8558_s2, 4 }
  0x7e   : > { %s9652_s29 = sld [smem:[#allocation28_spill]]  ;;  %s540_s0 = scalar_lea.vmem [#allocation2], %s6586_s6 }
  0x7f   : > { %s9651_s25 = scalar_select %p8560_p2, 1, 0 }
  0x80   : > { %s548_s4 = sshll.u32 %s540_s0, 4  ;;  %p8571_p5 = pnand %p7376_p0, %p54_p11  ;;  %s549_s4 = int_to_ptr.vmem [resolvable:$true] %s548_s4 }
  0x81   : > { %s537_s12 = scalar_lea.sflag [#allocation3], %s8558_s2 }
  0x82   : > { %p8164_p1 = pneg %p8571_p5 }
  0x84   : > { %s8569_s17 = scalar_lea.hbm %s9652_s29, %s7059_s30  ;;  %s8167_s3 = scalar_lea.hbm %s9652_s29, 512 }
  0x85   : > { %s8162_s18 = scalar_lea.hbm %s8569_s17, 256  ;;  %p8168_p7 = scmp.lt.s32.totalorder %s8569_s17, %s9652_s29 }
  0x86   : > { %p8163_p8 = scmp.ne.s32.totalorder %s8569_s17, %s8162_s18  ;;  %p8169_p9 = scmp.lt.s32.totalorder %s8167_s3, %s8162_s18 }
  0x88   : > { %p8165_p3 = pnand %p8164_p1, %p8163_p8  ;;  %p8170_p11 = por %p8169_p9, %p8168_p7 }
  0x8a   : > { %p8166_p4 = pneg %p8165_p3 }
  0x8c   : > { %p8171_p10 = pnand %p8170_p11, %p8166_p4 }
  0x8e   : > { %8174 = shalt.err (!%p8171_p10)
}
  0x8f   : > { %s8175_s10 = scalar_lea.vmem %s549_s4, 256  ;;  %s8317_s23 = smov [#allocation2]  }
  0x90   : > { %p8176_p13 = scmp.ne.s32.totalorder %s549_s4, %s8175_s10  ;;  %s8180_s19 = sshll.u32 %s8317_s23, 4  ;;  %s8181_s19 = int_to_ptr.vmem [resolvable:$false] %s8180_s19 }
  0x91   : > { %s8182_s30 = scalar_lea.vmem %s8181_s19, 512  ;;  %p8183_p3 = scmp.lt.s32.totalorder %s549_s4, %s8181_s19 }
  0x92   : > { %p8178_p0 = pnand %p8176_p13, %p8164_p1  ;;  %p8184_p2 = scmp.lt.s32.totalorder %s8182_s30, %s8175_s10 }
  0x94   : > { %p8179_p8 = pneg %p8178_p0  ;;  %p8185_p6 = por %p8184_p2, %p8183_p3 }
  0x96   : > { %p8186_p12 = pnand %p8185_p6, %p8179_p8 }
  0x98   : > { %8189 = shalt.err (!%p8186_p12)
}
  0x99   : > { %7361 = dma.hbm_to_vmem [thread:$0]  (!%p8571_p5), %s8569_s17, 256, %s549_s4, %s537_s12  }
  0x9a   : > { %s6589_s18 = sshll.u32 %s8302_s24, 4  ;;  %s558_s10 = scalar_lea.vmem [#allocation5], %s8558_s2 }
  0x9b   : > { %s8601_s23 = scalar_lea.hbm %s9597_s1, %s6589_s18  ;;  %s565_s19 = sshll.u32 %s558_s10, 4  ;;  %s566_s19 = int_to_ptr.vmem [resolvable:$true] %s565_s19 }
  0x9c   : > { %s9654_s16 = sand.u32 1, %s8302_s24   ;;  %s8190_s30 = scalar_lea.hbm %s8601_s23, 16 }
  0x9d   : > { %s556_s0 = scalar_lea.sflag [#allocation6], %s9654_s16  ;;  %p8191_p12 = scmp.ne.s32.totalorder %s8601_s23, %s8190_s30 }
  0x9e   : > { %s8195_s17 = scalar_lea.hbm %s9597_s1, 32  ;;  %p8196_p4 = scmp.lt.s32.totalorder %s8601_s23, %s9597_s1 }
  0x9f   : > { %p8193_p6 = pnand %p8191_p12, %p8164_p1  ;;  %p8197_p7 = scmp.lt.s32.totalorder %s8195_s17, %s8190_s30 }
  0xa1   : > { %p8194_p2 = pneg %p8193_p6  ;;  %p8198_p9 = por %p8197_p7, %p8196_p4 }
  0xa3   : > { %p8199_p11 = pnand %p8198_p9, %p8194_p2 }
  0xa5   : > { %8202 = shalt.err (!%p8199_p11)
}
  0xa6   : > { %s8203_s2 = scalar_lea.vmem %s566_s19, 16  ;;  %s8318_s3 = smov [#allocation5]  }
  0xa7   : > { %p8204_p10 = scmp.ne.s32.totalorder %s566_s19, %s8203_s2  ;;  %s8208_s10 = sshll.u32 %s8318_s3, 4  ;;  %s8209_s10 = int_to_ptr.vmem [resolvable:$false] %s8208_s10 }
  0xa8   : > { %s8210_s16 = scalar_lea.vmem %s8209_s10, 32  ;;  %p8211_p8 = scmp.lt.s32.totalorder %s566_s19, %s8209_s10 }
  0xa9   : > { %p8206_p13 = pnand %p8204_p10, %p8164_p1  ;;  %p8212_p3 = scmp.lt.s32.totalorder %s8210_s16, %s8203_s2 }
  0xab   : > { %p8207_p0 = pneg %p8206_p13  ;;  %p8213_p12 = por %p8212_p3, %p8211_p8 }
  0xad   : > { %p8214_p6 = pnand %p8213_p12, %p8207_p0 }
  0xaf   : > { %8217 = shalt.err (!%p8214_p6)
}
  0xb0   : > { %7364 = dma.hbm_to_vmem [thread:$0]  (!%p8571_p5), %s8601_s23, 16, %s566_s19, %s556_s0  }
  0xb1   : > { %p9655_p2 = scmp.ne.s32.totalorder %s9634_s28, 0 }
  0xb2   : > { %s8627_s30 = sand.u32 (!%p9655_p2), 1, %s8294_s22   ;;  %p9656_p1 = scmp.ne.s32.totalorder (!%p9655_p2), %s9649_s26, 0 }
  0xb3   : > { %574 = sbr.rel (%p9655_p2) target bundleno = 6416 (0x1910), region = 84  ;;  %s6591_s4 = sshll.u32 (!%p9655_p2), %s8627_s30, 4 }
  0xb4   : > { %s577_s12 = scalar_lea.sflag (!%p9655_p2), [#allocation3], %s8627_s30  ;;  %s8631_s17 = scalar_lea.vmem (!%p9655_p2), [#allocation2], %s6591_s4 }
  0xb8   : > { %8261 = dma.done.wait (%p9656_p1), %s577_s12, 256  }
  0xb9   : > { %8263 = vsyncadd (%p9656_p1), %s577_s12, 4294967040  ;;  %s585_s9 = sand.u32 1, %s8434_s27   ;;  %s588_s23 = scalar_lea.vmem [#allocation5], %s8627_s30 }
  0xba   : > { %s586_s28 = scalar_lea.sflag [#allocation6], %s585_s9 }
  0xbb   : > { %8265 = dma.done.wait (%p9656_p1), %s586_s28, 16  }
  0xbc   : > { %8267 = vsyncadd (%p9656_p1), %s586_s28, 4294967280  ;;  %p9657_p5 = scmp.eq.s32.totalorder %s8434_s27, 0 }
  0xbe   : > { %8269 = dma.done.wait (%p9657_p5), [#allocation6], 128   ;;  %p9658_p4 = pmov %p9657_p5 }
  0xc0   : > { %8271 = vsyncadd (%p9658_p4), [#allocation6], 4294967168  ;;  %p9659_p7 = pmov %p9658_p4 }
  0xc1   : > { %p9660_p9 = pmov %p9658_p4 }
  0xc2   : > { %8273 = dma.done.wait (%p9659_p7), [#allocation9], 12288  }
  0xc3   : > { %8275 = vsyncadd (%p9660_p9), [#allocation9], 4294955008  ;;  %p9661_p11 = pmov %p9658_p4 }
  0xc4   : > { %p9662_p10 = pmov %p9658_p4 }
  0xc5   : > { %8277 = dma.done.wait (%p9661_p11), [#allocation12], 4128  }
  0xc6   : > { %8279 = vsyncadd (%p9662_p10), [#allocation12], 4294963168  ;;  %p9663_p13 = pmov %p9658_p4 }
  0xc7   : > { %p9664_p0 = pmov %p9658_p4 }
  0xc8   : > { %8281 = dma.done.wait (%p9663_p13), [#allocation15], 32768  }
  0xc9   : > { %8283 = vsyncadd (%p9664_p0), [#allocation15], 4294934528  ;;  %v7438_v0 = vld [vmem:[#allocation8 + $0x74] ss:$8 sps:$4 sm:$0xff]   ;;  %v7442_v2 = vld [vmem:[#allocation8 + $0x70] ss:$8 sps:$4 sm:$0xff]  }
  0xca   : > { %v7440_v1 = vld [vmem:[#allocation10 + $0xe4] ss:$16 sps:$4 sm:$0xff]   ;;  %868 = vmatprep.subr.bf16.mxu0 %v7438_v0  ;;  %v7443_v3 = vld [vmem:[#allocation10 + $0xe0] ss:$16 sps:$4 sm:$0xff]   ;;  %vm8320_vm0 = vmmov 0   ;;  %vm1458_vm1 = vcmask 261120  }
  0xcb   : > { %1376 = vmatprep.subr.bf16.mxu1 %v7440_v1  ;;  %v7444_v4 = vld [vmem:[#allocation8 + $0x64] ss:$8 sps:$4 sm:$0xff]   ;;  %869 = vmatpush1.bf16.msra.mxu0 %v7442_v2  ;;  %v7448_v6 = vld [vmem:[#allocation8 + $0x60] ss:$8 sps:$4 sm:$0xff]   ;;  %v7450_v8 = vld [vmem:[#allocation8 + $0x54] ss:$8 sps:$4 sm:$0xff]  }
  0xcc   : > { %1377 = vmatpush1.bf16.msra.mxu1 %v7443_v3  ;;  %v7446_v5 = vld [vmem:[#allocation10 + $0xc4] ss:$16 sps:$4 sm:$0xff]   ;;  %870 = vmatprep.subr.bf16.mxu0 %v7444_v4  ;;  %v7449_v7 = vld [vmem:[#allocation10 + $0xc0] ss:$16 sps:$4 sm:$0xff]   ;;  %v8319_v4 = vmov 0.0   ;;  %vm1563_vm2 = vcmask 64512  }
  0xcd   : > { %1378 = vmatprep.subr.bf16.mxu1 %v7446_v5  ;;  %v7452_v9 = vld [vmem:[#allocation10 + $0xa4] ss:$16 sps:$4 sm:$0xff]   ;;  %v7454_v10 = vld [vmem:[#allocation8 + $0x50] ss:$8 sps:$4 sm:$0xff]   ;;  %v7460_v14 = vld [vmem:[#allocation8 + $0x40] ss:$8 sps:$4 sm:$0xff]   ;;  %v910_v5 = vlaneseq }
  0xce   : > { %v7455_v11 = vld [vmem:[#allocation10 + $0xa0] ss:$16 sps:$4 sm:$0xff]   ;;  %v7456_v12 = vld [vmem:[#allocation8 + $0x44] ss:$8 sps:$4 sm:$0xff]   ;;  %v7462_v16 = vld [vmem:[#allocation8 + $0x34] ss:$8 sps:$4 sm:$0xff]  }
  0xcf   : > { %871 = vmatpush1.bf16.msra.mxu0 %v7448_v6  ;;  %v7458_v13 = vld [vmem:[#allocation10 + $0x84] ss:$16 sps:$4 sm:$0xff]   ;;  %v7461_v15 = vld [vmem:[#allocation10 + $0x80] ss:$16 sps:$4 sm:$0xff]   ;;  %v8668_v6 = vshrl.u32 %v910_v5, 7  ;;  %s8321_s0 = smov 96  }
  0xd0   : > { %1379 = vmatpush1.bf16.msra.mxu1 %v7449_v7  ;;  %872 = vmatprep.subr.bf16.mxu0 %v7450_v8  ;;  %v7464_v17 = vld [vmem:[#allocation10 + $0x64] ss:$16 sps:$4 sm:$0xff]   ;;  %v7466_v18 = vld [vmem:[#allocation8 + $0x30] ss:$8 sps:$4 sm:$0xff]   ;;  %v7472_v22 = vld [vmem:[#allocation8 + $0x20] ss:$8 sps:$4 sm:$0xff]  }
  0xd1   : > { %1380 = vmatprep.subr.bf16.mxu1 %v7452_v9  ;;  %v7467_v19 = vld [vmem:[#allocation10 + $0x60] ss:$16 sps:$4 sm:$0xff]   ;;  %v7468_v20 = vld [vmem:[#allocation8 + $0x24] ss:$8 sps:$4 sm:$0xff]   ;;  %v7474_v24 = vld [vmem:[#allocation8 + $0x14] ss:$8 sps:$4 sm:$0xff]  }
  0xd2   : > { %v7470_v21 = vld [vmem:[#allocation10 + $0x44] ss:$16 sps:$4 sm:$0xff]   ;;  %v7473_v23 = vld [vmem:[#allocation10 + $0x40] ss:$16 sps:$4 sm:$0xff]   ;;  %v8671_v7 = vsub.s32 0, %v8668_v6  ;;  %v916_v9 = vsub.s32 4, %v8668_v6 }
  0xd3   : > { %873 = vmatpush1.bf16.msra.mxu0 %v7454_v10  ;;  %v7476_v25 = vld [vmem:[#allocation10 + $0x24] ss:$16 sps:$4 sm:$0xff]   ;;  %v7478_v26 = vld [vmem:[#allocation8 + $0x10] ss:$8 sps:$4 sm:$0xff]   ;;  %v7484_v30 = vld [vmem:[#allocation8] ss:$8 sps:$4 sm:$0xff]  }
  0xd4   : > { %1381 = vmatpush1.bf16.msra.mxu1 %v7455_v11  ;;  %874 = vmatprep.subr.bf16.mxu0 %v7456_v12  ;;  %v7479_v27 = vld [vmem:[#allocation10 + $0x20] ss:$16 sps:$4 sm:$0xff]   ;;  %v7480_v28 = vld [vmem:[#allocation8 + $0x4] ss:$8 sps:$4 sm:$0xff]   ;;  %v7486_v32 = vld [vmem:[#allocation8 + $0xf4] ss:$8 sps:$4 sm:$0xff]  }
  0xd5   : > { %1382 = vmatprep.subr.bf16.mxu1 %v7458_v13  ;;  %v7482_v29 = vld [vmem:[#allocation10 + $0x4] ss:$16 sps:$4 sm:$0xff]   ;;  %v7485_v31 = vld [vmem:[#allocation10] ss:$16 sps:$4 sm:$0xff]   ;;  %v673_v8 = vld [vmem:[#allocation7] sm:$0x77] }
  0xd6   : > { %v7488_v33 = vld [vmem:[#allocation10 + $0x1e4] ss:$16 sps:$4 sm:$0xff]   ;;  %v7490_v34 = vld [vmem:[#allocation8 + $0xf0] ss:$8 sps:$4 sm:$0xff]   ;;  %v7496_v38 = vld [vmem:[#allocation8 + $0xe0] ss:$8 sps:$4 sm:$0xff]   ;;  %v913_v12 = vrot.slane %v673_v8, %v8671_v7 }
  0xd7   : > { %875 = vmatpush1.bf16.msra.mxu0 %v7460_v14  ;;  %v7491_v35 = vld [vmem:[#allocation10 + $0x1e0] ss:$16 sps:$4 sm:$0xff]   ;;  %v7492_v36 = vld [vmem:[#allocation8 + $0xe4] ss:$8 sps:$4 sm:$0xff]   ;;  %v7498_v40 = vld [vmem:[#allocation8 + $0xd4] ss:$8 sps:$4 sm:$0xff]   ;;  %v917_v14 = vrot.slane %v673_v8, %v916_v9 }
  0xd8   : > { %1383 = vmatpush1.bf16.msra.mxu1 %v7461_v15  ;;  %876 = vmatprep.subr.bf16.mxu0 %v7462_v16  ;;  %v7494_v37 = vld [vmem:[#allocation10 + $0x1c4] ss:$16 sps:$4 sm:$0xff]   ;;  %v7497_v39 = vld [vmem:[#allocation10 + $0x1c0] ss:$16 sps:$4 sm:$0xff]   ;;  %v936_v10 = vsub.s32 5, %v8668_v6  ;;  %v956_v11 = vsub.s32 6, %v8668_v6 }
  0xd9   : > { %1384 = vmatprep.subr.bf16.mxu1 %v7464_v17  ;;  %v7500_v41 = vld [vmem:[#allocation10 + $0x1a4] ss:$16 sps:$4 sm:$0xff]   ;;  %v7502_v42 = vld [vmem:[#allocation8 + $0xd0] ss:$8 sps:$4 sm:$0xff]   ;;  %v7508_v46 = vld [vmem:[#allocation8 + $0xc0] ss:$8 sps:$4 sm:$0xff]  }
  0xda   : > { %v7503_v43 = vld [vmem:[#allocation10 + $0x1a0] ss:$16 sps:$4 sm:$0xff]   ;;  %v7504_v44 = vld [vmem:[#allocation8 + $0xc4] ss:$8 sps:$4 sm:$0xff]   ;;  %v7510_v49 = vld [vmem:[#allocation8 + $0xb4] ss:$8 sps:$4 sm:$0xff]   ;;  %v937_v15 = vrot.slane %v673_v8, %v936_v10  ;;  %v957_v16 = vrot.slane %v673_v8, %v956_v11 }
  0xdb   : > { %877 = vmatpush1.bf16.msra.mxu0 %v7466_v18  ;;  %v7506_v45 = vld [vmem:[#allocation10 + $0x184] ss:$16 sps:$4 sm:$0xff]   ;;  %v7509_v47 = vld [vmem:[#allocation10 + $0x180] ss:$16 sps:$4 sm:$0xff]   ;;  %v8689_v17 = vsub.s32 1, %v8668_v6  ;;  %v8692_v18 = vsub.s32 2, %v8668_v6 }
  0xdc   : > { %1385 = vmatpush1.bf16.msra.mxu1 %v7467_v19  ;;  %878 = vmatprep.subr.bf16.mxu0 %v7468_v20  ;;  %v671_v48 = vld [vmem:[%s8631_s17 + $0x8] sm:$0xff]  ;;  %v670_v2 = vld [vmem:[%s8631_s17] sm:$0xff]  ;;  %v923_v20 = vrot.slane %v913_v12, %v8671_v7  ;;  %s8323_s18 = smov 64   ;;  %s8324_s6 = smov 32  }
  0xdd   : > { %1386 = vmatprep.subr.bf16.mxu1 %v7470_v21  ;;  %v7512_v50 = vld [vmem:[#allocation10 + $0x164] ss:$16 sps:$4 sm:$0xff]   ;;  %v707_v51 = vpack.c.bf16 %v671_v48, %v671_v48  ;;  %v7514_v52 = vld [vmem:[#allocation8 + $0xb0] ss:$8 sps:$4 sm:$0xff]   ;;  %v7520_v56 = vld [vmem:[#allocation8 + $0xa0] ss:$8 sps:$4 sm:$0xff]   ;;  %v8661_v3 = vpack.c.bf16 %v670_v2, %v670_v2  ;;  %v927_v21 = vrot.slane %v917_v14, %v8671_v7 }
  0xde   : > { %v7515_v53 = vld [vmem:[#allocation10 + $0x160] ss:$16 sps:$4 sm:$0xff]   ;;  %v7516_v54 = vld [vmem:[#allocation8 + $0xa4] ss:$8 sps:$4 sm:$0xff]   ;;  %v7522_v58 = vld [vmem:[#allocation8 + $0x94] ss:$8 sps:$4 sm:$0xff]  }
  0xdf   : > { %879 = vmatpush1.bf16.msra.mxu0 %v7472_v22  ;;  %900 = vmatprep.mubr.bf16.mxu0 %v707_v51  ;;  %v7518_v55 = vld [vmem:[#allocation10 + $0x144] ss:$16 sps:$4 sm:$0xff]   ;;  %v7521_v57 = vld [vmem:[#allocation10 + $0x140] ss:$16 sps:$4 sm:$0xff]   ;;  %v947_v22 = vrot.slane %v937_v15, %v8689_v17  ;;  %v7540_v48 = vld [vmem:[#allocation10 + $0xa8] ss:$16 sps:$4 sm:$0xff]  }
  0xe0   : > { %1387 = vmatpush1.bf16.msra.mxu1 %v7473_v23  ;;  %880 = vmatprep.subr.bf16.mxu0 %v7474_v24  ;;  %v7524_v59 = vld [vmem:[#allocation10 + $0x124] ss:$16 sps:$4 sm:$0xff]   ;;  %v7526_v60 = vld [vmem:[#allocation8 + $0x90] ss:$8 sps:$4 sm:$0xff]   ;;  %v7532_v0 = vld [vmem:[#allocation8 + $0x80] ss:$8 sps:$4 sm:$0xff]   ;;  %v967_v23 = vrot.slane %v957_v16, %v8692_v18 }
  0xe1   : > { %1388 = vmatprep.subr.bf16.mxu1 %v7476_v25  ;;  %1408 = vmatprep.mubr.bf16.mxu1 %v707_v51  ;;  %v7527_v61 = vld [vmem:[#allocation10 + $0x120] ss:$16 sps:$4 sm:$0xff]   ;;  %v7528_v62 = vld [vmem:[#allocation8 + $0x84] ss:$8 sps:$4 sm:$0xff]   ;;  %v8680_v13 = vld [vmem:[%s9601_s5] sm:$0xf]  ;;  %v933_v25 = vrot.slane %v673_v8, %v8689_v17 }
  0xe2   : > { %v7530_v63 = vld [vmem:[#allocation10 + $0x104] ss:$16 sps:$4 sm:$0xff]   ;;  %v7533_v1 = vld [vmem:[#allocation10 + $0x100] ss:$16 sps:$4 sm:$0xff]   ;;  %v1039_v19 = vrot.slane %v8680_v13, %v8671_v7  ;;  %v7567_v2 = vld [vmem:[#allocation10 + $0x188] ss:$16 sps:$4 sm:$0xff]  }
  0xe3   : > { %881 = vmatpush1.bf16.msra.mxu0 %v7478_v26  ;;  %v7572_v5 = vld [vmem:[#allocation10 + $0x16c] ss:$16 sps:$4 sm:$0xff]   ;;  %v7573_v14 = vld [vmem:[#allocation10 + $0x148] ss:$16 sps:$4 sm:$0xff]   ;;  %s7301_s3 = smul.u32 768, %s8434_s27  ;;  %s9665_s12 = sld [smem:[#allocation36_spill]] }
  0xe4   : > { %1389 = vmatpush1.bf16.msra.mxu1 %v7479_v27  ;;  %882 = vmatprep.subr.bf16.mxu0 %v7480_v28  ;;  %v7575_v12 = vld [vmem:[#allocation10 + $0x14c] ss:$16 sps:$4 sm:$0xff]   ;;  %v7576_v16 = vld [vmem:[#allocation10 + $0x128] ss:$16 sps:$4 sm:$0xff]   ;;  %s6404_s27 = scalar_lea.sflag [#allocation4], %s8627_s30  ;;  %p9666_p3 = scmp.ne.s32.totalorder %s9650_s20, 0 }
  0xe5   : > { %1390 = vmatprep.subr.bf16.mxu1 %v7482_v29  ;;  %v7578_v15 = vld [vmem:[#allocation10 + $0x12c] ss:$16 sps:$4 sm:$0xff]   ;;  %s8325_s28 = smov [#allocation17]  }
  0xe7   : > { %883 = vmatpush1.bf16.msra.mxu0 %v7484_v30 }
  0xe8   : > { %1391 = vmatpush1.bf16.msra.mxu1 %v7485_v31  ;;  %884 = vmatprep.subr.bf16.mxu0 %v7486_v32 }
  0xe9   : > { %1392 = vmatprep.subr.bf16.mxu1 %v7488_v33  ;;  %s9551_s17 = scalar_lea.hbm %s9665_s12, %s7301_s3 }
  0xeb   : > { %885 = vmatpush2.bf16.msra.mxu0 %v7490_v34  ;;  %v943_v34 = vrot.slane %v933_v25, %v8689_v17 }
  0xec   : > { %1393 = vmatpush2.bf16.msra.mxu1 %v7491_v35  ;;  %886 = vmatprep.subr.bf16.mxu0 %v7492_v36  ;;  %v953_v35 = vrot.slane %v673_v8, %v8692_v18  ;;  %v7570_v8 = vld [vmem:[#allocation10 + $0x168] ss:$16 sps:$4 sm:$0xff]  }
  0xed   : > { %1394 = vmatprep.subr.bf16.mxu1 %v7494_v37 }
  0xef   : > { %887 = vmatpush2.bf16.msra.mxu0 %v7496_v38 }
  0xf0   : > { %1395 = vmatpush2.bf16.msra.mxu1 %v7497_v39  ;;  %888 = vmatprep.subr.bf16.mxu0 %v7498_v40 }
  0xf1   : > { %1396 = vmatprep.subr.bf16.mxu1 %v7500_v41  ;;  %v963_v41 = vrot.slane %v953_v35, %v8692_v18 }
  0xf3   : > { %889 = vmatpush2.bf16.msra.mxu0 %v7502_v42 }
  0xf4   : > { %1397 = vmatpush2.bf16.msra.mxu1 %v7503_v43  ;;  %890 = vmatprep.subr.bf16.mxu0 %v7504_v44  ;;  %v7534_v43 = vld [vmem:[#allocation10 + $0xe8] ss:$16 sps:$4 sm:$0xff]   ;;  %v7536_v44 = vld [vmem:[#allocation10 + $0xec] ss:$16 sps:$4 sm:$0xff]  }
  0xf5   : > { %1398 = vmatprep.subr.bf16.mxu1 %v7506_v45  ;;  %v7539_v45 = vld [vmem:[#allocation10 + $0xcc] ss:$16 sps:$4 sm:$0xff]  }
  0xf7   : > { %891 = vmatpush2.bf16.msra.mxu0 %v7508_v46  ;;  %v7537_v46 = vld [vmem:[#allocation10 + $0xc8] ss:$16 sps:$4 sm:$0xff]  }
  0xf8   : > { %1399 = vmatpush2.bf16.msra.mxu1 %v7509_v47  ;;  %892 = vmatprep.subr.bf16.mxu0 %v7510_v49  ;;  %v7542_v47 = vld [vmem:[#allocation10 + $0xac] ss:$16 sps:$4 sm:$0xff]  }
  0xf9   : > { %1400 = vmatprep.subr.bf16.mxu1 %v7512_v50  ;;  %v7545_v49 = vld [vmem:[#allocation10 + $0x8c] ss:$16 sps:$4 sm:$0xff]   ;;  %v7543_v50 = vld [vmem:[#allocation10 + $0x88] ss:$16 sps:$4 sm:$0xff]  }
  0xfb   : > { %893 = vmatpush2.bf16.msra.mxu0 %v7514_v52  ;;  %v7546_v52 = vld [vmem:[#allocation10 + $0x68] ss:$16 sps:$4 sm:$0xff]  }
  0xfc   : > { %1401 = vmatpush2.bf16.msra.mxu1 %v7515_v53  ;;  %894 = vmatprep.subr.bf16.mxu0 %v7516_v54  ;;  %v7551_v53 = vld [vmem:[#allocation10 + $0x4c] ss:$16 sps:$4 sm:$0xff]   ;;  %v7549_v54 = vld [vmem:[#allocation10 + $0x48] ss:$16 sps:$4 sm:$0xff]  }
  0xfd   : > { %1402 = vmatprep.subr.bf16.mxu1 %v7518_v55  ;;  %v7554_v55 = vld [vmem:[#allocation10 + $0x2c] ss:$16 sps:$4 sm:$0xff]  }
  0xff   : > { %895 = vmatpush2.bf16.msra.mxu0 %v7520_v56  ;;  %v7552_v56 = vld [vmem:[#allocation10 + $0x28] ss:$16 sps:$4 sm:$0xff]  }
 0x100   : > { %1403 = vmatpush2.bf16.msra.mxu1 %v7521_v57  ;;  %896 = vmatprep.subr.bf16.mxu0 %v7522_v58  ;;  %v7557_v57 = vld [vmem:[#allocation10 + $0xc] ss:$16 sps:$4 sm:$0xff]   ;;  %v7555_v58 = vld [vmem:[#allocation10 + $0x8] ss:$16 sps:$4 sm:$0xff]  }
 0x101   : > { %1404 = vmatprep.subr.bf16.mxu1 %v7524_v59  ;;  %v7560_v59 = vld [vmem:[#allocation10 + $0x1ec] ss:$16 sps:$4 sm:$0xff]  }
 0x103   : > { %897 = vmatpush2.bf16.msra.mxu0 %v7526_v60  ;;  %v7558_v60 = vld [vmem:[#allocation10 + $0x1e8] ss:$16 sps:$4 sm:$0xff]  }
 0x104   : > { %1405 = vmatpush2.bf16.msra.mxu1 %v7527_v61  ;;  %898 = vmatprep.subr.bf16.mxu0 %v7528_v62  ;;  %v7563_v61 = vld [vmem:[#allocation10 + $0x1cc] ss:$16 sps:$4 sm:$0xff]   ;;  %v7561_v62 = vld [vmem:[#allocation10 + $0x1c8] ss:$16 sps:$4 sm:$0xff]  }
 0x105   : > { %1406 = vmatprep.subr.bf16.mxu1 %v7530_v63  ;;  %v7566_v63 = vld [vmem:[#allocation10 + $0x1ac] ss:$16 sps:$4 sm:$0xff]  }
 0x107   : > { %899 = vmatpush2.bf16.msra.mxu0 %v7532_v0  ;;  %v7564_v0 = vld [vmem:[#allocation10 + $0x1a8] ss:$16 sps:$4 sm:$0xff]  }
 0x108   : > { %1407 = vmatpush2.bf16.msra.mxu1 %v7533_v1  ;;  %1417 = vmatprep.subr.bf16.mxu0 %v7536_v44  ;;  %v7569_v1 = vld [vmem:[#allocation10 + $0x18c] ss:$16 sps:$4 sm:$0xff]  }
 0x109   : > { %7124 = vmatprep.subr.mxu1 %v8319_v4 }
 0x10a   : > { %901 = vmatmul.mubr.bf16.vlgmr.msra.gmra.mxu0 %v8661_v3 }
 0x10b   : > { %1409 = vmatmul.mubr.bf16.vlgmr.msra.gmra.mxu1 %v8661_v3  ;;  %1449 = vmatprep.mubr.bf16.mxu0 %v707_v51  ;;  %v7548_v51 = vld [vmem:[#allocation10 + $0x6c] ss:$16 sps:$4 sm:$0xff]  }
 0x10c   : > { %7126 = vmatprep.mubr.msk.f32.mxu1 %vm8320_vm0, %v8319_v4  ;;  %1418 = vmatpush1.bf16.msra.mxu0 %v7534_v43 }
 0x10d   : > { %1419 = vmatprep.subr.bf16.mxu0 %v7539_v45 }
 0x110   : > { %1420 = vmatpush1.bf16.msra.mxu0 %v7537_v46 }
 0x111   : > { %1421 = vmatprep.subr.bf16.mxu0 %v7542_v47 }
 0x114   : > { %1422 = vmatpush1.bf16.msra.mxu0 %v7540_v48 }
 0x115   : > { %1423 = vmatprep.subr.bf16.mxu0 %v7545_v49 }
 0x118   : > { %1424 = vmatpush1.bf16.msra.mxu0 %v7543_v50 }
 0x119   : > { %1425 = vmatprep.subr.bf16.mxu0 %v7548_v51 }
 0x11c   : > { %1426 = vmatpush1.bf16.msra.mxu0 %v7546_v52 }
 0x11d   : > { %1427 = vmatprep.subr.bf16.mxu0 %v7551_v53 }
 0x120   : > { %1428 = vmatpush1.bf16.msra.mxu0 %v7549_v54  ;;  %v1047_v54 = vrot.slane %v8680_v13, %v8692_v18 }
 0x121   : > { %1429 = vmatprep.subr.bf16.mxu0 %v7554_v55 }
 0x124   : > { %1430 = vmatpush1.bf16.msra.mxu0 %v7552_v56 }
 0x125   : > { %1431 = vmatprep.subr.bf16.mxu0 %v7557_v57 }
 0x128   : > { %1432 = vmatpush1.bf16.msra.mxu0 %v7555_v58 }
 0x129   : > { %1433 = vmatprep.subr.bf16.mxu0 %v7560_v59 }
 0x12c   : > { %1434 = vmatpush2.bf16.msra.mxu0 %v7558_v60 }
 0x12d   : > { %1435 = vmatprep.subr.bf16.mxu0 %v7563_v61 }
 0x130   : > { %1436 = vmatpush2.bf16.msra.mxu0 %v7561_v62 }
 0x131   : > { %1437 = vmatprep.subr.bf16.mxu0 %v7566_v63 }
 0x134   : > { %1438 = vmatpush2.bf16.msra.mxu0 %v7564_v0 }
 0x135   : > { %1439 = vmatprep.subr.bf16.mxu0 %v7569_v1  ;;  %v7582_v1 = vld [vmem:[#allocation11 + $0x10] ss:$8 sps:$4 sm:$0xff]  }
 0x138   : > { %1440 = vmatpush2.bf16.msra.mxu0 %v7567_v2  ;;  %v7584_v2 = vld [vmem:[#allocation11 + $0x14] ss:$8 sps:$4 sm:$0xff]  }
 0x139   : > { %1441 = vmatprep.subr.bf16.mxu0 %v7572_v5 }
 0x13c   : > { %1442 = vmatpush2.bf16.msra.mxu0 %v7570_v8 }
 0x13d   : > { %1443 = vmatprep.subr.bf16.mxu0 %v7575_v12 }
 0x140   : > { %1444 = vmatpush2.bf16.msra.mxu0 %v7573_v14 }
 0x141   : > { %1445 = vmatprep.subr.bf16.mxu0 %v7578_v15 }
 0x144   : > { %1446 = vmatpush2.bf16.msra.mxu0 %v7576_v16 }
 0x1ca   : > { %v902_v24 = vpop.f32.mrf.mxu0 }
 0x1cb   : > { %v1410_v26 = vpop.f32.mrf.mxu1  ;;  %v8703_v28 = vadd.f32 %v923_v20, %v902_v24  ;;  %v8722_v40 = vadd.f32 %v943_v34, %v902_v24  ;;  %v8729_v42 = vadd.f32 %v963_v41, %v902_v24  ;;  %v7579_v20 = vld [vmem:[#allocation10 + $0x108] ss:$16 sps:$4 sm:$0xff]  }
 0x1cc   : > { %v8701_v27 = vadd.f32 %v1410_v26, %v1039_v19  ;;  %v904_v29 = vpop.f32.mrf.mxu0  ;;  %v7581_v19 = vld [vmem:[#allocation10 + $0x10c] ss:$16 sps:$4 sm:$0xff]  }
 0x1cd   : > { %v8705_v30 = vpop.f32.mrf.mxu1  ;;  %v8707_v31 = vadd.f32 %v927_v21, %v904_v29  ;;  %v8709_v32 = vadd.f32 %v947_v22, %v904_v29  ;;  %v8711_v33 = vadd.f32 %v967_v23, %v904_v29  ;;  %1447 = vmatprep.subr.bf16.mxu0 %v7581_v19  ;;  %v8738_v22 = vld [vmem:[%s588_s23] ss:$0 sm:$0xff] }
 0x1ce   : > { %7125 = vmatpush3.xpose.msk.msra.mxu1 %vm1458_vm1, %v8701_v27  ;;  %v906_v36 = vpop.f32.mrf.mxu0  ;;  %1448 = vmatpush2.bf16.msra.mxu0 %v7579_v20 }
 0x1cf   : > { %v1414_v37 = vpop.f32.mrf.mxu1  ;;  %7135 = vmatprep.subr.mxu1 %v8319_v4  ;;  %2041 = vmatprep.subr.bf16.mxu0 %v7584_v2 }
 0x1d0   : > { %v907_v38 = vpop.f32.mrf.mxu0 }
 0x1d1   : > { %v1415_v39 = vpop.f32.mrf.mxu1  ;;  %7127 = vmatmul.mubr.msk.f32.vlgmr.msra.gmra.mxu1 %vm1458_vm1, %v8703_v28  ;;  %1450 = vmatmul.mubr.bf16.vlgmr.msra.gmra.mxu0 %v8661_v3 }
 0x1d2   : > { %7129 = vmatprep.mubr.msk.f32.mxu1 %vm8320_vm0, %v8319_v4  ;;  %2042 = vmatpush1.bf16.msra.mxu0 %v7582_v1 }
 0x1d5   : > { %7130 = vmatmul.mubr.msk.f32.gmra.mxu1 %vm1458_vm1, %v8722_v40 }
 0x1d6   : > { %7132 = vmatprep.mubr.msk.f32.mxu1 %vm8320_vm0, %v8319_v4 }
 0x1d9   : > { %7133 = vmatmul.mubr.msk.f32.gmra.mxu1 %vm1458_vm1, %v8729_v42 }
 0x1da   : > { %7137 = vmatprep.mubr.msk.f32.mxu1 %vm8320_vm0, %v8319_v4 }
 0x291   : > { %v1537_v21 = vpop.f32.mrf.mxu1  ;;  %v1451_v55 = vpop.f32.mrf.mxu0 }
 0x292   : > { %v1551_v23 = vmul.f32 0.17677669, %v1537_v21  ;;  %v8752_v56 = vadd.f32 %v1451_v55, %v1047_v54 }
 0x293   : > { %v7128_v24 = vpop.f32.mrf.mxu1  ;;  %v8758_v59 = vpop.f32.mrf.mxu0 }
 0x294   : > { %v1560_v25 = vadd.f32 %v8738_v22, %v1551_v23  ;;  %7136 = vmatpush3.msra.mxu1 %v8752_v56 }
 0x295   : > { %v1542_v26 = vpop.f32.mrf.mxu1  ;;  %7146 = vmatprep.subr.mxu1 %v8319_v4  ;;  %v1455_v61 = vpop.f32.mrf.mxu0 }
 0x296   : > { %v1552_v29 = vmul.f32 0.17677669, %v1542_v26  ;;  %v1564_v34 = vsel %vm1563_vm2, %v1560_v25, -inf }
 0x297   : > { %1565 = vmax.xlane.f32.xlu0 %v1564_v34  ;;  %v7131_v35 = vpop.f32.mrf.mxu1  ;;  %v1456_v62 = vpop.f32.mrf.mxu0  ;;  %v7587_v34 = vld [vmem:[#allocation11 + $0x4] ss:$8 sps:$4 sm:$0xff]  }
 0x298   : > { %v1561_v36 = vadd.f32 %v8738_v22, %v1552_v29  ;;  %v7585_v29 = vld [vmem:[#allocation11] ss:$8 sps:$4 sm:$0xff]   ;;  %2043 = vmatprep.subr.bf16.mxu0 %v7587_v34  ;;  %v8322_v35 = vmov 0  }
 0x299   : > { %v1547_v37 = vpop.f32.mrf.mxu1  ;;  %2044 = vmatpush1.bf16.msra.mxu0 %v7585_v29  ;;  %2061 = vmatprep.mubr.bf16.mxu0 %v8322_v35 }
 0x29a   : > { %v1553_v38 = vmul.f32 0.17677669, %v1547_v37  ;;  %v1567_v3 = vsel %vm1563_vm2, %v1561_v36, -inf }
 0x29b   : > { %1568 = vmax.xlane.f32.xlu0 %v1567_v3  ;;  %v7134_v39 = vpop.f32.mrf.mxu1 }
 0x29c   : > { %v1562_v41 = vadd.f32 %v8738_v22, %v1553_v38 }
 0x29e   : > { %v1570_v43 = vsel %vm1563_vm2, %v1562_v41, -inf }
 0x29f   : > { %1571 = vmax.xlane.f32.xlu1 %v1570_v43 }
 0x320   : > { %v1566_v44 = vpop.xlane.xlu0 %1565 }
 0x321   : > { %v1573_v45 = vsub.f32 %v1560_v25, %v1566_v44 }
 0x323   : > { %v1576_v46 = vmul.f32 1.442695, %v1573_v45 }
 0x324   : > { %v1569_v47 = vpop.xlane.xlu0 %1568 }
 0x325   : > { %7822 = vpow2.f32 %v1576_v46  ;;  %v1574_v48 = vsub.f32 %v1561_v36, %v1569_v47 }
 0x327   : > { %v1578_v49 = vmul.f32 1.442695, %v1574_v48 }
 0x328   : > { %v1572_v57 = vpop.xlane.xlu1 %1571 }
 0x329   : > { %7824 = vpow2.f32 %v1578_v49  ;;  %v1575_v58 = vsub.f32 %v1562_v41, %v1572_v57 }
 0x32b   : > { %v1580_v60 = vmul.f32 1.442695, %v1575_v58 }
 0x32d   : > { %7826 = vpow2.f32 %v1580_v60 }
 0x332   : > { %v7823_v50 = vpop.eup %7822 }
 0x333   : > { %v1582_v51 = vsel %vm1563_vm2, %v7823_v50, 0.0 }
 0x334   : > { %1583 = vadd.xlane.f32.xlu1 %v1582_v51 }
 0x336   : > { %v7825_v52 = vpop.eup %7824 }
 0x337   : > { %v1585_v53 = vsel %vm1563_vm2, %v7825_v52, 0.0 }
 0x338   : > { %1586 = vadd.xlane.f32.xlu0 %v1585_v53 }
 0x33a   : > { %v7827_v63 = vpop.eup %7826 }
 0x33b   : > { %v1588_v0 = vsel %vm1563_vm2, %v7827_v63, 0.0 }
 0x345   : > { %1692 = vrot.lane.b32.xlu1 %v8703_v28, %s8321_s0 }
 0x34e   : > { %1698 = vrot.lane.b32.xlu0 %v8701_v27, %s8321_s0 }
 0x369   : > { %1589 = vadd.xlane.f32.xlu1 %v1588_v0 }
 0x37a   : > { %1694 = vrot.lane.b32.xlu1 %v8722_v40, %s8321_s0 }
 0x37e   : > { %1696 = vrot.lane.b32.xlu1 %v8729_v42, %s8321_s0 }
 0x3bd   : > { %v1584_v5 = vpop.xlane.xlu1 %1583 }
 0x3be   : > { %7828 = vrcp.f32 %v1584_v5 }
 0x3c1   : > { %v1587_v8 = vpop.xlane.xlu0 %1586  ;;  %v1693_v20 = vpop.permute.xlu1 %1692 }
 0x3c2   : > { %7830 = vrcp.f32 %v1587_v8 }
 0x3c5   : > { %v1699_v15 = vpop.permute.xlu0 %1698 }
 0x3cb   : > { %v7829_v12 = vpop.eup %7828 }
 0x3cc   : > { %v1594_v14 = vmul.f32 %v7829_v12, %v7823_v50 }
 0x3ce   : > { %7138 = vmatmul.mubr.msk.f32.vlgmr.msra.gmra.mxu1 %vm1563_vm2, %v1594_v14 }
 0x3cf   : > { %v7831_v16 = vpop.eup %7830  ;;  %7147 = vmatpush3.xpose.msk.msra.mxu1 %vm1458_vm1, %v1699_v15  ;;  %7140 = vmatprep.mubr.msk.f32.mxu1 %vm8320_vm0, %v8319_v4 }
 0x3d0   : > { %v1595_v19 = vmul.f32 %v7831_v16, %v7825_v52  ;;  %7157 = vmatprep.subr.mxu1 %v8319_v4 }
 0x3d2   : > { %7141 = vmatmul.mubr.msk.f32.gmra.mxu1 %vm1563_vm2, %v1595_v19 }
 0x3d3   : > { %7143 = vmatprep.mubr.msk.f32.mxu1 %vm8320_vm0, %v8319_v4 }
 0x3f2   : > { %v1590_v21 = vpop.xlane.xlu1 %1589 }
 0x3f3   : > { %7832 = vrcp.f32 %v1590_v21 }
 0x3f6   : > { %v1695_v25 = vpop.permute.xlu1 %1694 }
 0x3fa   : > { %v1697_v26 = vpop.permute.xlu1 %1696 }
 0x400   : > { %v7833_v23 = vpop.eup %7832 }
 0x401   : > { %v1596_v24 = vmul.f32 %v7833_v23, %v7827_v63 }
 0x403   : > { %7144 = vmatmul.mubr.msk.f32.gmra.mxu1 %vm1563_vm2, %v1596_v24 }
 0x404   : > { %7148 = vmatprep.mubr.msk.f32.mxu1 %vm8320_vm0, %v8319_v4 }
 0x407   : > { %7149 = vmatmul.mubr.msk.f32.vlgmr.msra.gmra.mxu1 %vm1458_vm1, %v1693_v20 }
 0x408   : > { %7151 = vmatprep.mubr.msk.f32.mxu1 %vm8320_vm0, %v8319_v4 }
 0x40b   : > { %7152 = vmatmul.mubr.msk.f32.gmra.mxu1 %vm1458_vm1, %v1695_v25 }
 0x40c   : > { %7154 = vmatprep.mubr.msk.f32.mxu1 %vm8320_vm0, %v8319_v4 }
 0x40f   : > { %7155 = vmatmul.mubr.msk.f32.gmra.mxu1 %vm1458_vm1, %v1697_v26 }
 0x410   : > { %7159 = vmatprep.mubr.msk.f32.mxu1 %vm8320_vm0, %v8319_v4 }
 0x48e   : > { %v1672_v36 = vpop.f32.mrf.mxu1 }
 0x490   : > { %v7139_v37 = vpop.f32.mrf.mxu1 }
 0x492   : > { %v1677_v38 = vpop.f32.mrf.mxu1 }
 0x493   : > { %v1690_v3 = vpack.c.bf16 %v1677_v38, %v1672_v36 }
 0x494   : > { %v7142_v39 = vpop.f32.mrf.mxu1 }
 0x495   : > { %6720 = vmatmul.mubr.msk.bf16.vlgmr.msra.gmra.mxu0 %vm1458_vm1, %v1690_v3 }
 0x496   : > { %2071 = vmatprep.mubr.bf16.mxu0 %v8322_v35 }
 0x4c3   : > { %v1682_v41 = vpop.f32.mrf.mxu1 }
 0x4c4   : > { %v1691_v43 = vpack.c.bf16 %v1682_v41, %v1682_v41  ;;  %v7590_v41 = vld [vmem:[#allocation11 + $0x34] ss:$8 sps:$4 sm:$0xff]  }
 0x4c5   : > { %v7145_v44 = vpop.f32.mrf.mxu1 }
 0x4c6   : > { %6721 = vmatmul.mubr.msk.bf16.gmra.mxu0 %vm1458_vm1, %v1691_v43 }
 0x4c7   : > { %v1774_v45 = vpop.f32.mrf.mxu1  ;;  %2371 = vmatprep.mubr.bf16.mxu0 %v8322_v35 }
 0x4c8   : > { %v1788_v46 = vmul.f32 0.17677669, %v1774_v45 }
 0x4c9   : > { %v7150_v47 = vpop.f32.mrf.mxu1 }
 0x4ca   : > { %v1791_v48 = vadd.f32 %v8738_v22, %v1788_v46  ;;  %v7588_v46 = vld [vmem:[#allocation11 + $0x30] ss:$8 sps:$4 sm:$0xff]  }
 0x4cb   : > { %v1779_v49 = vpop.f32.mrf.mxu1 }
 0x4cc   : > { %v1789_v50 = vmul.f32 0.17677669, %v1779_v49  ;;  %v1794_v51 = vsel %vm1563_vm2, %v1791_v48, -inf }
 0x4cd   : > { %1795 = vmax.xlane.f32.xlu0 %v1794_v51  ;;  %v7153_v52 = vpop.f32.mrf.mxu1 }
 0x4ce   : > { %v1792_v53 = vadd.f32 %v8738_v22, %v1789_v50  ;;  %v7593_v52 = vld [vmem:[#allocation11 + $0x24] ss:$8 sps:$4 sm:$0xff]  }
 0x4cf   : > { %v1784_v54 = vpop.f32.mrf.mxu1 }
 0x4d0   : > { %v1790_v55 = vmul.f32 0.17677669, %v1784_v54  ;;  %v1797_v57 = vsel %vm1563_vm2, %v1792_v53, -inf }
 0x4d1   : > { %1798 = vmax.xlane.f32.xlu1 %v1797_v57  ;;  %v7156_v58 = vpop.f32.mrf.mxu1 }
 0x4d2   : > { %v1793_v60 = vadd.f32 %v8738_v22, %v1790_v55 }
 0x4d4   : > { %v1800_v61 = vsel %vm1563_vm2, %v1793_v60, -inf }
 0x4d5   : > { %1801 = vmax.xlane.f32.xlu0 %v1800_v61 }
 0x555   : > { %v8799_v24 = vpop.f32.mrf.mxu0 }
 0x556   : > { %v1796_v62 = vpop.xlane.xlu0 %1795 }
 0x557   : > { %v1803_v63 = vsub.f32 %v1791_v48, %v1796_v62  ;;  %v8801_v25 = vpop.f32.mrf.mxu0 }
 0x559   : > { %v1806_v0 = vmul.f32 1.442695, %v1803_v63  ;;  %v8803_v26 = vpop.f32.mrf.mxu0 }
 0x55a   : > { %v1799_v1 = vpop.xlane.xlu1 %1798 }
 0x55b   : > { %7834 = vpow2.f32 %v1806_v0  ;;  %v1804_v2 = vsub.f32 %v1792_v53, %v1799_v1  ;;  %v8807_v29 = vpop.f32.mrf.mxu0  ;;  %v7591_v53 = vld [vmem:[#allocation11 + $0x20] ss:$8 sps:$4 sm:$0xff]  }
 0x55d   : > { %v1808_v5 = vmul.f32 1.442695, %v1804_v2 }
 0x55e   : > { %v1802_v8 = vpop.xlane.xlu0 %1801 }
 0x55f   : > { %7836 = vpow2.f32 %v1808_v5  ;;  %v1805_v12 = vsub.f32 %v1793_v60, %v1802_v8 }
 0x561   : > { %v1810_v14 = vmul.f32 1.442695, %v1805_v12 }
 0x563   : > { %7838 = vpow2.f32 %v1810_v14 }
 0x568   : > { %v7835_v15 = vpop.eup %7834 }
 0x569   : > { %v1812_v16 = vsel %vm1563_vm2, %v7835_v15, 0.0 }
 0x56a   : > { %1813 = vadd.xlane.f32.xlu0 %v1812_v16 }
 0x56c   : > { %v7837_v19 = vpop.eup %7836 }
 0x56d   : > { %v1815_v20 = vsel %vm1563_vm2, %v7837_v19, 0.0 }
 0x56e   : > { %1816 = vadd.xlane.f32.xlu0 %v1815_v20 }
 0x570   : > { %v7839_v21 = vpop.eup %7838 }
 0x571   : > { %v1818_v23 = vsel %vm1563_vm2, %v7839_v21, 0.0 }
 0x572   : > { %1819 = vadd.xlane.f32.xlu1 %v1818_v23 }
 0x583   : > { %2086 = vrot.lane.b32.xlu1 %v8701_v27, %s8323_s18 }
 0x584   : > { %1828 = vrot.lane.b32.xlu0 %v8752_v56, %s8321_s0 }
 0x586   : > { %v8811_v34 = vpop.f32.mrf.mxu0 }
 0x587   : > { %2080 = vrot.lane.b32.xlu1 %v8703_v28, %s8323_s18 }
 0x588   : > { %v8815_v36 = vpop.f32.mrf.mxu0  ;;  %2084 = vrot.lane.b32.xlu0 %v8729_v42, %s8323_s18 }
 0x58a   : > { %v2077_v37 = vpop.f32.mrf.mxu0 }
 0x58b   : > { %2082 = vrot.lane.b32.xlu1 %v8722_v40, %s8323_s18 }
 0x58c   : > { %v2078_v38 = vpop.f32.mrf.mxu0 }
 0x5f3   : > { %v1814_v3 = vpop.xlane.xlu0 %1813 }
 0x5f4   : > { %7840 = vrcp.f32 %v1814_v3 }
 0x5f7   : > { %v1817_v39 = vpop.xlane.xlu0 %1816 }
 0x5f8   : > { %7842 = vrcp.f32 %v1817_v39 }
 0x5fb   : > { %v1820_v43 = vpop.xlane.xlu1 %1819  ;;  %v1829_v44 = vpop.permute.xlu0 %1828 }
 0x5fc   : > { %7844 = vrcp.f32 %v1820_v43  ;;  %7158 = vmatpush3.msra.mxu1 %v1829_v44 }
 0x5fd   : > { %1964 = vmatprep.subr.bf16.mxu1 %v7590_v41 }
 0x5ff   : > { %v2087_v61 = vpop.permute.xlu1 %2086  ;;  %v2085_v5 = vpop.permute.xlu0 %2084 }
 0x601   : > { %v7841_v45 = vpop.eup %7840 }
 0x602   : > { %v1824_v47 = vmul.f32 %v7841_v45, %v7835_v15 }
 0x603   : > { %v2081_v1 = vpop.permute.xlu1 %2080 }
 0x604   : > { %7160 = vmatmul.mubr.msk.f32.vlgmr.msra.gmra.mxu1 %vm1563_vm2, %v1824_v47 }
 0x605   : > { %v7843_v48 = vpop.eup %7842  ;;  %7162 = vmatprep.mubr.msk.f32.mxu1 %vm8320_vm0, %v8319_v4  ;;  %1965 = vmatpush1.bf16.msra.mxu1 %v7588_v46 }
 0x606   : > { %v1825_v49 = vmul.f32 %v7843_v48, %v7837_v19  ;;  %1966 = vmatprep.subr.bf16.mxu1 %v7593_v52 }
 0x607   : > { %v2083_v2 = vpop.permute.xlu1 %2082 }
 0x608   : > { %7163 = vmatmul.mubr.msk.f32.gmra.mxu1 %vm1563_vm2, %v1825_v49 }
 0x609   : > { %v7845_v50 = vpop.eup %7844  ;;  %7165 = vmatprep.mubr.msk.f32.mxu1 %vm8320_vm0, %v8319_v4  ;;  %1967 = vmatpush1.bf16.msra.mxu1 %v7591_v53 }
 0x60a   : > { %v1826_v51 = vmul.f32 %v7845_v50, %v7839_v21  ;;  %7168 = vmatprep.subr.mxu1 %v8319_v4 }
 0x60c   : > { %7166 = vmatmul.mubr.msk.f32.gmra.mxu1 %vm1563_vm2, %v1826_v51 }
 0x60d   : > { %1984 = vmatprep.mubr.bf16.mxu1 %v8322_v35 }
 0x6c4   : > { %v1906_v54 = vpop.f32.mrf.mxu1 }
 0x6c6   : > { %v7161_v55 = vpop.f32.mrf.mxu1 }
 0x6c8   : > { %v1911_v57 = vpop.f32.mrf.mxu1 }
 0x6c9   : > { %v1924_v58 = vpack.c.bf16 %v1911_v57, %v1906_v54 }
 0x6ca   : > { %v7164_v60 = vpop.f32.mrf.mxu1 }
 0x6cb   : > { %6714 = vmatmul.mubr.msk.bf16.vlgmr.msra.gmra.mxu1 %vm1458_vm1, %v1924_v58 }
 0x6cc   : > { %7169 = vmatpush3.xpose.msk.msra.mxu1 %vm1458_vm1, %v2087_v61  ;;  %v1916_v62 = vpop.f32.mrf.mxu1  ;;  %1994 = vmatprep.mubr.bf16.mxu1 %v8322_v35 }
 0x6cd   : > { %7179 = vmatprep.subr.mxu1 %v8319_v4  ;;  %v1925_v0 = vpack.c.bf16 %v1916_v62, %v1916_v62 }
 0x6ce   : > { %v7167_v63 = vpop.f32.mrf.mxu1 }
 0x6d3   : > { %6715 = vmatmul.mubr.msk.bf16.gmra.mxu1 %vm1458_vm1, %v1925_v0 }
 0x6d4   : > { %7170 = vmatprep.mubr.msk.f32.mxu1 %vm8320_vm0, %v8319_v4 }
 0x6db   : > { %7171 = vmatmul.mubr.msk.f32.vlgmr.msra.gmra.mxu1 %vm1458_vm1, %v2081_v1 }
 0x6dc   : > { %7173 = vmatprep.mubr.msk.f32.mxu1 %vm8320_vm0, %v8319_v4 }
 0x6df   : > { %7174 = vmatmul.mubr.msk.f32.gmra.mxu1 %vm1458_vm1, %v2083_v2 }
 0x6e0   : > { %7176 = vmatprep.mubr.msk.f32.mxu1 %vm8320_vm0, %v8319_v4 }
 0x6e3   : > { %7177 = vmatmul.mubr.msk.f32.gmra.mxu1 %vm1458_vm1, %v2085_v5 }
 0x6e4   : > { %7181 = vmatprep.mubr.msk.f32.mxu1 %vm8320_vm0, %v8319_v4 }
 0x78b   : > { %v8846_v8 = vpop.f32.mrf.mxu1 }
 0x78d   : > { %v8848_v12 = vpop.f32.mrf.mxu1 }
 0x78f   : > { %v8850_v14 = vpop.f32.mrf.mxu1 }
 0x791   : > { %v8852_v15 = vpop.f32.mrf.mxu1 }
 0x793   : > { %v8854_v16 = vpop.f32.mrf.mxu1 }
 0x795   : > { %v8856_v19 = vpop.f32.mrf.mxu1 }
 0x797   : > { %v2000_v20 = vpop.f32.mrf.mxu1 }
 0x799   : > { %v2001_v21 = vpop.f32.mrf.mxu1 }
 0x79b   : > { %v2162_v23 = vpop.f32.mrf.mxu1 }
 0x79c   : > { %v2176_v37 = vmul.f32 0.17677669, %v2162_v23  ;;  %v7594_v23 = vld [vmem:[#allocation11 + $0x50] ss:$8 sps:$4 sm:$0xff]  }
 0x79d   : > { %v7172_v38 = vpop.f32.mrf.mxu1 }
 0x79e   : > { %v2179_v3 = vadd.f32 %v8738_v22, %v2176_v37  ;;  %v7596_v37 = vld [vmem:[#allocation11 + $0x54] ss:$8 sps:$4 sm:$0xff]  }
 0x79f   : > { %v2167_v39 = vpop.f32.mrf.mxu1  ;;  %2351 = vmatprep.subr.bf16.mxu0 %v7596_v37 }
 0x7a0   : > { %v2177_v41 = vmul.f32 0.17677669, %v2167_v39  ;;  %v2182_v43 = vsel %vm1563_vm2, %v2179_v3, -inf  ;;  %2352 = vmatpush1.bf16.msra.mxu0 %v7594_v23 }
 0x7a1   : > { %2183 = vmax.xlane.f32.xlu1 %v2182_v43  ;;  %v7175_v44 = vpop.f32.mrf.mxu1 }
 0x7a2   : > { %v2180_v45 = vadd.f32 %v8738_v22, %v2177_v41 }
 0x7a3   : > { %v2172_v46 = vpop.f32.mrf.mxu1 }
 0x7a4   : > { %v2178_v47 = vmul.f32 0.17677669, %v2172_v46  ;;  %v2185_v48 = vsel %vm1563_vm2, %v2180_v45, -inf }
 0x7a5   : > { %2186 = vmax.xlane.f32.xlu0 %v2185_v48  ;;  %v7178_v49 = vpop.f32.mrf.mxu1  ;;  %v7597_v48 = vld [vmem:[#allocation11 + $0x40] ss:$8 sps:$4 sm:$0xff]  }
 0x7a6   : > { %v2181_v50 = vadd.f32 %v8738_v22, %v2178_v47  ;;  %v7599_v49 = vld [vmem:[#allocation11 + $0x44] ss:$8 sps:$4 sm:$0xff]  }
 0x7a7   : > { %2353 = vmatprep.subr.bf16.mxu0 %v7599_v49 }
 0x7a8   : > { %v2188_v51 = vsel %vm1563_vm2, %v2181_v50, -inf  ;;  %2354 = vmatpush1.bf16.msra.mxu0 %v7597_v48 }
 0x7a9   : > { %2189 = vmax.xlane.f32.xlu0 %v2188_v51  ;;  %7201 = vmatprep.subr.mxu0 %v8319_v4 }
 0x7b2   : > { %2215 = vrot.lane.b32.xlu1 %v8752_v56, %s8323_s18 }
 0x82a   : > { %v2184_v52 = vpop.xlane.xlu1 %2183 }
 0x82b   : > { %v2191_v53 = vsub.f32 %v2179_v3, %v2184_v52 }
 0x82d   : > { %v2194_v54 = vmul.f32 1.442695, %v2191_v53 }
 0x82e   : > { %v2216_v55 = vpop.permute.xlu1 %2215  ;;  %v2187_v57 = vpop.xlane.xlu0 %2186 }
 0x82f   : > { %7846 = vpow2.f32 %v2194_v54  ;;  %v2192_v58 = vsub.f32 %v2180_v45, %v2187_v57  ;;  %7180 = vmatpush3.msra.mxu1 %v2216_v55 }
 0x830   : > { %7190 = vmatprep.subr.mxu1 %v8319_v4 }
 0x831   : > { %v2196_v60 = vmul.f32 1.442695, %v2192_v58 }
 0x832   : > { %v2190_v61 = vpop.xlane.xlu0 %2189 }
 0x833   : > { %7848 = vpow2.f32 %v2196_v60  ;;  %v2193_v62 = vsub.f32 %v2181_v50, %v2190_v61 }
 0x835   : > { %v2198_v63 = vmul.f32 1.442695, %v2193_v62 }
 0x837   : > { %7850 = vpow2.f32 %v2198_v63 }
 0x83c   : > { %v7847_v0 = vpop.eup %7846 }
 0x83d   : > { %v2200_v1 = vsel %vm1563_vm2, %v7847_v0, 0.0 }
 0x83e   : > { %2201 = vadd.xlane.f32.xlu0 %v2200_v1 }
 0x840   : > { %v7849_v2 = vpop.eup %7848 }
 0x841   : > { %v2203_v5 = vsel %vm1563_vm2, %v7849_v2, 0.0 }
 0x842   : > { %2204 = vadd.xlane.f32.xlu1 %v2203_v5 }
 0x844   : > { %v7851_v20 = vpop.eup %7850 }
 0x845   : > { %v2206_v21 = vsel %vm1563_vm2, %v7851_v20, 0.0 }
 0x846   : > { %2207 = vadd.xlane.f32.xlu0 %v2206_v21 }
 0x853   : > { %2396 = vrot.lane.b32.xlu1 %v8703_v28, %s8324_s6 }
 0x857   : > { %2398 = vrot.lane.b32.xlu1 %v8722_v40, %s8324_s6 }
 0x85b   : > { %2400 = vrot.lane.b32.xlu1 %v8729_v42, %s8324_s6 }
 0x85c   : > { %2402 = vrot.lane.b32.xlu0 %v8701_v27, %s8324_s6 }
 0x8c7   : > { %v2202_v38 = vpop.xlane.xlu0 %2201 }
 0x8c8   : > { %7852 = vrcp.f32 %v2202_v38 }
 0x8cb   : > { %v2205_v3 = vpop.xlane.xlu1 %2204 }
 0x8cc   : > { %7854 = vrcp.f32 %v2205_v3 }
 0x8cf   : > { %v2208_v39 = vpop.xlane.xlu0 %2207  ;;  %v2397_v45 = vpop.permute.xlu1 %2396 }
 0x8d0   : > { %7856 = vrcp.f32 %v2208_v39 }
 0x8d3   : > { %v2403_v43 = vpop.permute.xlu0 %2402  ;;  %v2399_v46 = vpop.permute.xlu1 %2398 }
 0x8d5   : > { %v7853_v28 = vpop.eup %7852 }
 0x8d6   : > { %v2212_v41 = vmul.f32 %v7853_v28, %v7847_v0 }
 0x8d7   : > { %v2401_v47 = vpop.permute.xlu1 %2400 }
 0x8d8   : > { %7182 = vmatmul.mubr.msk.f32.vlgmr.msra.gmra.mxu1 %vm1563_vm2, %v2212_v41 }
 0x8d9   : > { %v7855_v40 = vpop.eup %7854  ;;  %7191 = vmatpush3.xpose.msk.msra.mxu1 %vm1458_vm1, %v2403_v43  ;;  %7184 = vmatprep.mubr.msk.f32.mxu1 %vm8320_vm0, %v8319_v4 }
 0x8da   : > { %v2213_v27 = vmul.f32 %v7855_v40, %v7849_v2 }
 0x8dc   : > { %7185 = vmatmul.mubr.msk.f32.gmra.mxu1 %vm1563_vm2, %v2213_v27 }
 0x8dd   : > { %v7857_v42 = vpop.eup %7856  ;;  %7187 = vmatprep.mubr.msk.f32.mxu1 %vm8320_vm0, %v8319_v4 }
 0x8de   : > { %v2214_v44 = vmul.f32 %v7857_v42, %v7851_v20 }
 0x8e0   : > { %7188 = vmatmul.mubr.msk.f32.gmra.mxu1 %vm1563_vm2, %v2214_v44 }
 0x8e1   : > { %7192 = vmatprep.mubr.msk.f32.mxu1 %vm8320_vm0, %v8319_v4 }
 0x8e4   : > { %7193 = vmatmul.mubr.msk.f32.vlgmr.msra.gmra.mxu1 %vm1458_vm1, %v2397_v45 }
 0x8e5   : > { %7195 = vmatprep.mubr.msk.f32.mxu1 %vm8320_vm0, %v8319_v4 }
 0x8e8   : > { %7196 = vmatmul.mubr.msk.f32.gmra.mxu1 %vm1458_vm1, %v2399_v46 }
 0x8e9   : > { %7198 = vmatprep.mubr.msk.f32.mxu1 %vm8320_vm0, %v8319_v4 }
 0x8ec   : > { %7199 = vmatmul.mubr.msk.f32.gmra.mxu1 %vm1458_vm1, %v2401_v47 }
 0x8ed   : > { %2687 = vmatprep.mubr.bf16.mxu1 %v8322_v35 }
 0x998   : > { %v2293_v50 = vpop.f32.mrf.mxu1 }
 0x99a   : > { %v7183_v51 = vpop.f32.mrf.mxu1 }
 0x99c   : > { %v2298_v52 = vpop.f32.mrf.mxu1 }
 0x99d   : > { %v2311_v53 = vpack.c.bf16 %v2298_v52, %v2293_v50 }
 0x99e   : > { %v7186_v54 = vpop.f32.mrf.mxu1 }
 0x99f   : > { %6733 = vmatmul.mubr.msk.bf16.vlgmr.msra.gmra.mxu0 %vm1458_vm1, %v2311_v53  ;;  %v2064_v53 = vadd.f32 %v8799_v24, %v8846_v8  ;;  %v1043_v54 = vrot.slane %v8680_v13, %v8689_v17  ;;  %v2070_v13 = vadd.f32 %v8807_v29, %v8852_v15 }
 0x9a0   : > { %v2303_v55 = vpop.f32.mrf.mxu1  ;;  %2381 = vmatprep.mubr.bf16.mxu0 %v8322_v35 }
 0x9a1   : > { %v2312_v60 = vpack.c.bf16 %v2303_v55, %v2303_v55  ;;  %v8926_v24 = vadd.f32 %v8705_v30, %v1043_v54  ;;  %v2076_v30 = vadd.f32 %v8815_v36, %v8856_v19 }
 0x9a2   : > { %v7189_v57 = vpop.f32.mrf.mxu1 }
 0x9a3   : > { %v2066_v57 = vadd.f32 %v8801_v25, %v8848_v12 }
 0x9a4   : > { %v2478_v58 = vpop.f32.mrf.mxu1 }
 0x9a5   : > { %v2492_v61 = vmul.f32 0.17677669, %v2478_v58 }
 0x9a6   : > { %v7194_v62 = vpop.f32.mrf.mxu1 }
 0x9a7   : > { %6734 = vmatmul.mubr.msk.bf16.gmra.mxu0 %vm1458_vm1, %v2312_v60  ;;  %v2495_v63 = vadd.f32 %v8738_v22, %v2492_v61  ;;  %v2068_v61 = vadd.f32 %v8803_v26, %v8850_v14 }
 0x9a8   : > { %v2483_v0 = vpop.f32.mrf.mxu1  ;;  %7203 = vmatprep.mubr.msk.f32.mxu0 %vm8320_vm0, %v8319_v4 }
 0x9a9   : > { %v2493_v1 = vmul.f32 0.17677669, %v2483_v0  ;;  %v2498_v2 = vsel %vm1563_vm2, %v2495_v63, -inf }
 0x9aa   : > { %2499 = vmax.xlane.f32.xlu0 %v2498_v2  ;;  %v7197_v5 = vpop.f32.mrf.mxu1 }
 0x9ab   : > { %v2496_v20 = vadd.f32 %v8738_v22, %v2493_v1 }
 0x9ac   : > { %v2488_v21 = vpop.f32.mrf.mxu1 }
 0x9ad   : > { %v2494_v23 = vmul.f32 0.17677669, %v2488_v21  ;;  %v2501_v37 = vsel %vm1563_vm2, %v2496_v20, -inf }
 0x9ae   : > { %2502 = vmax.xlane.f32.xlu1 %v2501_v37  ;;  %v7200_v38 = vpop.f32.mrf.mxu1 }
 0x9af   : > { %v2497_v3 = vadd.f32 %v8738_v22, %v2494_v23 }
 0x9b1   : > { %v2504_v39 = vsel %vm1563_vm2, %v2497_v3, -inf }
 0x9b2   : > { %2505 = vmax.xlane.f32.xlu0 %v2504_v39  ;;  %v7605_v39 = vld [vmem:[#allocation11 + $0x64] ss:$8 sps:$4 sm:$0xff]  }
 0xa33   : > { %v2500_v28 = vpop.xlane.xlu0 %2499 }
 0xa34   : > { %v2507_v41 = vsub.f32 %v2495_v63, %v2500_v28  ;;  %v7603_v28 = vld [vmem:[#allocation11 + $0x60] ss:$8 sps:$4 sm:$0xff]  }
 0xa36   : > { %v2510_v43 = vmul.f32 1.442695, %v2507_v41  ;;  %v1050_v41 = vsub.s32 3, %v8668_v6 }
 0xa37   : > { %v2503_v40 = vpop.xlane.xlu1 %2502 }
 0xa38   : > { %7858 = vpow2.f32 %v2510_v43  ;;  %v2508_v27 = vsub.f32 %v2496_v20, %v2503_v40  ;;  %v7978_v40 = vld [vmem:[%s9601_s5] sm:$0xf] }
 0xa3a   : > { %v2512_v42 = vmul.f32 1.442695, %v2508_v27  ;;  %v1051_v27 = vrot.slane %v7978_v40, %v1050_v41 }
 0xa3b   : > { %v2506_v44 = vpop.xlane.xlu0 %2505 }
 0xa3c   : > { %7860 = vpow2.f32 %v2512_v42  ;;  %v2509_v45 = vsub.f32 %v2497_v3, %v2506_v44 }
 0xa3e   : > { %v2514_v46 = vmul.f32 1.442695, %v2509_v45 }
 0xa40   : > { %7862 = vpow2.f32 %v2514_v46  ;;  %v8979_v46 = vadd.f32 %v8758_v59, %v1051_v27 }
 0xa45   : > { %v7859_v47 = vpop.eup %7858 }
 0xa46   : > { %v2516_v48 = vsel %vm1563_vm2, %v7859_v47, 0.0 }
 0xa47   : > { %2517 = vadd.xlane.f32.xlu0 %v2516_v48 }
 0xa49   : > { %v7861_v49 = vpop.eup %7860 }
 0xa4a   : > { %v2519_v50 = vsel %vm1563_vm2, %v7861_v49, 0.0 }
 0xa4b   : > { %2520 = vadd.xlane.f32.xlu0 %v2519_v50 }
 0xa4d   : > { %v7863_v51 = vpop.eup %7862 }
 0xa4e   : > { %v2522_v52 = vsel %vm1563_vm2, %v7863_v51, 0.0 }
 0xa4f   : > { %2523 = vadd.xlane.f32.xlu1 %v2522_v52 }
 0xa5f   : > { %v2373_v55 = vpop.f32.mrf.mxu0 }
 0xa60   : > { %v8917_v58 = vadd.f32 %v2373_v55, %v2064_v53 }
 0xa61   : > { %v2375_v60 = vpop.f32.mrf.mxu0  ;;  %2531 = vrot.lane.b32.xlu0 %v8752_v56, %s8324_s6  ;;  %v2074_v56 = vadd.f32 %v8811_v34, %v8854_v16  ;;  %v7600_v34 = vld [vmem:[#allocation11 + $0x70] ss:$8 sps:$4 sm:$0xff]   ;;  %v7602_v16 = vld [vmem:[#allocation11 + $0x74] ss:$8 sps:$4 sm:$0xff]  }
 0xa62   : > { %v8923_v62 = vadd.f32 %v2375_v60, %v2066_v57  ;;  %2667 = vmatprep.subr.bf16.mxu1 %v7602_v16 }
 0xa63   : > { %v2377_v8 = vpop.f32.mrf.mxu0  ;;  %2668 = vmatpush1.bf16.msra.mxu1 %v7600_v34 }
 0xa64   : > { %v8930_v63 = vadd.f32 %v2377_v8, %v2068_v61  ;;  %2669 = vmatprep.subr.bf16.mxu1 %v7605_v39 }
 0xa65   : > { %v2379_v25 = vpop.f32.mrf.mxu0  ;;  %3027 = vrot.lane.b32.xlu0 %v8926_v24, %s8321_s0 }
 0xa66   : > { %v8936_v12 = vadd.f32 %v2379_v25, %v2070_v13 }
 0xa67   : > { %v2383_v26 = vpop.f32.mrf.mxu0  ;;  %2670 = vmatpush1.bf16.msra.mxu1 %v7603_v28 }
 0xa68   : > { %v8940_v14 = vadd.f32 %v2383_v26, %v2074_v56  ;;  %7223 = vmatprep.subr.mxu1 %v8319_v4 }
 0xa69   : > { %v2385_v0 = vpop.f32.mrf.mxu0  ;;  %3023 = vrot.lane.b32.xlu0 %v8709_v32, %s8321_s0 }
 0xa6a   : > { %v8944_v29 = vadd.f32 %v2385_v0, %v2076_v30 }
 0xa6b   : > { %v2387_v15 = vpop.f32.mrf.mxu0 }
 0xa6d   : > { %v2388_v1 = vpop.f32.mrf.mxu0  ;;  %3025 = vrot.lane.b32.xlu0 %v8711_v33, %s8321_s0 }
 0xad0   : > { %v2518_v2 = vpop.xlane.xlu0 %2517 }
 0xad1   : > { %7864 = vrcp.f32 %v2518_v2 }
 0xad4   : > { %v2521_v36 = vpop.xlane.xlu0 %2520 }
 0xad5   : > { %7866 = vrcp.f32 %v2521_v36 }
 0xad8   : > { %v2524_v19 = vpop.xlane.xlu1 %2523  ;;  %v2532_v5 = vpop.permute.xlu0 %2531 }
 0xad9   : > { %7868 = vrcp.f32 %v2524_v19  ;;  %7202 = vmatpush3.msra.mxu0 %v2532_v5 }
 0xada   : > { %7212 = vmatprep.subr.mxu0 %v8319_v4 }
 0xade   : > { %v7865_v20 = vpop.eup %7864 }
 0xadf   : > { %v2528_v21 = vmul.f32 %v7865_v20, %v7859_v47 }
 0xae1   : > { %7204 = vmatmul.mubr.msk.f32.vlgmr.msra.gmra.mxu0 %vm1563_vm2, %v2528_v21 }
 0xae2   : > { %v7867_v23 = vpop.eup %7866  ;;  %7213 = vmatpush3.xpose.msk.msra.mxu0 %vm1458_vm1, %v8926_v24  ;;  %7206 = vmatprep.mubr.msk.f32.mxu0 %vm8320_vm0, %v8319_v4 }
 0xae3   : > { %v2529_v37 = vmul.f32 %v7867_v23, %v7861_v49 }
 0xae5   : > { %7207 = vmatmul.mubr.msk.f32.gmra.mxu0 %vm1563_vm2, %v2529_v37 }
 0xae6   : > { %v7869_v38 = vpop.eup %7868  ;;  %7209 = vmatprep.mubr.msk.f32.mxu0 %vm8320_vm0, %v8319_v4 }
 0xae7   : > { %v2530_v3 = vmul.f32 %v7869_v38, %v7863_v51 }
 0xae9   : > { %7210 = vmatmul.mubr.msk.f32.gmra.mxu0 %vm1563_vm2, %v2530_v3 }
 0xaea   : > { %7214 = vmatprep.mubr.msk.f32.mxu0 %vm8320_vm0, %v8319_v4 }
 0xaed   : > { %7215 = vmatmul.mubr.msk.f32.vlgmr.msra.gmra.mxu0 %vm1458_vm1, %v8707_v31 }
 0xaee   : > { %7217 = vmatprep.mubr.msk.f32.mxu0 %vm8320_vm0, %v8319_v4 }
 0xaf1   : > { %7218 = vmatmul.mubr.msk.f32.gmra.mxu0 %vm1458_vm1, %v8709_v32 }
 0xaf2   : > { %7220 = vmatprep.mubr.msk.f32.mxu0 %vm8320_vm0, %v8319_v4 }
 0xaf5   : > { %7221 = vmatmul.mubr.msk.f32.gmra.mxu0 %vm1458_vm1, %v8711_v33 }
 0xaf6   : > { %2996 = vmatprep.mubr.bf16.mxu0 %v8322_v35 }
 0xba1   : > { %v2609_v43 = vpop.f32.mrf.mxu0 }
 0xba3   : > { %v7205_v42 = vpop.f32.mrf.mxu0 }
 0xba5   : > { %v2614_v44 = vpop.f32.mrf.mxu0 }
 0xba6   : > { %v2627_v45 = vpack.c.bf16 %v2614_v44, %v2609_v43 }
 0xba7   : > { %v7208_v47 = vpop.f32.mrf.mxu0 }
 0xba8   : > { %6746 = vmatmul.mubr.msk.bf16.vlgmr.msra.gmra.mxu1 %vm1458_vm1, %v2627_v45 }
 0xba9   : > { %7224 = vmatpush3.msra.mxu1 %v8979_v46  ;;  %v2619_v48 = vpop.f32.mrf.mxu0  ;;  %2697 = vmatprep.mubr.bf16.mxu1 %v8322_v35 }
 0xbaa   : > { %7234 = vmatprep.subr.mxu1 %v8319_v4  ;;  %v2628_v51 = vpack.c.bf16 %v2619_v48, %v2619_v48 }
 0xbab   : > { %v7211_v49 = vpop.f32.mrf.mxu0 }
 0xbad   : > { %v2790_v50 = vpop.f32.mrf.mxu0 }
 0xbae   : > { %v2804_v52 = vmul.f32 0.17677669, %v2790_v50 }
 0xbaf   : > { %v7216_v53 = vpop.f32.mrf.mxu0 }
 0xbb0   : > { %6747 = vmatmul.mubr.msk.bf16.gmra.mxu1 %vm1458_vm1, %v2628_v51  ;;  %v2807_v59 = vadd.f32 %v8738_v22, %v2804_v52  ;;  %v7608_v51 = vld [vmem:[#allocation11 + $0x94] ss:$8 sps:$4 sm:$0xff]  }
 0xbb1   : > { %v2795_v54 = vpop.f32.mrf.mxu0  ;;  %7225 = vmatprep.mubr.msk.f32.mxu1 %vm8320_vm0, %v8319_v4  ;;  %2976 = vmatprep.subr.bf16.mxu0 %v7608_v51 }
 0xbb2   : > { %v2805_v55 = vmul.f32 0.17677669, %v2795_v54  ;;  %v2810_v57 = vsel %vm1563_vm2, %v2807_v59, -inf }
 0xbb3   : > { %2811 = vmax.xlane.f32.xlu1 %v2810_v57  ;;  %v7219_v60 = vpop.f32.mrf.mxu0 }
 0xbb4   : > { %v2808_v61 = vadd.f32 %v8738_v22, %v2805_v55 }
 0xbb5   : > { %v2800_v8 = vpop.f32.mrf.mxu0 }
 0xbb6   : > { %v2806_v13 = vmul.f32 0.17677669, %v2800_v8  ;;  %v2813_v25 = vsel %vm1563_vm2, %v2808_v61, -inf }
 0xbb7   : > { %2814 = vmax.xlane.f32.xlu1 %v2813_v25  ;;  %v7222_v56 = vpop.f32.mrf.mxu0  ;;  %v7611_v25 = vld [vmem:[#allocation11 + $0x84] ss:$8 sps:$4 sm:$0xff]  }
 0xbb8   : > { %v2809_v26 = vadd.f32 %v8738_v22, %v2806_v13  ;;  %v7609_v13 = vld [vmem:[#allocation11 + $0x80] ss:$8 sps:$4 sm:$0xff]  }
 0xbba   : > { %v2816_v30 = vsel %vm1563_vm2, %v2809_v26, -inf }
 0xbbb   : > { %2817 = vmax.xlane.f32.xlu1 %v2816_v30 }
 0xc3c   : > { %v2812_v0 = vpop.xlane.xlu1 %2811 }
 0xc3d   : > { %v2819_v15 = vsub.f32 %v2807_v59, %v2812_v0 }
 0xc3f   : > { %v2822_v1 = vmul.f32 1.442695, %v2819_v15 }
 0xc40   : > { %v2815_v34 = vpop.xlane.xlu1 %2814 }
 0xc41   : > { %7870 = vpow2.f32 %v2822_v1  ;;  %v2820_v16 = vsub.f32 %v2808_v61, %v2815_v34 }
 0xc43   : > { %v2824_v2 = vmul.f32 1.442695, %v2820_v16 }
 0xc44   : > { %v2818_v36 = vpop.xlane.xlu1 %2817 }
 0xc45   : > { %7872 = vpow2.f32 %v2824_v2  ;;  %v2821_v19 = vsub.f32 %v2809_v26, %v2818_v36 }
 0xc47   : > { %v2826_v5 = vmul.f32 1.442695, %v2821_v19 }
 0xc49   : > { %7874 = vpow2.f32 %v2826_v5  ;;  %v9041_v5 = vld [vmem:[%s588_s23] ss:$0 sm:$0xff]  ;;  %s8222_s23 = sshll.u32 %s8325_s28, 4  ;;  %s8223_s23 = int_to_ptr.vmem [resolvable:$false] %s8222_s23 }
 0xc4a   : > { %s8224_s26 = scalar_lea.vmem %s8223_s23, 1536 }
 0xc4e   : > { %v7871_v20 = vpop.eup %7870 }
 0xc4f   : > { %v2828_v21 = vsel %vm1563_vm2, %v7871_v20, 0.0 }
 0xc50   : > { %2829 = vadd.xlane.f32.xlu1 %v2828_v21 }
 0xc52   : > { %v7873_v22 = vpop.eup %7872 }
 0xc53   : > { %v2831_v23 = vsel %vm1563_vm2, %v7873_v22, 0.0 }
 0xc54   : > { %2832 = vadd.xlane.f32.xlu1 %v2831_v23 }
 0xc56   : > { %v7875_v37 = vpop.eup %7874 }
 0xc57   : > { %v2834_v38 = vsel %vm1563_vm2, %v7875_v37, 0.0 }
 0xc58   : > { %2835 = vadd.xlane.f32.xlu1 %v2834_v38 }
 0xc68   : > { %v2689_v3 = vpop.f32.mrf.mxu1 }
 0xc69   : > { %v8998_v39 = vadd.f32 %v2689_v3, %v8917_v58  ;;  %3021 = vrot.lane.b32.xlu1 %v8707_v31, %s8321_s0 }
 0xc6a   : > { %v2691_v28 = vpop.f32.mrf.mxu1 }
 0xc6b   : > { %v9003_v43 = vadd.f32 %v2691_v28, %v8923_v62  ;;  %v7606_v62 = vld [vmem:[#allocation11 + $0x90] ss:$8 sps:$4 sm:$0xff]  }
 0xc6c   : > { %v2693_v40 = vpop.f32.mrf.mxu1  ;;  %2977 = vmatpush1.bf16.msra.mxu0 %v7606_v62 }
 0xc6d   : > { %v9006_v27 = vadd.f32 %v2693_v40, %v8930_v63  ;;  %2978 = vmatprep.subr.bf16.mxu0 %v7611_v25 }
 0xc6e   : > { %v2695_v42 = vpop.f32.mrf.mxu1 }
 0xc6f   : > { %v9009_v44 = vadd.f32 %v2695_v42, %v8936_v12 }
 0xc70   : > { %v2699_v45 = vpop.f32.mrf.mxu1  ;;  %2979 = vmatpush1.bf16.msra.mxu0 %v7609_v13 }
 0xc71   : > { %v9012_v47 = vadd.f32 %v2699_v45, %v8940_v14  ;;  %v3028_v14 = vpop.permute.xlu0 %3027  ;;  %7245 = vmatprep.subr.mxu0 %v8319_v4 }
 0xc72   : > { %v2701_v58 = vpop.f32.mrf.mxu1 }
 0xc73   : > { %v9015_v48 = vadd.f32 %v2701_v58, %v8944_v29 }
 0xc74   : > { %v2703_v49 = vpop.f32.mrf.mxu1 }
 0xc75   : > { %v3024_v61 = vpop.permute.xlu0 %3023 }
 0xc76   : > { %v2704_v50 = vpop.f32.mrf.mxu1 }
 0xc79   : > { %v3026_v8 = vpop.permute.xlu0 %3025 }
 0xcd9   : > { %v2830_v63 = vpop.xlane.xlu1 %2829 }
 0xcda   : > { %7876 = vrcp.f32 %v2830_v63 }
 0xcdd   : > { %v2833_v52 = vpop.xlane.xlu1 %2832 }
 0xcde   : > { %7878 = vrcp.f32 %v2833_v52 }
 0xce1   : > { %v2836_v12 = vpop.xlane.xlu1 %2835 }
 0xce2   : > { %7880 = vrcp.f32 %v2836_v12 }
 0xce5   : > { %v3022_v60 = vpop.permute.xlu1 %3021 }
 0xce7   : > { %v7877_v53 = vpop.eup %7876 }
 0xce8   : > { %v2840_v59 = vmul.f32 %v7877_v53, %v7871_v20 }
 0xcea   : > { %7226 = vmatmul.mubr.msk.f32.vlgmr.msra.gmra.mxu1 %vm1563_vm2, %v2840_v59 }
 0xceb   : > { %v7879_v54 = vpop.eup %7878  ;;  %7235 = vmatpush3.xpose.msk.msra.mxu1 %vm1458_vm1, %v3028_v14  ;;  %7228 = vmatprep.mubr.msk.f32.mxu1 %vm8320_vm0, %v8319_v4 }
 0xcec   : > { %v2841_v29 = vmul.f32 %v7879_v54, %v7873_v22 }
 0xcee   : > { %7229 = vmatmul.mubr.msk.f32.gmra.mxu1 %vm1563_vm2, %v2841_v29 }
 0xcef   : > { %v7881_v55 = vpop.eup %7880  ;;  %7231 = vmatprep.mubr.msk.f32.mxu1 %vm8320_vm0, %v8319_v4 }
 0xcf0   : > { %v2842_v57 = vmul.f32 %v7881_v55, %v7875_v37 }
 0xcf2   : > { %7232 = vmatmul.mubr.msk.f32.gmra.mxu1 %vm1563_vm2, %v2842_v57 }
 0xcf3   : > { %7236 = vmatprep.mubr.msk.f32.mxu1 %vm8320_vm0, %v8319_v4 }
 0xcf6   : > { %7237 = vmatmul.mubr.msk.f32.vlgmr.msra.gmra.mxu1 %vm1458_vm1, %v3022_v60 }
 0xcf7   : > { %7239 = vmatprep.mubr.msk.f32.mxu1 %vm8320_vm0, %v8319_v4 }
 0xcfa   : > { %7240 = vmatmul.mubr.msk.f32.gmra.mxu1 %vm1458_vm1, %v3024_v61 }
 0xcfb   : > { %7242 = vmatprep.mubr.msk.f32.mxu1 %vm8320_vm0, %v8319_v4 }
 0xcfe   : > { %7243 = vmatmul.mubr.msk.f32.gmra.mxu1 %vm1458_vm1, %v3026_v8 }
 0xcff   : > { %3313 = vmatprep.mubr.bf16.mxu1 %v8322_v35 }
 0xdaa   : > { %v2918_v56 = vpop.f32.mrf.mxu1 }
 0xdac   : > { %v7227_v26 = vpop.f32.mrf.mxu1 }
 0xdae   : > { %v2923_v30 = vpop.f32.mrf.mxu1 }
 0xdaf   : > { %v2936_v0 = vpack.c.bf16 %v2923_v30, %v2918_v56 }
 0xdb0   : > { %v7230_v15 = vpop.f32.mrf.mxu1 }
 0xdb1   : > { %6759 = vmatmul.mubr.msk.bf16.vlgmr.msra.gmra.mxu0 %vm1458_vm1, %v2936_v0 }
 0xdb2   : > { %v2928_v1 = vpop.f32.mrf.mxu1  ;;  %3006 = vmatprep.mubr.bf16.mxu0 %v8322_v35 }
 0xdb3   : > { %v2937_v2 = vpack.c.bf16 %v2928_v1, %v2928_v1 }
 0xdb4   : > { %v7233_v34 = vpop.f32.mrf.mxu1 }
 0xdb6   : > { %v3103_v16 = vpop.f32.mrf.mxu1 }
 0xdb7   : > { %v3117_v36 = vmul.f32 0.17677669, %v3103_v16 }
 0xdb8   : > { %v7238_v19 = vpop.f32.mrf.mxu1 }
 0xdb9   : > { %6760 = vmatmul.mubr.msk.bf16.gmra.mxu0 %vm1458_vm1, %v2937_v2  ;;  %v3120_v20 = vadd.f32 %v9041_v5, %v3117_v36  ;;  %v7612_v36 = vld [vmem:[#allocation11 + $0xb0] ss:$8 sps:$4 sm:$0xff]  }
 0xdba   : > { %v3108_v21 = vpop.f32.mrf.mxu1  ;;  %7247 = vmatprep.mubr.msk.f32.mxu0 %vm8320_vm0, %v8319_v4 }
 0xdbb   : > { %v3118_v22 = vmul.f32 0.17677669, %v3108_v21  ;;  %v3123_v23 = vsel %vm1563_vm2, %v3120_v20, -inf }
 0xdbc   : > { %3124 = vmax.xlane.f32.xlu0 %v3123_v23  ;;  %v7241_v37 = vpop.f32.mrf.mxu1 }
 0xdbd   : > { %v3121_v38 = vadd.f32 %v9041_v5, %v3118_v22 }
 0xdbe   : > { %v3113_v3 = vpop.f32.mrf.mxu1 }
 0xdbf   : > { %v3119_v28 = vmul.f32 0.17677669, %v3113_v3  ;;  %v3126_v40 = vsel %vm1563_vm2, %v3121_v38, -inf }
 0xdc0   : > { %3127 = vmax.xlane.f32.xlu1 %v3126_v40  ;;  %v7244_v42 = vpop.f32.mrf.mxu1 }
 0xdc1   : > { %v3122_v45 = vadd.f32 %v9041_v5, %v3119_v28  ;;  %v7615_v42 = vld [vmem:[#allocation11 + $0xa0] ss:$8 sps:$4 sm:$0xff]  }
 0xdc3   : > { %v3129_v58 = vsel %vm1563_vm2, %v3122_v45, -inf }
 0xdc4   : > { %3130 = vmax.xlane.f32.xlu0 %v3129_v58 }
 0xdd1   : > { %3157 = vrot.lane.b32.xlu1 %v8979_v46, %s8321_s0 }
 0xdd5   : > { %3338 = vrot.lane.b32.xlu1 %v8707_v31, %s8323_s18 }
 0xdd9   : > { %3340 = vrot.lane.b32.xlu1 %v8709_v32, %s8323_s18 }
 0xddd   : > { %3342 = vrot.lane.b32.xlu1 %v8711_v33, %s8323_s18 }
 0xe45   : > { %v3125_v49 = vpop.xlane.xlu0 %3124 }
 0xe46   : > { %v3132_v50 = vsub.f32 %v3120_v20, %v3125_v49 }
 0xe48   : > { %v3135_v62 = vmul.f32 1.442695, %v3132_v50 }
 0xe49   : > { %v3128_v51 = vpop.xlane.xlu1 %3127 }
 0xe4a   : > { %7882 = vpow2.f32 %v3135_v62  ;;  %v3133_v63 = vsub.f32 %v3121_v38, %v3128_v51 }
 0xe4c   : > { %v3137_v52 = vmul.f32 1.442695, %v3133_v63 }
 0xe4d   : > { %v3158_v12 = vpop.permute.xlu1 %3157  ;;  %v3131_v53 = vpop.xlane.xlu0 %3130 }
 0xe4e   : > { %7884 = vpow2.f32 %v3137_v52  ;;  %v3134_v59 = vsub.f32 %v3122_v45, %v3131_v53  ;;  %7246 = vmatpush3.msra.mxu0 %v3158_v12  ;;  %v7617_v45 = vld [vmem:[#allocation11 + $0xa4] ss:$8 sps:$4 sm:$0xff]  }
 0xe4f   : > { %7256 = vmatprep.subr.mxu0 %v8319_v4 }
 0xe50   : > { %v3139_v14 = vmul.f32 1.442695, %v3134_v59 }
 0xe51   : > { %v3339_v3 = vpop.permute.xlu1 %3338 }
 0xe52   : > { %7886 = vpow2.f32 %v3139_v14 }
 0xe55   : > { %v3341_v28 = vpop.permute.xlu1 %3340 }
 0xe57   : > { %v7883_v54 = vpop.eup %7882 }
 0xe58   : > { %v3141_v29 = vsel %vm1563_vm2, %v7883_v54, 0.0 }
 0xe59   : > { %3142 = vadd.xlane.f32.xlu0 %v3141_v29  ;;  %v3343_v40 = vpop.permute.xlu1 %3342 }
 0xe5b   : > { %v7885_v55 = vpop.eup %7884 }
 0xe5c   : > { %v3144_v57 = vsel %vm1563_vm2, %v7885_v55, 0.0 }
 0xe5d   : > { %3145 = vadd.xlane.f32.xlu0 %v3144_v57 }
 0xe5f   : > { %v7887_v60 = vpop.eup %7886 }
 0xe60   : > { %v3147_v61 = vsel %vm1563_vm2, %v7887_v60, 0.0 }
 0xe61   : > { %3148 = vadd.xlane.f32.xlu0 %v3147_v61 }
 0xe71   : > { %v2998_v8 = vpop.f32.mrf.mxu0 }
 0xe72   : > { %v9064_v13 = vadd.f32 %v2998_v8, %v8998_v39 }
 0xe73   : > { %v3000_v25 = vpop.f32.mrf.mxu0 }
 0xe74   : > { %v9067_v56 = vadd.f32 %v3000_v25, %v9003_v43 }
 0xe75   : > { %v3002_v26 = vpop.f32.mrf.mxu0 }
 0xe76   : > { %v9070_v30 = vadd.f32 %v3002_v26, %v9006_v27  ;;  %v7614_v27 = vld [vmem:[#allocation11 + $0xb4] ss:$8 sps:$4 sm:$0xff]  }
 0xe77   : > { %v3004_v0 = vpop.f32.mrf.mxu0  ;;  %3344 = vrot.lane.b32.xlu0 %v8926_v24, %s8323_s18  ;;  %3293 = vmatprep.subr.bf16.mxu1 %v7614_v27 }
 0xe78   : > { %v9075_v15 = vadd.f32 %v3004_v0, %v9009_v44  ;;  %3294 = vmatpush1.bf16.msra.mxu1 %v7612_v36 }
 0xe79   : > { %v3008_v1 = vpop.f32.mrf.mxu0  ;;  %3295 = vmatprep.subr.bf16.mxu1 %v7617_v45 }
 0xe7a   : > { %v9078_v34 = vadd.f32 %v3008_v1, %v9012_v47 }
 0xe7b   : > { %v3010_v39 = vpop.f32.mrf.mxu0 }
 0xe7c   : > { %v9081_v16 = vadd.f32 %v3010_v39, %v9015_v48  ;;  %3296 = vmatpush1.bf16.msra.mxu1 %v7615_v42 }
 0xe7d   : > { %v3012_v43 = vpop.f32.mrf.mxu0  ;;  %7267 = vmatprep.subr.mxu1 %v8319_v4 }
 0xe7f   : > { %v3013_v2 = vpop.f32.mrf.mxu0 }
 0xee2   : > { %v3143_v19 = vpop.xlane.xlu0 %3142 }
 0xee3   : > { %7888 = vrcp.f32 %v3143_v19 }
 0xee6   : > { %v3146_v20 = vpop.xlane.xlu0 %3145 }
 0xee7   : > { %7890 = vrcp.f32 %v3146_v20 }
 0xeea   : > { %v3149_v44 = vpop.xlane.xlu0 %3148 }
 0xeeb   : > { %7892 = vrcp.f32 %v3149_v44 }
 0xeee   : > { %v3345_v47 = vpop.permute.xlu0 %3344 }
 0xef0   : > { %v7889_v21 = vpop.eup %7888 }
 0xef1   : > { %v3153_v22 = vmul.f32 %v7889_v21, %v7883_v54 }
 0xef3   : > { %7248 = vmatmul.mubr.msk.f32.vlgmr.msra.gmra.mxu0 %vm1563_vm2, %v3153_v22 }
 0xef4   : > { %v7891_v23 = vpop.eup %7890  ;;  %7257 = vmatpush3.xpose.msk.msra.mxu0 %vm1458_vm1, %v3345_v47  ;;  %7250 = vmatprep.mubr.msk.f32.mxu0 %vm8320_vm0, %v8319_v4 }
 0xef5   : > { %v3154_v48 = vmul.f32 %v7891_v23, %v7885_v55 }
 0xef7   : > { %7251 = vmatmul.mubr.msk.f32.gmra.mxu0 %vm1563_vm2, %v3154_v48 }
 0xef8   : > { %v7893_v37 = vpop.eup %7892  ;;  %7253 = vmatprep.mubr.msk.f32.mxu0 %vm8320_vm0, %v8319_v4 }
 0xef9   : > { %v3155_v38 = vmul.f32 %v7893_v37, %v7887_v60 }
 0xefb   : > { %7254 = vmatmul.mubr.msk.f32.gmra.mxu0 %vm1563_vm2, %v3155_v38 }
 0xefc   : > { %7258 = vmatprep.mubr.msk.f32.mxu0 %vm8320_vm0, %v8319_v4 }
 0xeff   : > { %7259 = vmatmul.mubr.msk.f32.vlgmr.msra.gmra.mxu0 %vm1458_vm1, %v3339_v3 }
 0xf00   : > { %7261 = vmatprep.mubr.msk.f32.mxu0 %vm8320_vm0, %v8319_v4 }
 0xf03   : > { %7262 = vmatmul.mubr.msk.f32.gmra.mxu0 %vm1458_vm1, %v3341_v28 }
 0xf04   : > { %7264 = vmatprep.mubr.msk.f32.mxu0 %vm8320_vm0, %v8319_v4 }
 0xf07   : > { %7265 = vmatmul.mubr.msk.f32.gmra.mxu0 %vm1458_vm1, %v3343_v40 }
 0xf08   : > { %3629 = vmatprep.mubr.bf16.mxu0 %v8322_v35 }
 0xfb3   : > { %v3235_v58 = vpop.f32.mrf.mxu0 }
 0xfb5   : > { %v7249_v49 = vpop.f32.mrf.mxu0 }
 0xfb7   : > { %v3240_v50 = vpop.f32.mrf.mxu0 }
 0xfb8   : > { %v3253_v62 = vpack.c.bf16 %v3240_v50, %v3235_v58 }
 0xfb9   : > { %v7252_v51 = vpop.f32.mrf.mxu0 }
 0xfba   : > { %6772 = vmatmul.mubr.msk.bf16.vlgmr.msra.gmra.mxu1 %vm1458_vm1, %v3253_v62 }
 0xfbb   : > { %v3245_v63 = vpop.f32.mrf.mxu0  ;;  %3323 = vmatprep.mubr.bf16.mxu1 %v8322_v35 }
 0xfbc   : > { %v3254_v53 = vpack.c.bf16 %v3245_v63, %v3245_v63  ;;  %v7618_v63 = vld [vmem:[#allocation11 + $0xd0] ss:$8 sps:$4 sm:$0xff]  }
 0xfbd   : > { %v7255_v52 = vpop.f32.mrf.mxu0 }
 0xfbf   : > { %v3420_v12 = vpop.f32.mrf.mxu0 }
 0xfc0   : > { %v3434_v59 = vmul.f32 0.17677669, %v3420_v12 }
 0xfc1   : > { %v7260_v14 = vpop.f32.mrf.mxu0 }
 0xfc2   : > { %6773 = vmatmul.mubr.msk.bf16.gmra.mxu1 %vm1458_vm1, %v3254_v53  ;;  %v3437_v54 = vadd.f32 %v9041_v5, %v3434_v59 }
 0xfc3   : > { %v3425_v29 = vpop.f32.mrf.mxu0  ;;  %7269 = vmatprep.mubr.msk.f32.mxu1 %vm8320_vm0, %v8319_v4 }
 0xfc4   : > { %v3435_v55 = vmul.f32 0.17677669, %v3425_v29  ;;  %v3440_v57 = vsel %vm1563_vm2, %v3437_v54, -inf }
 0xfc5   : > { %3441 = vmax.xlane.f32.xlu0 %v3440_v57  ;;  %v7263_v60 = vpop.f32.mrf.mxu0 }
 0xfc6   : > { %v3438_v61 = vadd.f32 %v9041_v5, %v3435_v55 }
 0xfc7   : > { %v3430_v8 = vpop.f32.mrf.mxu0 }
 0xfc8   : > { %v3436_v25 = vmul.f32 0.17677669, %v3430_v8  ;;  %v3443_v26 = vsel %vm1563_vm2, %v3438_v61, -inf  ;;  %v7623_v8 = vld [vmem:[#allocation11 + $0xc4] ss:$8 sps:$4 sm:$0xff]  }
 0xfc9   : > { %3444 = vmax.xlane.f32.xlu1 %v3443_v26  ;;  %v7266_v0 = vpop.f32.mrf.mxu0 }
 0xfca   : > { %v3439_v1 = vadd.f32 %v9041_v5, %v3436_v25 }
 0xfcc   : > { %v3446_v39 = vsel %vm1563_vm2, %v3439_v1, -inf }
 0xfcd   : > { %3447 = vmax.xlane.f32.xlu0 %v3446_v39 }
 0xfda   : > { %3660 = vrot.lane.b32.xlu1 %v8926_v24, %s8324_s6 }
 0xfde   : > { %3654 = vrot.lane.b32.xlu1 %v8707_v31, %s8324_s6 }
0x104e   : > { %v3442_v43 = vpop.xlane.xlu0 %3441 }
0x104f   : > { %v3449_v2 = vsub.f32 %v3437_v54, %v3442_v43 }
0x1051   : > { %v3452_v36 = vmul.f32 1.442695, %v3449_v2 }
0x1052   : > { %v3445_v27 = vpop.xlane.xlu1 %3444 }
0x1053   : > { %7894 = vpow2.f32 %v3452_v36  ;;  %v3450_v19 = vsub.f32 %v3438_v61, %v3445_v27  ;;  %v7621_v61 = vld [vmem:[#allocation11 + $0xc0] ss:$8 sps:$4 sm:$0xff]  }
0x1055   : > { %v3454_v20 = vmul.f32 1.442695, %v3450_v19 }
0x1056   : > { %v3448_v44 = vpop.xlane.xlu0 %3447  ;;  %v3661_v52 = vpop.permute.xlu1 %3660 }
0x1057   : > { %7896 = vpow2.f32 %v3454_v20  ;;  %v3451_v21 = vsub.f32 %v3439_v1, %v3448_v44 }
0x1059   : > { %v3456_v22 = vmul.f32 1.442695, %v3451_v21 }
0x105a   : > { %v3655_v12 = vpop.permute.xlu1 %3654 }
0x105b   : > { %7898 = vpow2.f32 %v3456_v22 }
0x1060   : > { %v7895_v47 = vpop.eup %7894 }
0x1061   : > { %v3458_v23 = vsel %vm1563_vm2, %v7895_v47, 0.0 }
0x1062   : > { %3459 = vadd.xlane.f32.xlu0 %v3458_v23 }
0x1064   : > { %v7897_v24 = vpop.eup %7896 }
0x1065   : > { %v3461_v48 = vsel %vm1563_vm2, %v7897_v24, 0.0 }
0x1066   : > { %3462 = vadd.xlane.f32.xlu0 %v3461_v48 }
0x1068   : > { %v7899_v31 = vpop.eup %7898 }
0x1069   : > { %v3464_v37 = vsel %vm1563_vm2, %v7899_v31, 0.0 }
0x106a   : > { %3465 = vadd.xlane.f32.xlu1 %v3464_v37 }
0x107a   : > { %v3315_v38 = vpop.f32.mrf.mxu1 }
0x107b   : > { %v9121_v3 = vadd.f32 %v3315_v38, %v9064_v13  ;;  %3656 = vrot.lane.b32.xlu1 %v8709_v32, %s8324_s6 }
0x107c   : > { %3473 = vrot.lane.b32.xlu0 %v8979_v46, %s8323_s18  ;;  %v3317_v28 = vpop.f32.mrf.mxu1 }
0x107d   : > { %v9128_v40 = vadd.f32 %v3317_v28, %v9067_v56 }
0x107e   : > { %v3319_v42 = vpop.f32.mrf.mxu1 }
0x107f   : > { %v9131_v45 = vadd.f32 %v3319_v42, %v9070_v30  ;;  %v7620_v30 = vld [vmem:[#allocation11 + $0xd4] ss:$8 sps:$4 sm:$0xff]  }
0x1080   : > { %3658 = vrot.lane.b32.xlu0 %v8711_v33, %s8324_s6  ;;  %v3321_v58 = vpop.f32.mrf.mxu1  ;;  %3609 = vmatprep.subr.bf16.mxu0 %v7620_v30 }
0x1081   : > { %v9136_v13 = vadd.f32 %v3321_v58, %v9075_v15  ;;  %3610 = vmatpush1.bf16.msra.mxu0 %v7618_v63 }
0x1082   : > { %v3325_v49 = vpop.f32.mrf.mxu1  ;;  %3611 = vmatprep.subr.bf16.mxu0 %v7623_v8 }
0x1083   : > { %v9139_v32 = vadd.f32 %v3325_v49, %v9078_v34 }
0x1084   : > { %v3327_v50 = vpop.f32.mrf.mxu1 }
0x1085   : > { %v9142_v62 = vadd.f32 %v3327_v50, %v9081_v16  ;;  %3612 = vmatpush1.bf16.msra.mxu0 %v7621_v61 }
0x1086   : > { %v3329_v56 = vpop.f32.mrf.mxu1  ;;  %7289 = vmatprep.subr.mxu0 %v8319_v4 }
0x1088   : > { %v3330_v51 = vpop.f32.mrf.mxu1 }
0x10eb   : > { %v3460_v33 = vpop.xlane.xlu0 %3459 }
0x10ec   : > { %7900 = vrcp.f32 %v3460_v33 }
0x10ef   : > { %v3463_v15 = vpop.xlane.xlu0 %3462 }
0x10f0   : > { %7902 = vrcp.f32 %v3463_v15 }
0x10f3   : > { %v3466_v53 = vpop.xlane.xlu1 %3465  ;;  %v3474_v59 = vpop.permute.xlu0 %3473 }
0x10f4   : > { %7904 = vrcp.f32 %v3466_v53  ;;  %7268 = vmatpush3.msra.mxu1 %v3474_v59 }
0x10f5   : > { %7278 = vmatprep.subr.mxu1 %v8319_v4 }
0x10f7   : > { %v3657_v57 = vpop.permute.xlu1 %3656  ;;  %v3659_v60 = vpop.permute.xlu0 %3658 }
0x10f9   : > { %v7901_v34 = vpop.eup %7900 }
0x10fa   : > { %v3470_v16 = vmul.f32 %v7901_v34, %v7895_v47 }
0x10fc   : > { %7270 = vmatmul.mubr.msk.f32.vlgmr.msra.gmra.mxu1 %vm1563_vm2, %v3470_v16 }
0x10fd   : > { %v7903_v14 = vpop.eup %7902  ;;  %7279 = vmatpush3.xpose.msk.msra.mxu1 %vm1458_vm1, %v3661_v52  ;;  %7272 = vmatprep.mubr.msk.f32.mxu1 %vm8320_vm0, %v8319_v4 }
0x10fe   : > { %v3471_v54 = vmul.f32 %v7903_v14, %v7897_v24 }
0x1100   : > { %7273 = vmatmul.mubr.msk.f32.gmra.mxu1 %vm1563_vm2, %v3471_v54 }
0x1101   : > { %v7905_v29 = vpop.eup %7904  ;;  %7275 = vmatprep.mubr.msk.f32.mxu1 %vm8320_vm0, %v8319_v4 }
0x1102   : > { %v3472_v55 = vmul.f32 %v7905_v29, %v7899_v31 }
0x1104   : > { %7276 = vmatmul.mubr.msk.f32.gmra.mxu1 %vm1563_vm2, %v3472_v55 }
0x1105   : > { %7280 = vmatprep.mubr.msk.f32.mxu1 %vm8320_vm0, %v8319_v4 }
0x1108   : > { %7281 = vmatmul.mubr.msk.f32.vlgmr.msra.gmra.mxu1 %vm1458_vm1, %v3655_v12 }
0x1109   : > { %7283 = vmatprep.mubr.msk.f32.mxu1 %vm8320_vm0, %v8319_v4 }
0x110c   : > { %7284 = vmatmul.mubr.msk.f32.gmra.mxu1 %vm1458_vm1, %v3657_v57 }
0x110d   : > { %7286 = vmatprep.mubr.msk.f32.mxu1 %vm8320_vm0, %v8319_v4 }
0x1110   : > { %7287 = vmatmul.mubr.msk.f32.gmra.mxu1 %vm1458_vm1, %v3659_v60 }
0x1111   : > { %3945 = vmatprep.mubr.bf16.mxu1 %v8322_v35 }
0x11bc   : > { %v3551_v25 = vpop.f32.mrf.mxu1 }
0x11be   : > { %v7271_v26 = vpop.f32.mrf.mxu1 }
0x11c0   : > { %v3556_v0 = vpop.f32.mrf.mxu1 }
0x11c1   : > { %v3569_v1 = vpack.c.bf16 %v3556_v0, %v3551_v25  ;;  %v7624_v0 = vld [vmem:[#allocation11 + $0xf0] ss:$8 sps:$4 sm:$0xff]  }
0x11c2   : > { %v7274_v39 = vpop.f32.mrf.mxu1 }
0x11c3   : > { %6785 = vmatmul.mubr.msk.bf16.vlgmr.msra.gmra.mxu0 %vm1458_vm1, %v3569_v1  ;;  %v7626_v1 = vld [vmem:[#allocation11 + $0xf4] ss:$8 sps:$4 sm:$0xff]  }
0x11c4   : > { %v3561_v43 = vpop.f32.mrf.mxu1  ;;  %3639 = vmatprep.mubr.bf16.mxu0 %v8322_v35  ;;  %3925 = vmatprep.subr.bf16.mxu1 %v7626_v1  ;;  %v4121_v1 = vld [vmem:[#allocation14 + $0x180] sm:$0xff] }
0x11c5   : > { %v3570_v27 = vpack.c.bf16 %v3561_v43, %v3561_v43  ;;  %3926 = vmatpush1.bf16.msra.mxu1 %v7624_v0  ;;  %v4134_v0 = vld [vmem:[#allocation14 + $0x1e8] sm:$0xff] }
0x11c6   : > { %v7277_v2 = vpop.f32.mrf.mxu1 }
0x11c8   : > { %v3736_v36 = vpop.f32.mrf.mxu1 }
0x11c9   : > { %v3750_v19 = vmul.f32 0.17677669, %v3736_v36 }
0x11ca   : > { %v7282_v20 = vpop.f32.mrf.mxu1 }
0x11cb   : > { %6786 = vmatmul.mubr.msk.bf16.gmra.mxu0 %vm1458_vm1, %v3570_v27  ;;  %v3753_v44 = vadd.f32 %v9041_v5, %v3750_v19  ;;  %v7627_v20 = vld [vmem:[#allocation11 + $0xe0] ss:$8 sps:$4 sm:$0xff]  }
0x11cc   : > { %v3741_v21 = vpop.f32.mrf.mxu1  ;;  %7291 = vmatprep.mubr.msk.f32.mxu0 %vm8320_vm0, %v8319_v4 }
0x11cd   : > { %v3751_v22 = vmul.f32 0.17677669, %v3741_v21  ;;  %v3756_v47 = vsel %vm1563_vm2, %v3753_v44, -inf }
0x11ce   : > { %3757 = vmax.xlane.f32.xlu1 %v3756_v47  ;;  %v7285_v23 = vpop.f32.mrf.mxu1 }
0x11cf   : > { %v3754_v24 = vadd.f32 %v9041_v5, %v3751_v22 }
0x11d0   : > { %v3746_v48 = vpop.f32.mrf.mxu1 }
0x11d1   : > { %v3752_v31 = vmul.f32 0.17677669, %v3746_v48  ;;  %v3759_v37 = vsel %vm1563_vm2, %v3754_v24, -inf }
0x11d2   : > { %3760 = vmax.xlane.f32.xlu0 %v3759_v37  ;;  %v7288_v38 = vpop.f32.mrf.mxu1 }
0x11d3   : > { %v3755_v28 = vadd.f32 %v9041_v5, %v3752_v31 }
0x11d5   : > { %v3762_v42 = vsel %vm1563_vm2, %v3755_v28, -inf }
0x11d6   : > { %3763 = vmax.xlane.f32.xlu0 %v3762_v42 }
0x1257   : > { %v3758_v58 = vpop.xlane.xlu1 %3757 }
0x1258   : > { %v3765_v49 = vsub.f32 %v3753_v44, %v3758_v58  ;;  %v7629_v44 = vld [vmem:[#allocation11 + $0xe4] ss:$8 sps:$4 sm:$0xff]  }
0x1259   : > { %3927 = vmatprep.subr.bf16.mxu1 %v7629_v44 }
0x125a   : > { %v3768_v50 = vmul.f32 1.442695, %v3765_v49  ;;  %3928 = vmatpush1.bf16.msra.mxu1 %v7627_v20 }
0x125b   : > { %v3761_v56 = vpop.xlane.xlu0 %3760 }
0x125c   : > { %7906 = vpow2.f32 %v3768_v50  ;;  %v3766_v51 = vsub.f32 %v3754_v24, %v3761_v56 }
0x125e   : > { %v3770_v63 = vmul.f32 1.442695, %v3766_v51 }
0x125f   : > { %v3764_v30 = vpop.xlane.xlu0 %3763 }
0x1260   : > { %7908 = vpow2.f32 %v3770_v63  ;;  %v3767_v52 = vsub.f32 %v3755_v28, %v3764_v30 }
0x1262   : > { %v3772_v33 = vmul.f32 1.442695, %v3767_v52 }
0x1264   : > { %7910 = vpow2.f32 %v3772_v33 }
0x1269   : > { %v7907_v12 = vpop.eup %7906 }
0x126a   : > { %v3774_v15 = vsel %vm1563_vm2, %v7907_v12, 0.0 }
0x126b   : > { %3775 = vadd.xlane.f32.xlu0 %v3774_v15 }
0x126d   : > { %v7909_v5 = vpop.eup %7908 }
0x126e   : > { %v3777_v53 = vsel %vm1563_vm2, %v7909_v5, 0.0 }
0x126f   : > { %3778 = vadd.xlane.f32.xlu1 %v3777_v53 }
0x1271   : > { %v7911_v59 = vpop.eup %7910 }
0x1272   : > { %v3780_v34 = vsel %vm1563_vm2, %v7911_v59, 0.0 }
0x1273   : > { %3781 = vadd.xlane.f32.xlu1 %v3780_v34 }
0x1281   : > { %3789 = vrot.lane.b32.xlu0 %v8979_v46, %s8324_s6  ;;  %s7300_s6 = smul.u32 48, %s8627_s30 }
0x1283   : > { %v3631_v16 = vpop.f32.mrf.mxu0  ;;  %s668_s2 = scalar_lea.vmem [#allocation17], %s7300_s6 }
0x1284   : > { %v3648_v14 = vadd.f32 %v3631_v16, %v9121_v3  ;;  %s6417_s10 = sshll.u32 %s668_s2, 4  ;;  %s9553_s10 = int_to_ptr.vmem [resolvable:$true] %s6417_s10 }
0x1285   : > { %v3633_v54 = vpop.f32.mrf.mxu0  ;;  %s8218_s9 = scalar_lea.vmem %s9553_s10, 768  ;;  %p8225_p2 = scmp.lt.s32.totalorder %s9553_s10, %s8223_s23 }
0x1286   : > { %v3649_v29 = vadd.f32 %v3633_v54, %v9128_v40  ;;  %p8219_p8 = scmp.ne.s32.totalorder %s9553_s10, %s8218_s9  ;;  %p8226_p1 = scmp.lt.s32.totalorder %s8224_s26, %s8218_s9 }
0x1287   : > { %v3635_v55 = vpop.f32.mrf.mxu0 }
0x1288   : > { %v3650_v57 = vadd.f32 %v3635_v55, %v9131_v45  ;;  %p8220_p12 = pnand %p8219_p8, %p9666_p3  ;;  %p8227_p5 = por %p8226_p1, %p8225_p2 }
0x1289   : > { %v3637_v60 = vpop.f32.mrf.mxu0 }
0x128a   : > { %v3651_v61 = vadd.f32 %v3637_v60, %v9136_v13  ;;  %v4129_v60 = vld [vmem:[#allocation14 + $0x1c0] sm:$0xff]  ;;  %p8221_p6 = pneg %p8220_p12 }
0x128b   : > { %v3641_v8 = vpop.f32.mrf.mxu0 }
0x128c   : > { %v3652_v25 = vadd.f32 %v3641_v8, %v9139_v32  ;;  %v4130_v8 = vld [vmem:[#allocation14 + $0x1c8] sm:$0xff]  ;;  %p8228_p4 = pnand %p8227_p5, %p8221_p6 }
0x128d   : > { %v3643_v26 = vpop.f32.mrf.mxu0 }
0x128e   : > { %v3653_v46 = vadd.f32 %v3643_v26, %v9142_v62 }
0x128f   : > { %v3645_v39 = vpop.f32.mrf.mxu0 }
0x1290   : > { %v6858_v39 = vcombine.low %v4130_v8, %v4134_v0 }
0x1291   : > { %v3646_v3 = vpop.f32.mrf.mxu0 }
0x1292   : > { %v6859_v3 = vcombine.high %v4130_v8, %v4134_v0  ;;  %v4077_v0 = vld [vmem:[#allocation14 + $0x20] sm:$0xff] }
0x1294   : > { %4938 = vmatprep.subr.bf16.mxu1 %v6859_v3 }
0x12f4   : > { %v3776_v43 = vpop.xlane.xlu0 %3775 }
0x12f5   : > { %7912 = vrcp.f32 %v3776_v43 }
0x12f8   : > { %v3779_v40 = vpop.xlane.xlu1 %3778  ;;  %v3790_v2 = vpop.permute.xlu0 %3789 }
0x12f9   : > { %7914 = vrcp.f32 %v3779_v40  ;;  %7290 = vmatpush3.msra.mxu0 %v3790_v2  ;;  %v4122_v40 = vld [vmem:[#allocation14 + $0x188] sm:$0xff] }
0x12fa   : > { %v4126_v2 = vld [vmem:[#allocation14 + $0x1a8] sm:$0xff] }
0x12fc   : > { %v3782_v45 = vpop.xlane.xlu1 %3781 }
0x12fd   : > { %7916 = vrcp.f32 %v3782_v45  ;;  %v4113_v45 = vld [vmem:[#allocation14 + $0x140] sm:$0xff] }
0x1302   : > { %v7913_v13 = vpop.eup %7912 }
0x1303   : > { %v3786_v36 = vmul.f32 %v7913_v13, %v7907_v12  ;;  %v6851_v13 = vcombine.high %v4122_v40, %v4126_v2 }
0x1305   : > { %7292 = vmatmul.mubr.msk.f32.vlgmr.msra.gmra.mxu0 %vm1563_vm2, %v3786_v36  ;;  %v4117_v36 = vld [vmem:[#allocation14 + $0x160] sm:$0xff] }
0x1306   : > { %v7915_v32 = vpop.eup %7914  ;;  %7294 = vmatprep.mubr.msk.f32.mxu0 %vm8320_vm0, %v8319_v4  ;;  %v6841_v20 = vcombine.high %v4113_v45, %v4117_v36 }
0x1307   : > { %v3787_v62 = vmul.f32 %v7915_v32, %v7909_v5  ;;  %v4114_v32 = vld [vmem:[#allocation14 + $0x148] sm:$0xff] }
0x1309   : > { %7295 = vmatmul.mubr.msk.f32.gmra.mxu0 %vm1563_vm2, %v3787_v62  ;;  %v4118_v62 = vld [vmem:[#allocation14 + $0x168] sm:$0xff] }
0x130a   : > { %v7917_v27 = vpop.eup %7916  ;;  %7297 = vmatprep.mubr.msk.f32.mxu0 %vm8320_vm0, %v8319_v4  ;;  %v3970_v4 = vld [vmem:[%s9603_s7] sm:$0x3]  ;;  %v6843_v44 = vcombine.high %v4114_v32, %v4118_v62 }
0x130b   : > { %v3788_v19 = vmul.f32 %v7917_v27, %v7911_v59  ;;  %v3975_v42 = vrot.slane %v3970_v4, %v8671_v7  ;;  %v3979_v58 = vrot.slane %v3970_v4, %v8689_v17  ;;  %v4097_v4 = vld [vmem:[#allocation14 + $0xc0] sm:$0xff] }
0x130d   : > { %7298 = vmatmul.mubr.msk.f32.gmra.mxu0 %vm1563_vm2, %v3788_v19  ;;  %v6850_v19 = vcombine.low %v4122_v40, %v4126_v2  ;;  %v4193_v2 = vld [vmem:[#allocation14 + $0x3c0] sm:$0xff] }
0x13c5   : > { %v3867_v21 = vpop.f32.mrf.mxu0 }
0x13c7   : > { %v7293_v22 = vpop.f32.mrf.mxu0 }
0x13c8   : > { %v4109_v22 = vld [vmem:[#allocation14 + $0x120] sm:$0xff] }
0x13c9   : > { %v3872_v47 = vpop.f32.mrf.mxu0 }
0x13ca   : > { %v3885_v23 = vpack.c.bf16 %v3872_v47, %v3867_v21  ;;  %v4105_v21 = vld [vmem:[#allocation14 + $0x100] sm:$0xff]  ;;  %v4106_v47 = vld [vmem:[#allocation14 + $0x108] sm:$0xff] }
0x13cb   : > { %v7296_v24 = vpop.f32.mrf.mxu0 }
0x13cc   : > { %6798 = vmatmul.mubr.msk.bf16.vlgmr.msra.gmra.mxu1 %vm1458_vm1, %v3885_v23  ;;  %v4110_v23 = vld [vmem:[#allocation14 + $0x128] sm:$0xff]  ;;  %v6840_v24 = vcombine.low %v4113_v45, %v4117_v36  ;;  %v4197_v45 = vld [vmem:[#allocation14 + $0x3e0] sm:$0xff] }
0x13cd   : > { %v3877_v48 = vpop.f32.mrf.mxu0  ;;  %3955 = vmatprep.mubr.bf16.mxu1 %v8322_v35  ;;  %4939 = vmatpush1.bf16.msra.mxu1 %v6858_v39  ;;  %v4198_v36 = vld [vmem:[#allocation14 + $0x3e8] sm:$0xff] }
0x13ce   : > { %v3886_v37 = vpack.c.bf16 %v3877_v48, %v3877_v48  ;;  %4940 = vmatprep.subr.bf16.mxu1 %v6851_v13  ;;  %v6842_v48 = vcombine.low %v4114_v32, %v4118_v62  ;;  %v4194_v13 = vld [vmem:[#allocation14 + $0x3c8] sm:$0xff] }
0x13cf   : > { %v7299_v31 = vpop.f32.mrf.mxu0 }
0x13d0   : > { %v6833_v31 = vcombine.high %v4105_v21, %v4109_v22 }
0x13d1   : > { %4941 = vmatpush1.bf16.msra.mxu1 %v6850_v19  ;;  %v6923_v19 = vcombine.high %v4194_v13, %v4198_v36 }
0x13d2   : > { %4942 = vmatprep.subr.bf16.mxu1 %v6843_v44  ;;  %v6922_v44 = vcombine.low %v4194_v13, %v4198_v36  ;;  %v4166_v36 = vld [vmem:[#allocation14 + $0x2e8] sm:$0xff] }
0x13d4   : > { %6799 = vmatmul.mubr.msk.bf16.gmra.mxu1 %vm1458_vm1, %v3886_v37  ;;  %v6835_v37 = vcombine.high %v4106_v47, %v4110_v23 }
0x13d5   : > { %4943 = vmatpush1.bf16.msra.mxu1 %v6842_v48 }
0x13d6   : > { %4944 = vmatprep.subr.bf16.mxu1 %v6835_v37 }
0x148c   : > { %v3947_v38 = vpop.f32.mrf.mxu1 }
0x148d   : > { %v3964_v28 = vadd.f32 %v3947_v38, %v3648_v14  ;;  %v4101_v38 = vld [vmem:[#allocation14 + $0xe0] sm:$0xff] }
0x148e   : > { %v3949_v49 = vpop.f32.mrf.mxu1 }
0x148f   : > { %v3965_v50 = vadd.f32 %v3949_v49, %v3649_v29  ;;  %v9201_v51 = vadd.f32 %v3975_v42, %v3964_v28  ;;  %v4098_v28 = vld [vmem:[#allocation14 + $0xc8] sm:$0xff]  ;;  %v6834_v49 = vcombine.low %v4106_v47, %v4110_v23 }
0x1490   : > { %v3951_v56 = vpop.f32.mrf.mxu1 }
0x1491   : > { %v9203_v35 = vadd.f32 %v3979_v58, %v3965_v50  ;;  %v3966_v63 = vadd.f32 %v3951_v56, %v3650_v57  ;;  %v6825_v50 = vcombine.high %v4097_v4, %v4101_v38  ;;  %4945 = vmatpush1.bf16.msra.mxu1 %v6834_v49 }
0x1492   : > { %v3953_v30 = vpop.f32.mrf.mxu1 }
0x1493   : > { %v3967_v52 = vadd.f32 %v3953_v30, %v3651_v61  ;;  %v3990_v33 = vadd.f32 %v9203_v35, %v9201_v51  ;;  %v9207_v15 = vadd.f32 %v3975_v42, %v3966_v63  ;;  %v4133_v61 = vld [vmem:[#allocation14 + $0x1e0] sm:$0xff] }
0x1494   : > { %v3957_v12 = vpop.f32.mrf.mxu1  ;;  %v6857_v26 = vcombine.high %v4129_v60, %v4133_v61  ;;  %v4089_v63 = vld [vmem:[#allocation14 + $0x80] sm:$0xff] }
0x1495   : > { %v9209_v5 = vadd.f32 %v3979_v58, %v3967_v52  ;;  %v3968_v53 = vadd.f32 %v3957_v12, %v3652_v25  ;;  %3991 = vadd.xlane.f32.xlu1 %v3990_v33  ;;  %v6856_v25 = vcombine.low %v4129_v60, %v4133_v61  ;;  %v4093_v30 = vld [vmem:[#allocation14 + $0xa0] sm:$0xff]  ;;  %v4090_v52 = vld [vmem:[#allocation14 + $0x88] sm:$0xff]  ;;  %v6824_v12 = vcombine.low %v4097_v4, %v4101_v38 }
0x1496   : > { %v3959_v59 = vpop.f32.mrf.mxu1  ;;  %4887 = vmatprep.subr.bf16.mxu0 %v6857_v26  ;;  %v4094_v33 = vld [vmem:[#allocation14 + $0xa8] sm:$0xff]  ;;  %v6816_v60 = vcombine.low %v4089_v63, %v4093_v30  ;;  %v4073_v26 = vld [vmem:[#allocation14] sm:$0xff] }
0x1497   : > { %v3969_v34 = vadd.f32 %v3959_v59, %v3653_v46  ;;  %v3993_v16 = vadd.f32 %v9209_v5, %v9207_v15  ;;  %v9213_v54 = vadd.f32 %v3975_v42, %v3968_v53  ;;  %v4125_v46 = vld [vmem:[#allocation14 + $0x1a0] sm:$0xff]  ;;  %4888 = vmatpush1.bf16.msra.mxu0 %v6856_v25  ;;  %v4102_v42 = vld [vmem:[#allocation14 + $0xe8] sm:$0xff]  ;;  %v6817_v59 = vcombine.high %v4089_v63, %v4093_v30 }
0x1498   : > { %v3961_v14 = vpop.f32.mrf.mxu1  ;;  %v6849_v43 = vcombine.high %v4121_v1, %v4125_v46  ;;  %v6848_v27 = vcombine.low %v4121_v1, %v4125_v46  ;;  %v6827_v56 = vcombine.high %v4098_v28, %v4102_v42  ;;  %v6826_v53 = vcombine.low %v4098_v28, %v4102_v42  ;;  %v4074_v1 = vld [vmem:[#allocation14 + $0x8] sm:$0xff]  ;;  %v4185_v30 = vld [vmem:[#allocation14 + $0x380] sm:$0xff] }
0x1499   : > { %v9215_v29 = vadd.f32 %v3979_v58, %v3969_v34  ;;  %3994 = vadd.xlane.f32.xlu1 %v3993_v16  ;;  %v6832_v58 = vcombine.low %v4105_v21, %v4109_v22  ;;  %v6819_v34 = vcombine.high %v4090_v52, %v4094_v33  ;;  %v4081_v16 = vld [vmem:[#allocation14 + $0x40] sm:$0xff]  ;;  %v6818_v61 = vcombine.low %v4090_v52, %v4094_v33  ;;  %v4078_v46 = vld [vmem:[#allocation14 + $0x28] sm:$0xff] }
0x149a   : > { %v3962_v55 = vpop.f32.mrf.mxu1  ;;  %4889 = vmatprep.subr.bf16.mxu0 %v6849_v43  ;;  %4946 = vmatprep.subr.bf16.mxu1 %v6827_v56  ;;  %v4085_v14 = vld [vmem:[#allocation14 + $0x60] sm:$0xff]  ;;  %v6801_v43 = vcombine.high %v4073_v26, %v4077_v0  ;;  %v6803_v40 = vcombine.high %v4074_v1, %v4078_v46  ;;  %v6800_v32 = vcombine.low %v4073_v26, %v4077_v0  ;;  %v4186_v33 = vld [vmem:[#allocation14 + $0x388] sm:$0xff] }
0x149b   : > { %v3996_v57 = vadd.f32 %v9215_v29, %v9213_v54  ;;  %4890 = vmatpush1.bf16.msra.mxu0 %v6848_v27  ;;  %v4082_v55 = vld [vmem:[#allocation14 + $0x48] sm:$0xff]  ;;  %4947 = vmatpush1.bf16.msra.mxu1 %v6826_v53  ;;  %v6809_v8 = vcombine.high %v4081_v16, %v4085_v14  ;;  %v6808_v39 = vcombine.low %v4081_v16, %v4085_v14  ;;  %v4189_v52 = vld [vmem:[#allocation14 + $0x3a0] sm:$0xff] }
0x149c   : > { %4891 = vmatprep.subr.bf16.mxu0 %v6841_v20  ;;  %4948 = vmatprep.subr.bf16.mxu1 %v6819_v34  ;;  %v6802_v62 = vcombine.low %v4074_v1, %v4078_v46  ;;  %v6921_v27 = vcombine.high %v4193_v2, %v4197_v45  ;;  %v6920_v20 = vcombine.low %v4193_v2, %v4197_v45  ;;  %v4190_v53 = vld [vmem:[#allocation14 + $0x3a8] sm:$0xff]  ;;  %v4181_v16 = vld [vmem:[#allocation14 + $0x360] sm:$0xff] }
0x149d   : > { %3997 = vadd.xlane.f32.xlu1 %v3996_v57  ;;  %v4086_v57 = vld [vmem:[#allocation14 + $0x68] sm:$0xff]  ;;  %v6915_v34 = vcombine.high %v4186_v33, %v4190_v53  ;;  %v4173_v26 = vld [vmem:[#allocation14 + $0x320] sm:$0xff] }
0x149e   : > { %v6811_v25 = vcombine.high %v4082_v55, %v4086_v57  ;;  %v6810_v3 = vcombine.low %v4082_v55, %v4086_v57  ;;  %v4178_v14 = vld [vmem:[#allocation14 + $0x348] sm:$0xff]  ;;  %v4165_v2 = vld [vmem:[#allocation14 + $0x2e0] sm:$0xff] }
0x149f   : > { %4892 = vmatpush1.bf16.msra.mxu0 %v6840_v24  ;;  %4949 = vmatpush1.bf16.msra.mxu1 %v6818_v61  ;;  %v4182_v57 = vld [vmem:[#allocation14 + $0x368] sm:$0xff] }
0x14a0   : > { %4893 = vmatprep.subr.bf16.mxu0 %v6833_v31  ;;  %4950 = vmatprep.subr.bf16.mxu1 %v6811_v25  ;;  %v6906_v61 = vcombine.low %v4178_v14, %v4182_v57  ;;  %v4169_v25 = vld [vmem:[#allocation14 + $0x300] sm:$0xff]  ;;  %v4170_v0 = vld [vmem:[#allocation14 + $0x308] sm:$0xff] }
0x14a1   : > { %v6897_v1 = vcombine.high %v4169_v25, %v4173_v26  ;;  %v4174_v46 = vld [vmem:[#allocation14 + $0x328] sm:$0xff] }
0x14a2   : > { %v4162_v45 = vld [vmem:[#allocation14 + $0x2c8] sm:$0xff] }
0x14a3   : > { %4894 = vmatpush1.bf16.msra.mxu0 %v6832_v58  ;;  %4951 = vmatpush1.bf16.msra.mxu1 %v6810_v3  ;;  %v6898_v3 = vcombine.low %v4170_v0, %v4174_v46 }
0x14a4   : > { %4895 = vmatprep.subr.bf16.mxu0 %v6825_v50  ;;  %4952 = vmatprep.subr.bf16.mxu1 %v6803_v40  ;;  %v4161_v40 = vld [vmem:[#allocation14 + $0x2c0] sm:$0xff] }
0x14a5   : > { %v6889_v13 = vcombine.high %v4161_v40, %v4165_v2 }
0x14a7   : > { %4896 = vmatpush1.bf16.msra.mxu0 %v6824_v12  ;;  %4953 = vmatpush1.bf16.msra.mxu1 %v6802_v62  ;;  %v6913_v12 = vcombine.high %v4185_v30, %v4189_v52  ;;  %v6890_v62 = vcombine.low %v4162_v45, %v4166_v36 }
0x14a8   : > { %4897 = vmatprep.subr.bf16.mxu0 %v6817_v59  ;;  %4954 = vmatprep.subr.bf16.mxu1 %v6923_v19  ;;  %v6914_v59 = vcombine.low %v4186_v33, %v4190_v53  ;;  %v4153_v19 = vld [vmem:[#allocation14 + $0x280] sm:$0xff]  ;;  %v4142_v33 = vld [vmem:[#allocation14 + $0x228] sm:$0xff] }
0x14ab   : > { %4898 = vmatpush1.bf16.msra.mxu0 %v6816_v60  ;;  %4955 = vmatpush2.bf16.msra.mxu1 %v6922_v44  ;;  %v4154_v44 = vld [vmem:[#allocation14 + $0x288] sm:$0xff] }
0x14ac   : > { %4899 = vmatprep.subr.bf16.mxu0 %v6809_v8  ;;  %4956 = vmatprep.subr.bf16.mxu1 %v6915_v34  ;;  %v6907_v8 = vcombine.high %v4178_v14, %v4182_v57  ;;  %v9251_v34 = vld [vmem:[#allocation14 + $0x1f0] sm:$0xff]  ;;  %v4136_v14 = vld [vmem:[#allocation14 + $0x1f8] sm:$0xff] }
0x14af   : > { %4900 = vmatpush1.bf16.msra.mxu0 %v6808_v39  ;;  %4957 = vmatpush2.bf16.msra.mxu1 %v6914_v59  ;;  %v6896_v39 = vcombine.low %v4169_v25, %v4173_v26  ;;  %v9249_v59 = vld [vmem:[#allocation14 + $0x1d0] sm:$0xff] }
0x14b0   : > { %4901 = vmatprep.subr.bf16.mxu0 %v6801_v43  ;;  %4958 = vmatprep.subr.bf16.mxu1 %v6907_v8  ;;  %v6899_v43 = vcombine.high %v4170_v0, %v4174_v46 }
0x14b3   : > { %4902 = vmatpush1.bf16.msra.mxu0 %v6800_v32  ;;  %4959 = vmatpush2.bf16.msra.mxu1 %v6906_v61  ;;  %v6888_v32 = vcombine.low %v4161_v40, %v4165_v2 }
0x14b4   : > { %4903 = vmatprep.subr.bf16.mxu0 %v6921_v27  ;;  %4960 = vmatprep.subr.bf16.mxu1 %v6899_v43  ;;  %v6891_v27 = vcombine.high %v4162_v45, %v4166_v36  ;;  %v3988_v43 = vld [vmem:[%s9604_s8] sm:$0x3]  ;;  %v3989_v36 = vld [vmem:[#allocation13] sm:$0x3] }
0x14b5   : > { %v4043_v2 = vrot.slane %v3988_v43, %v8671_v7  ;;  %v4047_v45 = vrot.slane %v3988_v43, %v8689_v17  ;;  %v4104_v43 = vld [vmem:[#allocation14 + $0xf8] sm:$0xff] }
0x14b7   : > { %4904 = vmatpush2.bf16.msra.mxu0 %v6920_v20  ;;  %4961 = vmatpush2.bf16.msra.mxu1 %v6898_v3  ;;  %v4157_v20 = vld [vmem:[#allocation14 + $0x2a0] sm:$0xff] }
0x14b8   : > { %4905 = vmatprep.subr.bf16.mxu0 %v6913_v12  ;;  %4962 = vmatprep.subr.bf16.mxu1 %v6891_v27 }
0x14bb   : > { %4963 = vmatpush2.bf16.msra.mxu1 %v6890_v62 }
0x151e   : > { %v3992_v21 = vpop.xlane.xlu1 %3991 }
0x151f   : > { %v4000_v22 = vmul.f32 0.00390625, %v3992_v21  ;;  %v6881_v21 = vcombine.high %v4153_v19, %v4157_v20 }
0x1521   : > { %v9220_v47 = vsub.f32 %v9201_v51, %v4000_v22  ;;  %v9223_v23 = vsub.f32 %v9203_v35, %v4000_v22  ;;  %v4158_v22 = vld [vmem:[#allocation14 + $0x2a8] sm:$0xff] }
0x1522   : > { %v3995_v24 = vpop.xlane.xlu1 %3994 }
0x1523   : > { %v4001_v48 = vmul.f32 0.00390625, %v3995_v24  ;;  %v4009_v31 = vmul.f32 %v9220_v47, %v9220_v47  ;;  %v4010_v37 = vmul.f32 %v9223_v23, %v9223_v23  ;;  %v6880_v24 = vcombine.low %v4153_v19, %v4157_v20 }
0x1524   : > { %v4060_v19 = vrot.slane %v3989_v36, %v8671_v7  ;;  %v4064_v20 = vrot.slane %v3989_v36, %v8689_v17  ;;  %v4091_v36 = vld [vmem:[#allocation14 + $0x90] sm:$0xff] }
0x1525   : > { %v9230_v4 = vsub.f32 %v9207_v15, %v4001_v48  ;;  %v9233_v38 = vsub.f32 %v9209_v5, %v4001_v48  ;;  %v4015_v28 = vadd.f32 %v4010_v37, %v4009_v31  ;;  %v6882_v48 = vcombine.low %v4154_v44, %v4158_v22  ;;  %v4145_v37 = vld [vmem:[#allocation14 + $0x240] sm:$0xff] }
0x1526   : > { %v3998_v51 = vpop.xlane.xlu1 %3997  ;;  %v6883_v31 = vcombine.high %v4154_v44, %v4158_v22 }
0x1527   : > { %v4002_v42 = vmul.f32 0.00390625, %v3998_v51  ;;  %4016 = vadd.xlane.f32.xlu1 %v4015_v28  ;;  %v4011_v35 = vmul.f32 %v9230_v4, %v9230_v4  ;;  %v4012_v58 = vmul.f32 %v9233_v38, %v9233_v38  ;;  %v4149_v28 = vld [vmem:[#allocation14 + $0x260] sm:$0xff]  ;;  %v4146_v51 = vld [vmem:[#allocation14 + $0x248] sm:$0xff] }
0x1528   : > { %4964 = vmatprep.subr.bf16.mxu1 %v6883_v31 }
0x1529   : > { %v9240_v49 = vsub.f32 %v9213_v54, %v4002_v42  ;;  %v9243_v50 = vsub.f32 %v9215_v29, %v4002_v42  ;;  %v4018_v15 = vadd.f32 %v4012_v58, %v4011_v35  ;;  %v6912_v54 = vcombine.low %v4185_v30, %v4189_v52  ;;  %v4177_v29 = vld [vmem:[#allocation14 + $0x340] sm:$0xff]  ;;  %4965 = vmatpush2.bf16.msra.mxu1 %v6882_v48  ;;  %v4150_v35 = vld [vmem:[#allocation14 + $0x268] sm:$0xff] }
0x152a   : > { %v6905_v55 = vcombine.high %v4177_v29, %v4181_v16  ;;  %v6904_v60 = vcombine.low %v4177_v29, %v4181_v16  ;;  %v6873_v42 = vcombine.high %v4145_v37, %v4149_v28  ;;  %v6872_v58 = vcombine.low %v4145_v37, %v4149_v28  ;;  %v4138_v30 = vld [vmem:[#allocation14 + $0x208] sm:$0xff]  ;;  %v9253_v29 = vld [vmem:[#allocation14 + $0x1d8] sm:$0xff]  ;;  %v4123_v28 = vld [vmem:[#allocation14 + $0x190] sm:$0xff] }
0x152b   : > { %4019 = vadd.xlane.f32.xlu1 %v4018_v15  ;;  %v4013_v5 = vmul.f32 %v9240_v49, %v9240_v49  ;;  %v4014_v56 = vmul.f32 %v9243_v50, %v9243_v50  ;;  %4906 = vmatpush2.bf16.msra.mxu0 %v6912_v54  ;;  %v6874_v15 = vcombine.low %v4146_v51, %v4150_v35 }
0x152c   : > { %4907 = vmatprep.subr.bf16.mxu0 %v6905_v55  ;;  %v6867_v53 = vcombine.high %v4138_v30, %v4142_v33  ;;  %v6866_v54 = vcombine.low %v4138_v30, %v4142_v33  ;;  %v6861_v16 = vcombine.high %v9249_v59, %v9251_v34  ;;  %v6860_v55 = vcombine.low %v9249_v59, %v9251_v34 }
0x152d   : > { %v4021_v63 = vadd.f32 %v4014_v56, %v4013_v5  ;;  %v6875_v5 = vcombine.high %v4146_v51, %v4150_v35  ;;  %v4137_v56 = vld [vmem:[#allocation14 + $0x200] sm:$0xff]  ;;  %v6862_v57 = vcombine.low %v9253_v29, %v4136_v14  ;;  %v4127_v35 = vld [vmem:[#allocation14 + $0x1b0] sm:$0xff] }
0x152e   : > { %v6852_v59 = vcombine.low %v4123_v28, %v4127_v35 }
0x152f   : > { %4022 = vadd.xlane.f32.xlu0 %v4021_v63  ;;  %4908 = vmatpush2.bf16.msra.mxu0 %v6904_v60  ;;  %v4141_v63 = vld [vmem:[#allocation14 + $0x220] sm:$0xff]  ;;  %v6863_v60 = vcombine.high %v9253_v29, %v4136_v14 }
0x1530   : > { %4909 = vmatprep.subr.bf16.mxu0 %v6897_v1  ;;  %v6865_v52 = vcombine.high %v4137_v56, %v4141_v63  ;;  %4966 = vmatprep.subr.bf16.mxu1 %v6875_v5  ;;  %v6864_v12 = vcombine.low %v4137_v56, %v4141_v63  ;;  %v6853_v63 = vcombine.high %v4123_v28, %v4127_v35 }
0x1531   : > { %4967 = vmatpush2.bf16.msra.mxu1 %v6874_v15  ;;  %v4128_v15 = vld [vmem:[#allocation14 + $0x1b8] sm:$0xff] }
0x1532   : > { %4968 = vmatprep.subr.bf16.mxu1 %v6867_v53  ;;  %v4116_v53 = vld [vmem:[#allocation14 + $0x158] sm:$0xff] }
0x1533   : > { %4910 = vmatpush2.bf16.msra.mxu0 %v6896_v39 }
0x1534   : > { %4911 = vmatprep.subr.bf16.mxu0 %v6889_v13 }
0x1535   : > { %4969 = vmatpush2.bf16.msra.mxu1 %v6866_v54  ;;  %v4120_v54 = vld [vmem:[#allocation14 + $0x178] sm:$0xff] }
0x1536   : > { %5040 = vmatprep.subr.bf16.mxu1 %v6863_v60  ;;  %v4107_v60 = vld [vmem:[#allocation14 + $0x110] sm:$0xff] }
0x1537   : > { %4912 = vmatpush2.bf16.msra.mxu0 %v6888_v32 }
0x1538   : > { %4913 = vmatprep.subr.bf16.mxu0 %v6881_v21 }
0x153b   : > { %4914 = vmatpush2.bf16.msra.mxu0 %v6880_v24 }
0x153c   : > { %4915 = vmatprep.subr.bf16.mxu0 %v6873_v42 }
0x153f   : > { %4916 = vmatpush2.bf16.msra.mxu0 %v6872_v58  ;;  %v4124_v58 = vld [vmem:[#allocation14 + $0x198] sm:$0xff] }
0x1540   : > { %4917 = vmatprep.subr.bf16.mxu0 %v6865_v52  ;;  %v6855_v30 = vcombine.high %v4124_v58, %v4128_v15  ;;  %v4115_v52 = vld [vmem:[#allocation14 + $0x150] sm:$0xff]  ;;  %v6854_v34 = vcombine.low %v4124_v58, %v4128_v15 }
0x1541   : > { %v4075_v15 = vld [vmem:[#allocation14 + $0x10] sm:$0xff] }
0x1543   : > { %4918 = vmatpush2.bf16.msra.mxu0 %v6864_v12  ;;  %v4119_v12 = vld [vmem:[#allocation14 + $0x170] sm:$0xff] }
0x1544   : > { %4989 = vmatprep.subr.bf16.mxu0 %v6861_v16  ;;  %v6845_v29 = vcombine.high %v4115_v52, %v4119_v12  ;;  %v6847_v16 = vcombine.high %v4116_v53, %v4120_v54 }
0x15b0   : > { %v4017_v61 = vpop.xlane.xlu1 %4016 }
0x15b1   : > { %v4024_v8 = vmul.f32 0.00390625, %v4017_v61  ;;  %v4111_v61 = vld [vmem:[#allocation14 + $0x130] sm:$0xff] }
0x15b3   : > { %v4027_v25 = vadd.f32 1e-05, %v4024_v8  ;;  %v6844_v8 = vcombine.low %v4115_v52, %v4119_v12  ;;  %v4195_v12 = vld [vmem:[#allocation14 + $0x3d0] sm:$0xff] }
0x15b4   : > { %v4020_v26 = vpop.xlane.xlu1 %4019 }
0x15b5   : > { %7918 = vrsqrt.f32 %v4027_v25  ;;  %v4025_v0 = vmul.f32 0.00390625, %v4020_v26  ;;  %v6846_v25 = vcombine.low %v4116_v53, %v4120_v54  ;;  %v4199_v53 = vld [vmem:[#allocation14 + $0x3f0] sm:$0xff]  ;;  %v4196_v54 = vld [vmem:[#allocation14 + $0x3d8] sm:$0xff] }
0x15b7   : > { %v4028_v1 = vadd.f32 1e-05, %v4025_v0  ;;  %v4099_v0 = vld [vmem:[#allocation14 + $0xd0] sm:$0xff] }
0x15b8   : > { %v4023_v46 = vpop.xlane.xlu0 %4022 }
0x15b9   : > { %7920 = vrsqrt.f32 %v4028_v1  ;;  %v4026_v39 = vmul.f32 0.00390625, %v4023_v46  ;;  %v6837_v1 = vcombine.high %v4107_v60, %v4111_v61 }
0x15bb   : > { %v4029_v3 = vadd.f32 1e-05, %v4026_v39  ;;  %v4103_v39 = vld [vmem:[#allocation14 + $0xf0] sm:$0xff] }
0x15bd   : > { %7922 = vrsqrt.f32 %v4029_v3  ;;  %v4100_v3 = vld [vmem:[#allocation14 + $0xd8] sm:$0xff] }
0x15c2   : > { %v7919_v40 = vpop.eup %7918 }
0x15c3   : > { %v4033_v13 = vmul.f32 %v7919_v40, %v9220_v47  ;;  %v4034_v32 = vmul.f32 %v7919_v40, %v9223_v23  ;;  %v6836_v40 = vcombine.low %v4107_v60, %v4111_v61  ;;  %v4187_v61 = vld [vmem:[#allocation14 + $0x390] sm:$0xff] }
0x15c5   : > { %v4051_v27 = vmul.f32 %v4047_v45, %v4034_v32  ;;  %v4050_v44 = vmul.f32 %v4043_v2, %v4033_v13  ;;  %v6831_v13 = vcombine.high %v4100_v3, %v4104_v43  ;;  %v4095_v32 = vld [vmem:[#allocation14 + $0xb0] sm:$0xff] }
0x15c6   : > { %v7921_v62 = vpop.eup %7920  ;;  %v6820_v28 = vcombine.low %v4091_v36, %v4095_v32 }
0x15c7   : > { %v4035_v21 = vmul.f32 %v7921_v62, %v9230_v4  ;;  %v4036_v22 = vmul.f32 %v7921_v62, %v9233_v38  ;;  %v9272_v37 = vadd.f32 %v4064_v20, %v4051_v27  ;;  %v9274_v47 = vadd.f32 %v4060_v19, %v4050_v44  ;;  %v4092_v62 = vld [vmem:[#allocation14 + $0x98] sm:$0xff] }
0x15c8   : > { %v4096_v27 = vld [vmem:[#allocation14 + $0xb8] sm:$0xff]  ;;  %v6821_v44 = vcombine.high %v4091_v36, %v4095_v32  ;;  %v4171_v32 = vld [vmem:[#allocation14 + $0x310] sm:$0xff] }
0x15c9   : > { %v4053_v24 = vmul.f32 %v4047_v45, %v4036_v22  ;;  %v4052_v48 = vmul.f32 %v4043_v2, %v4035_v21  ;;  %v6823_v21 = vcombine.high %v4092_v62, %v4096_v27  ;;  %v4083_v22 = vld [vmem:[#allocation14 + $0x50] sm:$0xff] }
0x15ca   : > { %v7923_v31 = vpop.eup %7922 }
0x15cb   : > { %v9276_v23 = vadd.f32 %v4064_v20, %v4053_v24  ;;  %v9278_v51 = vadd.f32 %v4060_v19, %v4052_v48  ;;  %v4038_v42 = vmul.f32 %v7923_v31, %v9243_v50  ;;  %v4037_v4 = vmul.f32 %v7923_v31, %v9240_v49  ;;  %v4087_v24 = vld [vmem:[#allocation14 + $0x70] sm:$0xff]  ;;  %v4084_v48 = vld [vmem:[#allocation14 + $0x58] sm:$0xff] }
0x15cc   : > { %v4088_v31 = vld [vmem:[#allocation14 + $0x78] sm:$0xff]  ;;  %v6813_v35 = vcombine.high %v4083_v22, %v4087_v24 }
0x15cd   : > { %v4202_v38 = vpack.c.bf16 %v9276_v23, %v9272_v37  ;;  %v9286_v5 = vpack.c.bf16 %v9278_v51, %v9274_v47  ;;  %v4055_v56 = vmul.f32 %v4047_v45, %v4038_v42  ;;  %v4054_v33 = vmul.f32 %v4043_v2, %v4037_v4  ;;  %v4079_v4 = vld [vmem:[#allocation14 + $0x30] sm:$0xff] }
0x15ce   : > { %v6829_v45 = vcombine.high %v4099_v0, %v4103_v39  ;;  %v6822_v42 = vcombine.low %v4092_v62, %v4096_v27  ;;  %v6815_v58 = vcombine.high %v4084_v48, %v4088_v31  ;;  %v6805_v52 = vcombine.high %v4075_v15, %v4079_v4  ;;  %v4175_v62 = vld [vmem:[#allocation14 + $0x330] sm:$0xff]  ;;  %v4172_v27 = vld [vmem:[#allocation14 + $0x318] sm:$0xff] }
0x15cf   : > { %4919 = vmatprep.mubr.bf16.mxu0 %v4202_v38  ;;  %4970 = vmatprep.mubr.bf16.mxu1 %v4202_v38  ;;  %v9288_v50 = vadd.f32 %v4064_v20, %v4055_v56  ;;  %v9296_v14 = vadd.f32 %v4060_v19, %v4054_v33  ;;  %v6828_v19 = vcombine.low %v4099_v0, %v4103_v39  ;;  %v4080_v56 = vld [vmem:[#allocation14 + $0x38] sm:$0xff]  ;;  %v4179_v39 = vld [vmem:[#allocation14 + $0x350] sm:$0xff] }
0x15d0   : > { %4920 = vmatmul.mubr.bf16.vlgmr.msra.gmra.mxu0 %v9286_v5  ;;  %4971 = vmatmul.mubr.bf16.vlgmr.msra.gmra.mxu1 %v9286_v5  ;;  %v6830_v20 = vcombine.low %v4100_v3, %v4104_v43  ;;  %v4183_v3 = vld [vmem:[#allocation14 + $0x370] sm:$0xff]  ;;  %v4180_v43 = vld [vmem:[#allocation14 + $0x358] sm:$0xff] }
0x15d1   : > { %4990 = vmatpush1.bf16.msra.mxu0 %v6860_v55  ;;  %5041 = vmatpush1.bf16.msra.mxu1 %v6862_v57  ;;  %v9294_v49 = vpack.c.bf16 %v9288_v50, %v9288_v50  ;;  %v4108_v55 = vld [vmem:[#allocation14 + $0x118] sm:$0xff]  ;;  %v9302_v26 = vpack.c.bf16 %v9296_v14, %v9296_v14 }
0x15d2   : > { %4991 = vmatprep.subr.bf16.mxu0 %v6853_v63  ;;  %5042 = vmatprep.subr.bf16.mxu1 %v6855_v30  ;;  %v4112_v57 = vld [vmem:[#allocation14 + $0x138] sm:$0xff]  ;;  %v6812_v63 = vcombine.low %v4083_v22, %v4087_v24  ;;  %v6814_v30 = vcombine.low %v4084_v48, %v4088_v31  ;;  %v4163_v24 = vld [vmem:[#allocation14 + $0x2d0] sm:$0xff] }
0x15d3   : > { %4929 = vmatprep.mubr.bf16.mxu0 %v9294_v49  ;;  %4980 = vmatprep.mubr.bf16.mxu1 %v9294_v49  ;;  %v6839_v46 = vcombine.high %v4108_v55, %v4112_v57  ;;  %v6838_v2 = vcombine.low %v4108_v55, %v4112_v57  ;;  %v4191_v55 = vld [vmem:[#allocation14 + $0x3b0] sm:$0xff]  ;;  %v4188_v57 = vld [vmem:[#allocation14 + $0x398] sm:$0xff] }
0x15d4   : > { %v4167_v48 = vld [vmem:[#allocation14 + $0x2f0] sm:$0xff]  ;;  %v4164_v31 = vld [vmem:[#allocation14 + $0x2d8] sm:$0xff] }
0x15d5   : > { %4992 = vmatpush1.bf16.msra.mxu0 %v6852_v59  ;;  %5043 = vmatpush1.bf16.msra.mxu1 %v6854_v34  ;;  %v4200_v59 = vld [vmem:[#allocation14 + $0x3f8] sm:$0xff]  ;;  %v6804_v34 = vcombine.low %v4075_v15, %v4079_v4  ;;  %v4155_v4 = vld [vmem:[#allocation14 + $0x290] sm:$0xff] }
0x15d6   : > { %4993 = vmatprep.subr.bf16.mxu0 %v6845_v29  ;;  %5044 = vmatprep.subr.bf16.mxu1 %v6847_v16  ;;  %v6925_v16 = vcombine.high %v4195_v12, %v4199_v53  ;;  %v6927_v60 = vcombine.high %v4196_v54, %v4200_v59  ;;  %v6926_v0 = vcombine.low %v4196_v54, %v4200_v59  ;;  %v4151_v54 = vld [vmem:[#allocation14 + $0x270] sm:$0xff]  ;;  %v4148_v59 = vld [vmem:[#allocation14 + $0x258] sm:$0xff] }
0x15d8   : > { %4930 = vmatmul.mubr.bf16.gmra.mxu0 %v9302_v26  ;;  %4981 = vmatmul.mubr.bf16.gmra.mxu1 %v9302_v26 }
0x15d9   : > { %4994 = vmatpush1.bf16.msra.mxu0 %v6844_v8  ;;  %5045 = vmatpush1.bf16.msra.mxu1 %v6846_v25  ;;  %v4192_v8 = vld [vmem:[#allocation14 + $0x3b8] sm:$0xff]  ;;  %v6924_v25 = vcombine.low %v4195_v12, %v4199_v53  ;;  %v4147_v53 = vld [vmem:[#allocation14 + $0x250] sm:$0xff] }
0x15da   : > { %5021 = vmatprep.mubr.bf16.mxu0 %v4202_v38  ;;  %5072 = vmatprep.mubr.bf16.mxu1 %v4202_v38  ;;  %v4076_v38 = vld [vmem:[#allocation14 + $0x18] sm:$0xff] }
0x15db   : > { %4995 = vmatprep.subr.bf16.mxu0 %v6837_v1  ;;  %5046 = vmatprep.subr.bf16.mxu1 %v6839_v46  ;;  %v6807_v33 = vcombine.high %v4076_v38, %v4080_v56  ;;  %v6806_v29 = vcombine.low %v4076_v38, %v4080_v56  ;;  %v6917_v1 = vcombine.high %v4187_v61, %v4191_v55  ;;  %v4159_v38 = vld [vmem:[#allocation14 + $0x2b0] sm:$0xff]  ;;  %v4156_v56 = vld [vmem:[#allocation14 + $0x298] sm:$0xff] }
0x15dc   : > { %v6919_v46 = vcombine.high %v4188_v57, %v4192_v8 }
0x15dd   : > { %4996 = vmatpush1.bf16.msra.mxu0 %v6836_v40  ;;  %5047 = vmatpush1.bf16.msra.mxu1 %v6838_v2  ;;  %v4184_v40 = vld [vmem:[#allocation14 + $0x378] sm:$0xff]  ;;  %v6916_v2 = vcombine.low %v4187_v61, %v4191_v55  ;;  %v4139_v55 = vld [vmem:[#allocation14 + $0x210] sm:$0xff] }
0x15de   : > { %4997 = vmatprep.subr.bf16.mxu0 %v6829_v45  ;;  %5048 = vmatprep.subr.bf16.mxu1 %v6831_v13  ;;  %v6918_v45 = vcombine.low %v4188_v57, %v4192_v8  ;;  %v6909_v13 = vcombine.high %v4179_v39, %v4183_v3  ;;  %v6911_v36 = vcombine.high %v4180_v43, %v4184_v40  ;;  %v4143_v57 = vld [vmem:[#allocation14 + $0x230] sm:$0xff]  ;;  %v4140_v8 = vld [vmem:[#allocation14 + $0x218] sm:$0xff] }
0x15e1   : > { %4998 = vmatpush1.bf16.msra.mxu0 %v6828_v19  ;;  %5049 = vmatpush1.bf16.msra.mxu1 %v6830_v20  ;;  %v4176_v19 = vld [vmem:[#allocation14 + $0x338] sm:$0xff]  ;;  %v6908_v20 = vcombine.low %v4179_v39, %v4183_v3  ;;  %v6868_v3 = vcombine.low %v4139_v55, %v4143_v57 }
0x15e2   : > { %4999 = vmatprep.subr.bf16.mxu0 %v6821_v44  ;;  %5050 = vmatprep.subr.bf16.mxu1 %v6823_v21  ;;  %v6910_v44 = vcombine.low %v4180_v43, %v4184_v40  ;;  %v6901_v21 = vcombine.high %v4171_v32, %v4175_v62  ;;  %v6903_v22 = vcombine.high %v4172_v27, %v4176_v19  ;;  %v7632_v40 = vld [vmem:[#allocation16 + $0x74] ss:$8 sps:$4 sm:$0xff]  }
0x15e5   : > { %5000 = vmatpush1.bf16.msra.mxu0 %v6820_v28  ;;  %5051 = vmatpush1.bf16.msra.mxu1 %v6822_v42  ;;  %v4168_v28 = vld [vmem:[#allocation14 + $0x2f8] sm:$0xff]  ;;  %v6900_v42 = vcombine.low %v4171_v32, %v4175_v62  ;;  %v7641_v32 = vld [vmem:[#allocation16 + $0x164] ss:$8 sps:$4 sm:$0xff]   ;;  %v7636_v62 = vld [vmem:[#allocation16 + $0x60] ss:$8 sps:$4 sm:$0xff]  }
0x15e6   : > { %5001 = vmatprep.subr.bf16.mxu0 %v6813_v35  ;;  %5052 = vmatprep.subr.bf16.mxu1 %v6815_v58  ;;  %v6902_v35 = vcombine.low %v4172_v27, %v4176_v19  ;;  %v6893_v58 = vcombine.high %v4163_v24, %v4167_v48  ;;  %v6895_v15 = vcombine.high %v4164_v31, %v4168_v28  ;;  %v7639_v27 = vld [vmem:[#allocation16 + $0x160] ss:$8 sps:$4 sm:$0xff]   ;;  %v7644_v19 = vld [vmem:[#allocation16 + $0x54] ss:$8 sps:$4 sm:$0xff]  }
0x15e9   : > { %5002 = vmatpush1.bf16.msra.mxu0 %v6812_v63  ;;  %5053 = vmatpush1.bf16.msra.mxu1 %v6814_v30  ;;  %v4160_v63 = vld [vmem:[#allocation14 + $0x2b8] sm:$0xff]  ;;  %v6892_v30 = vcombine.low %v4163_v24, %v4167_v48  ;;  %v7651_v24 = vld [vmem:[#allocation16 + $0x140] ss:$8 sps:$4 sm:$0xff]  }
0x15ea   : > { %5003 = vmatprep.subr.bf16.mxu0 %v6805_v52  ;;  %5054 = vmatprep.subr.bf16.mxu1 %v6807_v33  ;;  %v6894_v52 = vcombine.low %v4164_v31, %v4168_v28  ;;  %v6885_v33 = vcombine.high %v4155_v4, %v4159_v38  ;;  %v6887_v12 = vcombine.high %v4156_v56, %v4160_v63  ;;  %v7656_v48 = vld [vmem:[#allocation16 + $0x34] ss:$8 sps:$4 sm:$0xff]   ;;  %v7654_v28 = vld [vmem:[#allocation16 + $0x30] ss:$8 sps:$4 sm:$0xff]  }
0x15eb   : > { %v7659_v31 = vld [vmem:[#allocation16 + $0x134] ss:$8 sps:$4 sm:$0xff]  }
0x15ed   : > { %5004 = vmatpush1.bf16.msra.mxu0 %v6804_v34  ;;  %5055 = vmatpush1.bf16.msra.mxu1 %v6806_v29  ;;  %v4152_v34 = vld [vmem:[#allocation14 + $0x278] sm:$0xff]  ;;  %v6884_v29 = vcombine.low %v4155_v4, %v4159_v38 }
0x15ee   : > { %5005 = vmatprep.subr.bf16.mxu0 %v6925_v16  ;;  %5056 = vmatprep.subr.bf16.mxu1 %v6927_v60  ;;  %v6886_v16 = vcombine.low %v4156_v56, %v4160_v63  ;;  %v6877_v60 = vcombine.high %v4147_v53, %v4151_v54  ;;  %v6879_v61 = vcombine.high %v4148_v59, %v4152_v34  ;;  %v7668_v4 = vld [vmem:[#allocation16 + $0x14] ss:$8 sps:$4 sm:$0xff]   ;;  %v7666_v56 = vld [vmem:[#allocation16 + $0x10] ss:$8 sps:$4 sm:$0xff]  }
0x15ef   : > { %v7671_v38 = vld [vmem:[#allocation16 + $0x114] ss:$8 sps:$4 sm:$0xff]   ;;  %v7669_v63 = vld [vmem:[#allocation16 + $0x110] ss:$8 sps:$4 sm:$0xff]  }
0x15f1   : > { %5006 = vmatpush2.bf16.msra.mxu0 %v6924_v25  ;;  %5057 = vmatpush2.bf16.msra.mxu1 %v6926_v0  ;;  %v4144_v25 = vld [vmem:[#allocation14 + $0x238] sm:$0xff]  ;;  %v6876_v0 = vcombine.low %v4147_v53, %v4151_v54 }
0x15f2   : > { %5007 = vmatprep.subr.bf16.mxu0 %v6917_v1  ;;  %5058 = vmatprep.subr.bf16.mxu1 %v6919_v46  ;;  %v6878_v1 = vcombine.low %v4148_v59, %v4152_v34  ;;  %v6869_v46 = vcombine.high %v4139_v55, %v4143_v57  ;;  %v6871_v39 = vcombine.high %v4140_v8, %v4144_v25  ;;  %v7680_v53 = vld [vmem:[#allocation16 + $0xf4] ss:$8 sps:$4 sm:$0xff]   ;;  %v7678_v59 = vld [vmem:[#allocation16 + $0xf0] ss:$8 sps:$4 sm:$0xff]  }
0x15f3   : > { %v6870_v43 = vcombine.low %v4140_v8, %v4144_v25  ;;  %v7683_v54 = vld [vmem:[#allocation16 + $0x1f4] ss:$8 sps:$4 sm:$0xff]   ;;  %v7681_v34 = vld [vmem:[#allocation16 + $0x1f0] ss:$8 sps:$4 sm:$0xff]  }
0x15f4   : > { %v7692_v55 = vld [vmem:[#allocation16 + $0xd4] ss:$8 sps:$4 sm:$0xff]   ;;  %v7690_v8 = vld [vmem:[#allocation16 + $0xd0] ss:$8 sps:$4 sm:$0xff]  }
0x15f5   : > { %5008 = vmatpush2.bf16.msra.mxu0 %v6916_v2  ;;  %5059 = vmatpush2.bf16.msra.mxu1 %v6918_v45  ;;  %v7635_v2 = vld [vmem:[#allocation16 + $0x174] ss:$8 sps:$4 sm:$0xff]   ;;  %v7630_v45 = vld [vmem:[#allocation16 + $0x70] ss:$8 sps:$4 sm:$0xff]  }
0x15f6   : > { %5009 = vmatprep.subr.bf16.mxu0 %v6909_v13  ;;  %5060 = vmatprep.subr.bf16.mxu1 %v6911_v36  ;;  %v7633_v13 = vld [vmem:[#allocation16 + $0x170] ss:$8 sps:$4 sm:$0xff]   ;;  %v7638_v36 = vld [vmem:[#allocation16 + $0x64] ss:$8 sps:$4 sm:$0xff]   ;;  %v7695_v57 = vld [vmem:[#allocation16 + $0x1d4] ss:$8 sps:$4 sm:$0xff]  }
0x15f7   : > { %v7693_v25 = vld [vmem:[#allocation16 + $0x1d0] ss:$8 sps:$4 sm:$0xff]  }
0x15f9   : > { %5010 = vmatpush2.bf16.msra.mxu0 %v6908_v20  ;;  %5061 = vmatpush2.bf16.msra.mxu1 %v6910_v44  ;;  %v7647_v20 = vld [vmem:[#allocation16 + $0x154] ss:$8 sps:$4 sm:$0xff]   ;;  %v7642_v44 = vld [vmem:[#allocation16 + $0x50] ss:$8 sps:$4 sm:$0xff]  }
0x15fa   : > { %5011 = vmatprep.subr.bf16.mxu0 %v6901_v21  ;;  %5062 = vmatprep.subr.bf16.mxu1 %v6903_v22  ;;  %v7645_v21 = vld [vmem:[#allocation16 + $0x150] ss:$8 sps:$4 sm:$0xff]   ;;  %v7650_v22 = vld [vmem:[#allocation16 + $0x44] ss:$8 sps:$4 sm:$0xff]  }
0x15fd   : > { %5012 = vmatpush2.bf16.msra.mxu0 %v6900_v42  ;;  %5063 = vmatpush2.bf16.msra.mxu1 %v6902_v35  ;;  %v7657_v42 = vld [vmem:[#allocation16 + $0x130] ss:$8 sps:$4 sm:$0xff]   ;;  %v7662_v35 = vld [vmem:[#allocation16 + $0x24] ss:$8 sps:$4 sm:$0xff]  }
0x15fe   : > { %5013 = vmatprep.subr.bf16.mxu0 %v6893_v58  ;;  %5064 = vmatprep.subr.bf16.mxu1 %v6895_v15  ;;  %v7665_v58 = vld [vmem:[#allocation16 + $0x124] ss:$8 sps:$4 sm:$0xff]   ;;  %v7660_v15 = vld [vmem:[#allocation16 + $0x20] ss:$8 sps:$4 sm:$0xff]  }
0x1601   : > { %5014 = vmatpush2.bf16.msra.mxu0 %v6892_v30  ;;  %5065 = vmatpush2.bf16.msra.mxu1 %v6894_v52  ;;  %v7674_v30 = vld [vmem:[#allocation16 + $0x4] ss:$8 sps:$4 sm:$0xff]  }
0x1602   : > { %5015 = vmatprep.subr.bf16.mxu0 %v6885_v33  ;;  %5066 = vmatprep.subr.bf16.mxu1 %v6887_v12  ;;  %v7677_v52 = vld [vmem:[#allocation16 + $0x104] ss:$8 sps:$4 sm:$0xff]   ;;  %v7672_v33 = vld [vmem:[#allocation16] ss:$8 sps:$4 sm:$0xff]  }
0x1603   : > { %v7675_v12 = vld [vmem:[#allocation16 + $0x100] ss:$8 sps:$4 sm:$0xff]  }
0x1605   : > { %5016 = vmatpush2.bf16.msra.mxu0 %v6884_v29  ;;  %5067 = vmatpush2.bf16.msra.mxu1 %v6886_v16  ;;  %v7686_v29 = vld [vmem:[#allocation16 + $0xe4] ss:$8 sps:$4 sm:$0xff]  }
0x1606   : > { %5017 = vmatprep.subr.bf16.mxu0 %v6877_v60  ;;  %5068 = vmatprep.subr.bf16.mxu1 %v6879_v61  ;;  %v7689_v16 = vld [vmem:[#allocation16 + $0x1e4] ss:$8 sps:$4 sm:$0xff]   ;;  %v7684_v60 = vld [vmem:[#allocation16 + $0xe0] ss:$8 sps:$4 sm:$0xff]  }
0x1607   : > { %v7687_v61 = vld [vmem:[#allocation16 + $0x1e0] ss:$8 sps:$4 sm:$0xff]  }
0x1609   : > { %5018 = vmatpush2.bf16.msra.mxu0 %v6876_v0  ;;  %5069 = vmatpush2.bf16.msra.mxu1 %v6878_v1  ;;  %v7698_v0 = vld [vmem:[#allocation16 + $0xc4] ss:$8 sps:$4 sm:$0xff]  }
0x160a   : > { %5019 = vmatprep.subr.bf16.mxu0 %v6869_v46  ;;  %5070 = vmatprep.subr.bf16.mxu1 %v6871_v39  ;;  %v7701_v1 = vld [vmem:[#allocation16 + $0x1c4] ss:$8 sps:$4 sm:$0xff]   ;;  %v7696_v46 = vld [vmem:[#allocation16 + $0xc0] ss:$8 sps:$4 sm:$0xff]  }
0x160b   : > { %v7699_v39 = vld [vmem:[#allocation16 + $0x1c0] ss:$8 sps:$4 sm:$0xff]  }
0x160d   : > { %5020 = vmatpush2.bf16.msra.mxu0 %v6868_v3  ;;  %5071 = vmatpush2.bf16.msra.mxu1 %v6870_v43  ;;  %v7704_v3 = vld [vmem:[#allocation16 + $0xb4] ss:$8 sps:$4 sm:$0xff]  }
0x160e   : > { %6103 = vmatprep.subr.bf16.mxu0 %v7632_v40  ;;  %6154 = vmatprep.subr.bf16.mxu1 %v7635_v2  ;;  %v7707_v43 = vld [vmem:[#allocation16 + $0x1b4] ss:$8 sps:$4 sm:$0xff]   ;;  %v7702_v40 = vld [vmem:[#allocation16 + $0xb0] ss:$8 sps:$4 sm:$0xff]  }
0x160f   : > { %v7705_v2 = vld [vmem:[#allocation16 + $0x1b0] ss:$8 sps:$4 sm:$0xff]  }
0x1610   : > { %5022 = vmatmul.mubr.bf16.vlgmr.msra.gmra.mxu0 %v9286_v5  ;;  %5073 = vmatmul.mubr.bf16.vlgmr.msra.gmra.mxu1 %v9286_v5  ;;  %v7653_v5 = vld [vmem:[#allocation16 + $0x144] ss:$8 sps:$4 sm:$0xff]  }
0x1611   : > { %5031 = vmatprep.mubr.bf16.mxu0 %v9294_v49  ;;  %5082 = vmatprep.mubr.bf16.mxu1 %v9294_v49  ;;  %v7648_v49 = vld [vmem:[#allocation16 + $0x40] ss:$8 sps:$4 sm:$0xff]  }
0x1612   : > { %6104 = vmatpush1.bf16.msra.mxu0 %v7630_v45  ;;  %6155 = vmatpush1.bf16.msra.mxu1 %v7633_v13  ;;  %v7710_v45 = vld [vmem:[#allocation16 + $0xa4] ss:$8 sps:$4 sm:$0xff]  }
0x1613   : > { %6105 = vmatprep.subr.bf16.mxu0 %v7638_v36  ;;  %6156 = vmatprep.subr.bf16.mxu1 %v7641_v32  ;;  %v7713_v13 = vld [vmem:[#allocation16 + $0x1a4] ss:$8 sps:$4 sm:$0xff]   ;;  %v7708_v36 = vld [vmem:[#allocation16 + $0xa0] ss:$8 sps:$4 sm:$0xff]  }
0x1614   : > { %v7711_v32 = vld [vmem:[#allocation16 + $0x1a0] ss:$8 sps:$4 sm:$0xff]  }
0x1616   : > { %6106 = vmatpush1.bf16.msra.mxu0 %v7636_v62  ;;  %6157 = vmatpush1.bf16.msra.mxu1 %v7639_v27  ;;  %v7716_v62 = vld [vmem:[#allocation16 + $0x94] ss:$8 sps:$4 sm:$0xff]  }
0x1617   : > { %6107 = vmatprep.subr.bf16.mxu0 %v7644_v19  ;;  %6158 = vmatprep.subr.bf16.mxu1 %v7647_v20  ;;  %v7719_v27 = vld [vmem:[#allocation16 + $0x194] ss:$8 sps:$4 sm:$0xff]   ;;  %v7714_v19 = vld [vmem:[#allocation16 + $0x90] ss:$8 sps:$4 sm:$0xff]  }
0x1618   : > { %5032 = vmatmul.mubr.bf16.gmra.mxu0 %v9302_v26  ;;  %5083 = vmatmul.mubr.bf16.gmra.mxu1 %v9302_v26  ;;  %v7663_v26 = vld [vmem:[#allocation16 + $0x120] ss:$8 sps:$4 sm:$0xff]   ;;  %v7717_v20 = vld [vmem:[#allocation16 + $0x190] ss:$8 sps:$4 sm:$0xff]  }
0x161a   : > { %6108 = vmatpush1.bf16.msra.mxu0 %v7642_v44  ;;  %6159 = vmatpush1.bf16.msra.mxu1 %v7645_v21  ;;  %v7722_v44 = vld [vmem:[#allocation16 + $0x84] ss:$8 sps:$4 sm:$0xff]  }
0x161b   : > { %6109 = vmatprep.subr.bf16.mxu0 %v7650_v22  ;;  %6160 = vmatprep.subr.bf16.mxu1 %v7653_v5  ;;  %v7725_v21 = vld [vmem:[#allocation16 + $0x184] ss:$8 sps:$4 sm:$0xff]   ;;  %v7720_v22 = vld [vmem:[#allocation16 + $0x80] ss:$8 sps:$4 sm:$0xff]  }
0x161c   : > { %v7723_v5 = vld [vmem:[#allocation16 + $0x180] ss:$8 sps:$4 sm:$0xff]  }
0x161e   : > { %6110 = vmatpush1.bf16.msra.mxu0 %v7648_v49  ;;  %6161 = vmatpush1.bf16.msra.mxu1 %v7651_v24  ;;  %v7728_v49 = vld [vmem:[#allocation16 + $0x274] ss:$8 sps:$4 sm:$0xff]  }
0x161f   : > { %6111 = vmatprep.subr.bf16.mxu0 %v7656_v48  ;;  %6162 = vmatprep.subr.bf16.mxu1 %v7659_v31  ;;  %v7731_v24 = vld [vmem:[#allocation16 + $0x374] ss:$8 sps:$4 sm:$0xff]  }
0x1620   : > { %v9315_v48 = vld [vmem:[%s9607_s11] sm:$0xff] }
0x1621   : > { %v4210_v31 = vrot.slane %v9315_v48, %v8671_v7 }
0x1622   : > { %6112 = vmatpush1.bf16.msra.mxu0 %v7654_v28  ;;  %6163 = vmatpush1.bf16.msra.mxu1 %v7657_v42  ;;  %v4218_v28 = vrot.slane %v9315_v48, %v8692_v18 }
0x1623   : > { %6113 = vmatprep.subr.bf16.mxu0 %v7662_v35  ;;  %6164 = vmatprep.subr.bf16.mxu1 %v7665_v58  ;;  %v4214_v58 = vrot.slane %v9315_v48, %v8689_v17 }
0x1626   : > { %6114 = vmatpush1.bf16.msra.mxu0 %v7660_v15  ;;  %6165 = vmatpush1.bf16.msra.mxu1 %v7663_v26  ;;  %v4222_v15 = vrot.slane %v9315_v48, %v1050_v41 }
0x1627   : > { %6115 = vmatprep.subr.bf16.mxu0 %v7668_v4  ;;  %6166 = vmatprep.subr.bf16.mxu1 %v7671_v38 }
0x162a   : > { %6116 = vmatpush1.bf16.msra.mxu0 %v7666_v56  ;;  %6167 = vmatpush1.bf16.msra.mxu1 %v7669_v63 }
0x162b   : > { %6117 = vmatprep.subr.bf16.mxu0 %v7674_v30  ;;  %6168 = vmatprep.subr.bf16.mxu1 %v7677_v52 }
0x162e   : > { %6118 = vmatpush1.bf16.msra.mxu0 %v7672_v33  ;;  %6169 = vmatpush1.bf16.msra.mxu1 %v7675_v12 }
0x162f   : > { %6119 = vmatprep.subr.bf16.mxu0 %v7680_v53  ;;  %6170 = vmatprep.subr.bf16.mxu1 %v7683_v54 }
0x1632   : > { %6120 = vmatpush2.bf16.msra.mxu0 %v7678_v59  ;;  %6171 = vmatpush2.bf16.msra.mxu1 %v7681_v34 }
0x1633   : > { %6121 = vmatprep.subr.bf16.mxu0 %v7686_v29  ;;  %6172 = vmatprep.subr.bf16.mxu1 %v7689_v16 }
0x1636   : > { %6122 = vmatpush2.bf16.msra.mxu0 %v7684_v60  ;;  %6173 = vmatpush2.bf16.msra.mxu1 %v7687_v61 }
0x1637   : > { %6123 = vmatprep.subr.bf16.mxu0 %v7692_v55  ;;  %6174 = vmatprep.subr.bf16.mxu1 %v7695_v57 }
0x163a   : > { %6124 = vmatpush2.bf16.msra.mxu0 %v7690_v8  ;;  %6175 = vmatpush2.bf16.msra.mxu1 %v7693_v25 }
0x163b   : > { %6125 = vmatprep.subr.bf16.mxu0 %v7698_v0  ;;  %6176 = vmatprep.subr.bf16.mxu1 %v7701_v1 }
0x163e   : > { %6126 = vmatpush2.bf16.msra.mxu0 %v7696_v46  ;;  %6177 = vmatpush2.bf16.msra.mxu1 %v7699_v39 }
0x163f   : > { %6127 = vmatprep.subr.bf16.mxu0 %v7704_v3  ;;  %6178 = vmatprep.subr.bf16.mxu1 %v7707_v43 }
0x1642   : > { %6128 = vmatpush2.bf16.msra.mxu0 %v7702_v40  ;;  %6179 = vmatpush2.bf16.msra.mxu1 %v7705_v2 }
0x1643   : > { %6129 = vmatprep.subr.bf16.mxu0 %v7710_v45  ;;  %6180 = vmatprep.subr.bf16.mxu1 %v7713_v13 }
0x1646   : > { %6130 = vmatpush2.bf16.msra.mxu0 %v7708_v36  ;;  %6181 = vmatpush2.bf16.msra.mxu1 %v7711_v32 }
0x1647   : > { %6131 = vmatprep.subr.bf16.mxu0 %v7716_v62  ;;  %6182 = vmatprep.subr.bf16.mxu1 %v7719_v27 }
0x164a   : > { %6132 = vmatpush2.bf16.msra.mxu0 %v7714_v19  ;;  %6183 = vmatpush2.bf16.msra.mxu1 %v7717_v20 }
0x164b   : > { %6133 = vmatprep.subr.bf16.mxu0 %v7722_v44  ;;  %6184 = vmatprep.subr.bf16.mxu1 %v7725_v21 }
0x164e   : > { %6134 = vmatpush2.bf16.msra.mxu0 %v7720_v22  ;;  %6185 = vmatpush2.bf16.msra.mxu1 %v7723_v5 }
0x164f   : > { %6205 = vmatprep.subr.bf16.mxu0 %v7728_v49  ;;  %6256 = vmatprep.subr.bf16.mxu1 %v7731_v24 }
0x1690   : > { %v4921_v42 = vpop.f32.mrf.mxu0  ;;  %v4972_v35 = vpop.f32.mrf.mxu1 }
0x1691   : > { %v9326_v26 = vadd.f32 %v4921_v42, %v4210_v31  ;;  %v9328_v4 = vadd.f32 %v4972_v35, %v4218_v28 }
0x1692   : > { %v4923_v38 = vpop.f32.mrf.mxu0  ;;  %v4974_v56 = vpop.f32.mrf.mxu1 }
0x1693   : > { %v5115_v63 = vmul.f32 0.044715, %v9326_v26  ;;  %v5117_v30 = vmul.f32 0.044715, %v9328_v4  ;;  %v9332_v18 = vadd.f32 %v4923_v38, %v4214_v58  ;;  %v9334_v52 = vadd.f32 %v4974_v56, %v4222_v15 }
0x1694   : > { %v4925_v33 = vpop.f32.mrf.mxu0  ;;  %v4976_v12 = vpop.f32.mrf.mxu1 }
0x1695   : > { %v5139_v53 = vmul.f32 %v5115_v63, %v9326_v26  ;;  %v5141_v41 = vmul.f32 %v5117_v30, %v9328_v4  ;;  %v9338_v54 = vadd.f32 %v4925_v33, %v4210_v31  ;;  %v9340_v59 = vadd.f32 %v4976_v12, %v4218_v28 }
0x1696   : > { %v5116_v34 = vmul.f32 0.044715, %v9332_v18  ;;  %v5118_v29 = vmul.f32 0.044715, %v9334_v52  ;;  %v4927_v16 = vpop.f32.mrf.mxu0  ;;  %v4978_v60 = vpop.f32.mrf.mxu1 }
0x1697   : > { %v5163_v61 = vmul.f32 %v5139_v53, %v9326_v26  ;;  %v5165_v55 = vmul.f32 %v5141_v41, %v9328_v4  ;;  %v5123_v57 = vmul.f32 0.044715, %v9338_v54  ;;  %v5125_v25 = vmul.f32 0.044715, %v9340_v59 }
0x1698   : > { %v5140_v8 = vmul.f32 %v5116_v34, %v9332_v18  ;;  %v4931_v0 = vpop.f32.mrf.mxu0  ;;  %v4982_v1 = vpop.f32.mrf.mxu1  ;;  %v9352_v43 = vadd.f32 %v4927_v16, %v4214_v58  ;;  %v5142_v40 = vmul.f32 %v5118_v29, %v9334_v52  ;;  %v9356_v45 = vadd.f32 %v4978_v60, %v4222_v15 }
0x1699   : > { %v5187_v46 = vadd.f32 %v5163_v61, %v9326_v26  ;;  %v5189_v39 = vadd.f32 %v5165_v55, %v9328_v4  ;;  %v5147_v3 = vmul.f32 %v5123_v57, %v9338_v54  ;;  %v5149_v2 = vmul.f32 %v5125_v25, %v9340_v59 }
0x169a   : > { %v4933_v13 = vpop.f32.mrf.mxu0  ;;  %v4984_v36 = vpop.f32.mrf.mxu1  ;;  %v5164_v62 = vmul.f32 %v5140_v8, %v9332_v18  ;;  %v5124_v19 = vmul.f32 0.044715, %v9352_v43  ;;  %v5126_v44 = vmul.f32 0.044715, %v9356_v45  ;;  %v9363_v21 = vadd.f32 %v4931_v0, %v4210_v31 }
0x169b   : > { %v5211_v32 = vmul.f32 0.7978846, %v5187_v46  ;;  %v5171_v27 = vmul.f32 %v5147_v3, %v9338_v54  ;;  %v5173_v20 = vmul.f32 %v5149_v2, %v9340_v59  ;;  %v9365_v22 = vadd.f32 %v4982_v1, %v4218_v28 }
0x169c   : > { %v4935_v5 = vpop.f32.mrf.mxu0  ;;  %v4986_v49 = vpop.f32.mrf.mxu1  ;;  %v5213_v24 = vmul.f32 0.7978846, %v5189_v39  ;;  %v5148_v35 = vmul.f32 %v5124_v19, %v9352_v43  ;;  %v9369_v38 = vadd.f32 %v4933_v13, %v4214_v58  ;;  %v5166_v56 = vmul.f32 %v5142_v40, %v9334_v52 }
0x169d   : > { %v5195_v42 = vadd.f32 %v5171_v27, %v9338_v54  ;;  %v5197_v63 = vadd.f32 %v5173_v20, %v9340_v59  ;;  %v5150_v30 = vmul.f32 %v5126_v44, %v9356_v45  ;;  %v5131_v31 = vmul.f32 0.044715, %v9363_v21 }
0x169e   : > { %v4936_v33 = vpop.f32.mrf.mxu0  ;;  %v4987_v28 = vpop.f32.mrf.mxu1  ;;  %v5172_v53 = vmul.f32 %v5148_v35, %v9352_v43  ;;  %v5133_v41 = vmul.f32 0.044715, %v9365_v22  ;;  %v5132_v34 = vmul.f32 0.044715, %v9369_v38  ;;  %7924 = vtanh.f32 %v5211_v32 }
0x169f   : > { %v5219_v12 = vmul.f32 0.7978846, %v5195_v42  ;;  %v5221_v58 = vmul.f32 0.7978846, %v5197_v63  ;;  %v5174_v29 = vmul.f32 %v5150_v30, %v9356_v45  ;;  %v9379_v16 = vadd.f32 %v4984_v36, %v4222_v15 }
0x16a0   : > { %7926 = vtanh.f32 %v5213_v24  ;;  %v5157_v60 = vmul.f32 %v5133_v41, %v9365_v22  ;;  %v5156_v61 = vmul.f32 %v5132_v34, %v9369_v38  ;;  %v5188_v57 = vadd.f32 %v5164_v62, %v9332_v18 }
0x16a1   : > { %7928 = vtanh.f32 %v5219_v12  ;;  %v5134_v55 = vmul.f32 0.044715, %v9379_v16  ;;  %v5196_v8 = vadd.f32 %v5172_v53, %v9352_v43  ;;  %v5155_v25 = vmul.f32 %v5131_v31, %v9363_v21 }
0x16a2   : > { %v5181_v0 = vmul.f32 %v5157_v60, %v9365_v22  ;;  %v5190_v1 = vadd.f32 %v5166_v56, %v9334_v52  ;;  %v5198_v15 = vadd.f32 %v5174_v29, %v9356_v45  ;;  %7930 = vtanh.f32 %v5221_v58 }
0x16a3   : > { %v5158_v46 = vmul.f32 %v5134_v55, %v9379_v16  ;;  %v5212_v39 = vmul.f32 0.7978846, %v5188_v57  ;;  %v5220_v3 = vmul.f32 0.7978846, %v5196_v8  ;;  %v5180_v36 = vmul.f32 %v5156_v61, %v9369_v38 }
0x16a4   : > { %v5205_v40 = vadd.f32 %v5181_v0, %v9365_v22  ;;  %v5214_v2 = vmul.f32 0.7978846, %v5190_v1  ;;  %v5222_v13 = vmul.f32 0.7978846, %v5198_v15  ;;  %v5179_v19 = vmul.f32 %v5155_v25, %v9363_v21 }
0x16a5   : > { %7932 = vtanh.f32 %v5212_v39  ;;  %v5182_v32 = vmul.f32 %v5158_v46, %v9379_v16  ;;  %v5204_v27 = vadd.f32 %v5180_v36, %v9369_v38  ;;  %v5091_v33 = vmul.f32 0.5, %v9326_v26 }
0x16a6   : > { %v5229_v62 = vmul.f32 0.7978846, %v5205_v40  ;;  %7934 = vtanh.f32 %v5220_v3  ;;  %v5203_v5 = vadd.f32 %v5179_v19, %v9363_v21  ;;  %v5099_v12 = vmul.f32 0.5, %v9338_v54 }
0x16a7   : > { %7936 = vtanh.f32 %v5214_v2  ;;  %v5206_v20 = vadd.f32 %v5182_v32, %v9379_v16  ;;  %v5228_v44 = vmul.f32 0.7978846, %v5204_v27  ;;  %v5092_v29 = vmul.f32 0.5, %v9332_v18 }
0x16a8   : > { %7938 = vtanh.f32 %v5222_v13  ;;  %v5227_v24 = vmul.f32 0.7978846, %v5203_v5  ;;  %v5100_v60 = vmul.f32 0.5, %v9352_v43  ;;  %v5094_v55 = vmul.f32 0.5, %v9334_v52  ;;  %v7734_v5 = vld [vmem:[#allocation16 + $0x264] ss:$8 sps:$4 sm:$0xff]  }
0x16a9   : > { %v5230_v49 = vmul.f32 0.7978846, %v5206_v20  ;;  %7940 = vtanh.f32 %v5229_v62  ;;  %v5101_v25 = vmul.f32 0.5, %v9340_v59  ;;  %v5102_v46 = vmul.f32 0.5, %v9356_v45  ;;  %v7726_v59 = vld [vmem:[#allocation16 + $0x270] ss:$8 sps:$4 sm:$0xff]  }
0x16aa   : > { %7942 = vtanh.f32 %v5228_v44  ;;  %v5093_v18 = vmul.f32 0.5, %v9328_v4  ;;  %v5108_v2 = vmul.f32 0.5, %v9369_v38  ;;  %v5110_v44 = vmul.f32 0.5, %v9379_v16  ;;  %v7729_v4 = vld [vmem:[#allocation16 + $0x370] ss:$8 sps:$4 sm:$0xff]  }
0x16ab   : > { %7944 = vtanh.f32 %v5230_v49  ;;  %v7925_v42 = vpop.eup %7924 }
0x16ac   : > { %7946 = vtanh.f32 %v5227_v24  ;;  %v5259_v34 = vadd.f32 1.0, %v7925_v42 }
0x16ad   : > { %v7927_v35 = vpop.eup %7926 }
0x16ae   : > { %v7929_v56 = vpop.eup %7928  ;;  %v5261_v8 = vadd.f32 1.0, %v7927_v35  ;;  %v5283_v43 = vmul.f32 %v5259_v34, %v5091_v33  ;;  %v7732_v33 = vld [vmem:[#allocation16 + $0x260] ss:$8 sps:$4 sm:$0xff]   ;;  %v7743_v34 = vld [vmem:[#allocation16 + $0x354] ss:$8 sps:$4 sm:$0xff]  }
0x16af   : > { %v7931_v63 = vpop.eup %7930  ;;  %v5267_v30 = vadd.f32 1.0, %v7929_v56  ;;  %v7737_v56 = vld [vmem:[#allocation16 + $0x364] ss:$8 sps:$4 sm:$0xff]  }
0x16b0   : > { %v5269_v53 = vadd.f32 1.0, %v7931_v63  ;;  %v5285_v19 = vmul.f32 %v5261_v8, %v5093_v18  ;;  %v5107_v63 = vmul.f32 0.5, %v9363_v21  ;;  %v7738_v21 = vld [vmem:[#allocation16 + $0x250] ss:$8 sps:$4 sm:$0xff]   ;;  %v7752_v8 = vld [vmem:[#allocation16 + $0x234] ss:$8 sps:$4 sm:$0xff]   ;;  %v9419_v18 = vrot.slane %v9315_v48, %v956_v11 }
0x16b1   : > { %v5291_v26 = vmul.f32 %v5267_v30, %v5099_v12 }
0x16b2   : > { %v7933_v31 = vpop.eup %7932  ;;  %v5293_v40 = vmul.f32 %v5269_v53, %v5101_v25  ;;  %v5109_v53 = vmul.f32 0.5, %v9365_v22  ;;  %v7744_v22 = vld [vmem:[#allocation16 + $0x240] ss:$8 sps:$4 sm:$0xff]  }
0x16b3   : > { %v7935_v28 = vpop.eup %7934  ;;  %v5260_v41 = vadd.f32 1.0, %v7933_v31  ;;  %v5435_v20 = vpack.c.bf16 %v5291_v26, %v5283_v43  ;;  %v7747_v25 = vld [vmem:[#allocation16 + $0x340] ss:$8 sps:$4 sm:$0xff]   ;;  %v7750_v26 = vld [vmem:[#allocation16 + $0x230] ss:$8 sps:$4 sm:$0xff]  }
0x16b4   : > { %v7937_v58 = vpop.eup %7936  ;;  %v5268_v61 = vadd.f32 1.0, %v7935_v28  ;;  %v5437_v35 = vpack.c.bf16 %v5293_v40, %v5285_v19  ;;  %v7740_v28 = vld [vmem:[#allocation16 + $0x254] ss:$8 sps:$4 sm:$0xff]   ;;  %v7759_v43 = vld [vmem:[#allocation16 + $0x320] ss:$8 sps:$4 sm:$0xff]  }
0x16b5   : > { %v7939_v57 = vpop.eup %7938  ;;  %v5262_v0 = vadd.f32 1.0, %v7937_v58  ;;  %v5284_v15 = vmul.f32 %v5260_v41, %v5092_v29  ;;  %v7735_v41 = vld [vmem:[#allocation16 + $0x360] ss:$8 sps:$4 sm:$0xff]   ;;  %v7764_v40 = vld [vmem:[#allocation16 + $0x214] ss:$8 sps:$4 sm:$0xff]  }
0x16b6   : > { %v7941_v1 = vpop.eup %7940  ;;  %v5292_v54 = vmul.f32 %v5268_v61, %v5100_v60  ;;  %v5270_v39 = vadd.f32 1.0, %v7939_v57  ;;  %v7746_v60 = vld [vmem:[#allocation16 + $0x244] ss:$8 sps:$4 sm:$0xff]   ;;  %v7741_v61 = vld [vmem:[#allocation16 + $0x350] ss:$8 sps:$4 sm:$0xff]  }
0x16b7   : > { %v7943_v3 = vpop.eup %7942  ;;  %v5286_v36 = vmul.f32 %v5262_v0, %v5094_v55  ;;  %v5277_v30 = vadd.f32 1.0, %v7941_v1  ;;  %v7749_v57 = vld [vmem:[#allocation16 + $0x344] ss:$8 sps:$4 sm:$0xff]   ;;  %v7755_v0 = vld [vmem:[#allocation16 + $0x334] ss:$8 sps:$4 sm:$0xff]  }
0x16b8   : > { %v7945_v52 = vpop.eup %7944  ;;  %v5436_v13 = vpack.c.bf16 %v5292_v54, %v5284_v15  ;;  %v5294_v32 = vmul.f32 %v5270_v39, %v5102_v46  ;;  %v5276_v62 = vadd.f32 1.0, %v7943_v3  ;;  %v7758_v1 = vld [vmem:[#allocation16 + $0x224] ss:$8 sps:$4 sm:$0xff]   ;;  %v7753_v15 = vld [vmem:[#allocation16 + $0x330] ss:$8 sps:$4 sm:$0xff]   ;;  %v4237_v46 = vsub.s32 7, %v8668_v6 }
0x16b9   : > { %v7947_v27 = vpop.eup %7946  ;;  %v5278_v45 = vadd.f32 1.0, %v7945_v52  ;;  %v5301_v58 = vmul.f32 %v5277_v30, %v5109_v53  ;;  %v7761_v54 = vld [vmem:[#allocation16 + $0x324] ss:$8 sps:$4 sm:$0xff]   ;;  %v7756_v39 = vld [vmem:[#allocation16 + $0x220] ss:$8 sps:$4 sm:$0xff]   ;;  %v9414_v3 = vrot.slane %v9315_v48, %v916_v9 }
0x16ba   : > { %6135 = vmatprep.mubr.bf16.mxu0 %v5436_v13  ;;  %v5438_v49 = vpack.c.bf16 %v5294_v32, %v5286_v36  ;;  %v5300_v24 = vmul.f32 %v5276_v62, %v5108_v2  ;;  %v5275_v42 = vadd.f32 1.0, %v7947_v27  ;;  %v7767_v13 = vld [vmem:[#allocation16 + $0x314] ss:$8 sps:$4 sm:$0xff]   ;;  %v9424_v36 = vrot.slane %v9315_v48, %v936_v10  ;;  %v7770_v19 = vld [vmem:[#allocation16 + $0x204] ss:$8 sps:$4 sm:$0xff]  }
0x16bb   : > { %6136 = vmatmul.mubr.bf16.vlgmr.msra.gmra.mxu0 %v5435_v20  ;;  %v5302_v38 = vmul.f32 %v5278_v45, %v5110_v44  ;;  %v5445_v55 = vpack.c.bf16 %v5301_v58, %v5301_v58  ;;  %v9427_v9 = vrot.slane %v9315_v48, %v4237_v46  ;;  %v7765_v20 = vld [vmem:[#allocation16 + $0x310] ss:$8 sps:$4 sm:$0xff]   ;;  %v7771_v53 = vld [vmem:[#allocation16 + $0x300] ss:$8 sps:$4 sm:$0xff]  }
0x16bc   : > { %6186 = vmatprep.mubr.bf16.mxu1 %v5438_v49  ;;  %6206 = vmatpush1.bf16.msra.mxu0 %v7726_v59  ;;  %v5444_v31 = vpack.c.bf16 %v5300_v24, %v5300_v24  ;;  %v5299_v12 = vmul.f32 %v5275_v42, %v5107_v63  ;;  %v7762_v59 = vld [vmem:[#allocation16 + $0x210] ss:$8 sps:$4 sm:$0xff]   ;;  %v7773_v49 = vld [vmem:[#allocation16 + $0x304] ss:$8 sps:$4 sm:$0xff]  }
0x16bd   : > { %6187 = vmatmul.mubr.bf16.vlgmr.msra.gmra.mxu1 %v5437_v35  ;;  %v5446_v16 = vpack.c.bf16 %v5302_v38, %v5302_v38  ;;  %6207 = vmatprep.subr.bf16.mxu0 %v7734_v5  ;;  %v7768_v38 = vld [vmem:[#allocation16 + $0x200] ss:$8 sps:$4 sm:$0xff]  }
0x16be   : > { %6257 = vmatpush1.bf16.msra.mxu1 %v7729_v4  ;;  %6145 = vmatprep.mubr.bf16.mxu0 %v5444_v31  ;;  %v5443_v29 = vpack.c.bf16 %v5299_v12, %v5299_v12 }
0x16bf   : > { %6196 = vmatprep.mubr.bf16.mxu1 %v5446_v16  ;;  %6258 = vmatprep.subr.bf16.mxu1 %v7737_v56 }
0x16c0   : > { %6208 = vmatpush1.bf16.msra.mxu0 %v7732_v33  ;;  %v7776_v33 = vld [vmem:[#allocation16 + $0x2f4] ss:$8 sps:$4 sm:$0xff]  }
0x16c1   : > { %6209 = vmatprep.subr.bf16.mxu0 %v7740_v28 }
0x16c2   : > { %6259 = vmatpush1.bf16.msra.mxu1 %v7735_v41 }
0x16c3   : > { %6260 = vmatprep.subr.bf16.mxu1 %v7743_v34  ;;  %6146 = vmatmul.mubr.bf16.gmra.mxu0 %v5443_v29  ;;  %v7779_v29 = vld [vmem:[#allocation16 + $0x3f4] ss:$8 sps:$4 sm:$0xff]  }
0x16c4   : > { %6210 = vmatpush1.bf16.msra.mxu0 %v7738_v21 }
0x16c5   : > { %6197 = vmatmul.mubr.bf16.gmra.mxu1 %v5445_v55  ;;  %6211 = vmatprep.subr.bf16.mxu0 %v7746_v60 }
0x16c6   : > { %6261 = vmatpush1.bf16.msra.mxu1 %v7741_v61 }
0x16c7   : > { %6262 = vmatprep.subr.bf16.mxu1 %v7749_v57 }
0x16c8   : > { %6212 = vmatpush1.bf16.msra.mxu0 %v7744_v22  ;;  %v7774_v22 = vld [vmem:[#allocation16 + $0x2f0] ss:$8 sps:$4 sm:$0xff]  }
0x16c9   : > { %6213 = vmatprep.subr.bf16.mxu0 %v7752_v8 }
0x16ca   : > { %6263 = vmatpush1.bf16.msra.mxu1 %v7747_v25 }
0x16cb   : > { %6264 = vmatprep.subr.bf16.mxu1 %v7755_v0 }
0x16cc   : > { %6214 = vmatpush1.bf16.msra.mxu0 %v7750_v26 }
0x16cd   : > { %6215 = vmatprep.subr.bf16.mxu0 %v7758_v1 }
0x16ce   : > { %6265 = vmatpush1.bf16.msra.mxu1 %v7753_v15  ;;  %v7782_v15 = vld [vmem:[#allocation16 + $0x2e4] ss:$8 sps:$4 sm:$0xff]  }
0x16cf   : > { %6266 = vmatprep.subr.bf16.mxu1 %v7761_v54 }
0x16d0   : > { %v5023_v2 = vpop.f32.mrf.mxu0  ;;  %v5074_v52 = vpop.f32.mrf.mxu1  ;;  %6216 = vmatpush1.bf16.msra.mxu0 %v7756_v39 }
0x16d1   : > { %v9430_v11 = vadd.f32 %v5023_v2, %v9414_v3  ;;  %v9433_v32 = vadd.f32 %v5074_v52, %v9419_v18  ;;  %6217 = vmatprep.subr.bf16.mxu0 %v7764_v40 }
0x16d2   : > { %v5025_v62 = vpop.f32.mrf.mxu0  ;;  %v5076_v27 = vpop.f32.mrf.mxu1  ;;  %6267 = vmatpush1.bf16.msra.mxu1 %v7759_v43  ;;  %v7777_v43 = vld [vmem:[#allocation16 + $0x3f0] ss:$8 sps:$4 sm:$0xff]  }
0x16d3   : > { %v5119_v6 = vmul.f32 0.044715, %v9430_v11  ;;  %v5121_v10 = vmul.f32 0.044715, %v9433_v32  ;;  %6268 = vmatprep.subr.bf16.mxu1 %v7767_v13  ;;  %v9438_v48 = vadd.f32 %v5025_v62, %v9424_v36  ;;  %v9441_v44 = vadd.f32 %v5076_v27, %v9427_v9 }
0x16d4   : > { %v5027_v45 = vpop.f32.mrf.mxu0  ;;  %v5078_v5 = vpop.f32.mrf.mxu1  ;;  %6218 = vmatpush1.bf16.msra.mxu0 %v7762_v59 }
0x16d5   : > { %v5143_v4 = vmul.f32 %v5119_v6, %v9430_v11  ;;  %v5145_v24 = vmul.f32 %v5121_v10, %v9433_v32  ;;  %v9446_v42 = vadd.f32 %v5027_v45, %v9414_v3  ;;  %v9449_v35 = vadd.f32 %v5078_v5, %v9419_v18  ;;  %6219 = vmatprep.subr.bf16.mxu0 %v7770_v19  ;;  %v7785_v19 = vld [vmem:[#allocation16 + $0x3e4] ss:$8 sps:$4 sm:$0xff]   ;;  %v7780_v5 = vld [vmem:[#allocation16 + $0x2e0] ss:$8 sps:$4 sm:$0xff]  }
0x16d6   : > { %v5120_v56 = vmul.f32 0.044715, %v9438_v48  ;;  %v5122_v63 = vmul.f32 0.044715, %v9441_v44  ;;  %v5029_v30 = vpop.f32.mrf.mxu0  ;;  %v5080_v31 = vpop.f32.mrf.mxu1  ;;  %6269 = vmatpush1.bf16.msra.mxu1 %v7765_v20 }
0x16d7   : > { %v5167_v16 = vmul.f32 %v5143_v4, %v9430_v11  ;;  %v5169_v28 = vmul.f32 %v5145_v24, %v9433_v32  ;;  %v5127_v12 = vmul.f32 0.044715, %v9446_v42  ;;  %v5129_v34 = vmul.f32 0.044715, %v9449_v35  ;;  %6270 = vmatprep.subr.bf16.mxu1 %v7773_v49  ;;  %v7783_v24 = vld [vmem:[#allocation16 + $0x3e0] ss:$8 sps:$4 sm:$0xff]  }
0x16d8   : > { %v5144_v41 = vmul.f32 %v5120_v56, %v9438_v48  ;;  %v5033_v58 = vpop.f32.mrf.mxu0  ;;  %v5084_v21 = vpop.f32.mrf.mxu1  ;;  %6220 = vmatpush1.bf16.msra.mxu0 %v7768_v38  ;;  %v9462_v57 = vadd.f32 %v5029_v30, %v9424_v36  ;;  %v5146_v8 = vmul.f32 %v5122_v63, %v9441_v44  ;;  %v9467_v0 = vadd.f32 %v5080_v31, %v9427_v9  ;;  %v7788_v63 = vld [vmem:[#allocation16 + $0x2d4] ss:$8 sps:$4 sm:$0xff]  }
0x16d9   : > { %v5191_v60 = vadd.f32 %v5167_v16, %v9430_v11  ;;  %v5193_v61 = vadd.f32 %v5169_v28, %v9433_v32  ;;  %v5151_v55 = vmul.f32 %v5127_v12, %v9446_v42  ;;  %v5153_v25 = vmul.f32 %v5129_v34, %v9449_v35  ;;  %6221 = vmatprep.subr.bf16.mxu0 %v7776_v33 }
0x16da   : > { %v5035_v26 = vpop.f32.mrf.mxu0  ;;  %v5086_v1 = vpop.f32.mrf.mxu1  ;;  %v5168_v46 = vmul.f32 %v5144_v41, %v9438_v48  ;;  %6271 = vmatpush1.bf16.msra.mxu1 %v7771_v53  ;;  %v5128_v40 = vmul.f32 0.044715, %v9462_v57  ;;  %v5130_v52 = vmul.f32 0.044715, %v9467_v0  ;;  %v9475_v13 = vadd.f32 %v5033_v58, %v9414_v3  ;;  %v7791_v53 = vld [vmem:[#allocation16 + $0x3d4] ss:$8 sps:$4 sm:$0xff]  }
0x16db   : > { %v5215_v54 = vmul.f32 0.7978846, %v5191_v60  ;;  %v5175_v39 = vmul.f32 %v5151_v55, %v9446_v42  ;;  %v5177_v2 = vmul.f32 %v5153_v25, %v9449_v35  ;;  %v9478_v59 = vadd.f32 %v5084_v21, %v9419_v18  ;;  %6272 = vmatprep.subr.bf16.mxu1 %v7779_v29  ;;  %v7786_v58 = vld [vmem:[#allocation16 + $0x2d0] ss:$8 sps:$4 sm:$0xff]   ;;  %v7794_v29 = vld [vmem:[#allocation16 + $0x2c4] ss:$8 sps:$4 sm:$0xff]  }
0x16dc   : > { %v5037_v62 = vpop.f32.mrf.mxu0  ;;  %v5088_v27 = vpop.f32.mrf.mxu1  ;;  %v5217_v6 = vmul.f32 0.7978846, %v5193_v61  ;;  %v5152_v20 = vmul.f32 %v5128_v40, %v9462_v57  ;;  %6222 = vmatpush2.bf16.msra.mxu0 %v7774_v22  ;;  %v9483_v45 = vadd.f32 %v5035_v26, %v9424_v36  ;;  %v5170_v3 = vmul.f32 %v5146_v8, %v9441_v44  ;;  %v7789_v22 = vld [vmem:[#allocation16 + $0x3d0] ss:$8 sps:$4 sm:$0xff]  }
0x16dd   : > { %v5199_v10 = vadd.f32 %v5175_v39, %v9446_v42  ;;  %v5201_v49 = vadd.f32 %v5177_v2, %v9449_v35  ;;  %v5154_v18 = vmul.f32 %v5130_v52, %v9467_v0  ;;  %v5135_v4 = vmul.f32 0.044715, %v9475_v13  ;;  %6223 = vmatprep.subr.bf16.mxu0 %v7782_v15  ;;  %v7792_v39 = vld [vmem:[#allocation16 + $0x2c0] ss:$8 sps:$4 sm:$0xff]   ;;  %v7800_v52 = vld [vmem:[#allocation16 + $0x2b4] ss:$8 sps:$4 sm:$0xff]  }
0x16de   : > { %v5038_v38 = vpop.f32.mrf.mxu0  ;;  %v5089_v56 = vpop.f32.mrf.mxu1  ;;  %v5176_v31 = vmul.f32 %v5152_v20, %v9462_v57  ;;  %v5137_v36 = vmul.f32 0.044715, %v9478_v59  ;;  %6273 = vmatpush2.bf16.msra.mxu1 %v7777_v43  ;;  %v5136_v33 = vmul.f32 0.044715, %v9483_v45  ;;  %7948 = vtanh.f32 %v5215_v54  ;;  %v7803_v20 = vld [vmem:[#allocation16 + $0x3b4] ss:$8 sps:$4 sm:$0xff]  }
0x16df   : > { %v5223_v30 = vmul.f32 0.7978846, %v5199_v10  ;;  %v5225_v16 = vmul.f32 0.7978846, %v5201_v49  ;;  %v5178_v28 = vmul.f32 %v5154_v18, %v9467_v0  ;;  %v9494_v12 = vadd.f32 %v5086_v1, %v9427_v9  ;;  %6274 = vmatprep.subr.bf16.mxu1 %v7785_v19  ;;  %v7797_v1 = vld [vmem:[#allocation16 + $0x3c4] ss:$8 sps:$4 sm:$0xff]  }
0x16e0   : > { %7950 = vtanh.f32 %v5217_v6  ;;  %v5161_v41 = vmul.f32 %v5137_v36, %v9478_v59  ;;  %v5160_v34 = vmul.f32 %v5136_v33, %v9483_v45  ;;  %6224 = vmatpush2.bf16.msra.mxu0 %v7780_v5  ;;  %v5192_v60 = vadd.f32 %v5168_v46, %v9438_v48  ;;  %v7795_v19 = vld [vmem:[#allocation16 + $0x3c0] ss:$8 sps:$4 sm:$0xff]   ;;  %v7801_v38 = vld [vmem:[#allocation16 + $0x3b0] ss:$8 sps:$4 sm:$0xff]   ;;  %v7812_v33 = vld [vmem:[#allocation16 + $0x294] ss:$8 sps:$4 sm:$0xff]  }
0x16e1   : > { %7952 = vtanh.f32 %v5223_v30  ;;  %v5138_v21 = vmul.f32 0.044715, %v9494_v12  ;;  %6225 = vmatprep.subr.bf16.mxu0 %v7788_v63  ;;  %v5200_v61 = vadd.f32 %v5176_v31, %v9462_v57  ;;  %v5159_v9 = vmul.f32 %v5135_v4, %v9475_v13  ;;  %v7806_v4 = vld [vmem:[#allocation16 + $0x2a4] ss:$8 sps:$4 sm:$0xff]   ;;  %v7804_v31 = vld [vmem:[#allocation16 + $0x2a0] ss:$8 sps:$4 sm:$0xff]  }
0x16e2   : > { %v5185_v55 = vmul.f32 %v5161_v41, %v9478_v59  ;;  %6275 = vmatpush2.bf16.msra.mxu1 %v7783_v24  ;;  %v5194_v8 = vadd.f32 %v5170_v3, %v9441_v44  ;;  %v5202_v25 = vadd.f32 %v5178_v28, %v9467_v0  ;;  %7954 = vtanh.f32 %v5225_v16  ;;  %v7798_v3 = vld [vmem:[#allocation16 + $0x2b0] ss:$8 sps:$4 sm:$0xff]   ;;  %v7809_v63 = vld [vmem:[#allocation16 + $0x3a4] ss:$8 sps:$4 sm:$0xff]   ;;  %v7807_v28 = vld [vmem:[#allocation16 + $0x3a0] ss:$8 sps:$4 sm:$0xff]  }
0x16e3   : > { %v5162_v26 = vmul.f32 %v5138_v21, %v9494_v12  ;;  %6276 = vmatprep.subr.bf16.mxu1 %v7791_v53  ;;  %v5216_v15 = vmul.f32 0.7978846, %v5192_v60  ;;  %v5224_v54 = vmul.f32 0.7978846, %v5200_v61  ;;  %v5184_v2 = vmul.f32 %v5160_v34, %v9483_v45  ;;  %v7815_v53 = vld [vmem:[#allocation16 + $0x394] ss:$8 sps:$4 sm:$0xff]  }
0x16e4   : > { %v5209_v46 = vadd.f32 %v5185_v55, %v9478_v59  ;;  %6226 = vmatpush2.bf16.msra.mxu0 %v7786_v58  ;;  %v5218_v40 = vmul.f32 0.7978846, %v5194_v8  ;;  %v5226_v43 = vmul.f32 0.7978846, %v5202_v25  ;;  %v5183_v10 = vmul.f32 %v5159_v9, %v9475_v13  ;;  %v7810_v34 = vld [vmem:[#allocation16 + $0x290] ss:$8 sps:$4 sm:$0xff]  }
0x16e5   : > { %6227 = vmatprep.subr.bf16.mxu0 %v7794_v29  ;;  %7956 = vtanh.f32 %v5216_v15  ;;  %v5186_v62 = vmul.f32 %v5162_v26, %v9494_v12  ;;  %v5208_v6 = vadd.f32 %v5184_v2, %v9483_v45  ;;  %v7818_v58 = vld [vmem:[#allocation16 + $0x284] ss:$8 sps:$4 sm:$0xff]   ;;  %v5095_v60 = vmul.f32 0.5, %v9430_v11  ;;  %v7813_v61 = vld [vmem:[#allocation16 + $0x390] ss:$8 sps:$4 sm:$0xff]  }
0x16e6   : > { %v5233_v27 = vmul.f32 0.7978846, %v5209_v46  ;;  %6277 = vmatpush2.bf16.msra.mxu1 %v7789_v22  ;;  %7958 = vtanh.f32 %v5224_v54  ;;  %v5207_v18 = vadd.f32 %v5183_v10, %v9475_v13  ;;  %v5103_v55 = vmul.f32 0.5, %v9446_v42  ;;  %v7821_v8 = vld [vmem:[#allocation16 + $0x384] ss:$8 sps:$4 sm:$0xff]  }
0x16e7   : > { %6278 = vmatprep.subr.bf16.mxu1 %v7797_v1  ;;  %7960 = vtanh.f32 %v5218_v40  ;;  %v5210_v5 = vadd.f32 %v5186_v62, %v9494_v12  ;;  %v5232_v49 = vmul.f32 0.7978846, %v5208_v6  ;;  %v7816_v15 = vld [vmem:[#allocation16 + $0x280] ss:$8 sps:$4 sm:$0xff]   ;;  %v5096_v54 = vmul.f32 0.5, %v9438_v48 }
0x16e8   : > { %6228 = vmatpush2.bf16.msra.mxu0 %v7792_v39  ;;  %7962 = vtanh.f32 %v5226_v43  ;;  %v5231_v56 = vmul.f32 0.7978846, %v5207_v18  ;;  %v5104_v46 = vmul.f32 0.5, %v9462_v57  ;;  %v5098_v11 = vmul.f32 0.5, %v9441_v44 }
0x16e9   : > { %6229 = vmatprep.subr.bf16.mxu0 %v7800_v52  ;;  %v5234_v24 = vmul.f32 0.7978846, %v5210_v5  ;;  %7964 = vtanh.f32 %v5233_v27  ;;  %v5105_v2 = vmul.f32 0.5, %v9449_v35  ;;  %v7819_v27 = vld [vmem:[#allocation16 + $0x380] ss:$8 sps:$4 sm:$0xff]   ;;  %v5106_v10 = vmul.f32 0.5, %v9467_v0 }
0x16ea   : > { %6279 = vmatpush2.bf16.msra.mxu1 %v7795_v19  ;;  %7966 = vtanh.f32 %v5232_v49  ;;  %v5097_v57 = vmul.f32 0.5, %v9433_v32  ;;  %v5114_v0 = vmul.f32 0.5, %v9494_v12 }
0x16eb   : > { %6280 = vmatprep.subr.bf16.mxu1 %v7803_v20  ;;  %7968 = vtanh.f32 %v5234_v24  ;;  %v7949_v30 = vpop.eup %7948 }
0x16ec   : > { %6230 = vmatpush2.bf16.msra.mxu0 %v7798_v3  ;;  %7970 = vtanh.f32 %v5231_v56  ;;  %v5263_v26 = vadd.f32 1.0, %v7949_v30  ;;  %v5112_v3 = vmul.f32 0.5, %v9483_v45 }
0x16ed   : > { %v7951_v36 = vpop.eup %7950  ;;  %6231 = vmatprep.subr.bf16.mxu0 %v7806_v4 }
0x16ee   : > { %v7953_v16 = vpop.eup %7952  ;;  %6281 = vmatpush2.bf16.msra.mxu1 %v7801_v38  ;;  %v5265_v43 = vadd.f32 1.0, %v7951_v36  ;;  %v5287_v44 = vmul.f32 %v5263_v26, %v5095_v60 }
0x16ef   : > { %6282 = vmatprep.subr.bf16.mxu1 %v7809_v63  ;;  %v7955_v41 = vpop.eup %7954  ;;  %v5271_v21 = vadd.f32 1.0, %v7953_v16  ;;  %v5111_v16 = vmul.f32 0.5, %v9475_v13 }
0x16f0   : > { %6232 = vmatpush2.bf16.msra.mxu0 %v7804_v31  ;;  %v5273_v22 = vadd.f32 1.0, %v7955_v41  ;;  %v5289_v56 = vmul.f32 %v5265_v43, %v5097_v57 }
0x16f1   : > { %6233 = vmatprep.subr.bf16.mxu0 %v7812_v33  ;;  %v5295_v52 = vmul.f32 %v5271_v21, %v5103_v55 }
0x16f2   : > { %v7957_v29 = vpop.eup %7956  ;;  %6283 = vmatpush2.bf16.msra.mxu1 %v7807_v28  ;;  %v5297_v5 = vmul.f32 %v5273_v22, %v5105_v2 }
0x16f3   : > { %v7959_v9 = vpop.eup %7958  ;;  %6284 = vmatprep.subr.bf16.mxu1 %v7815_v53  ;;  %v5264_v25 = vadd.f32 1.0, %v7957_v29  ;;  %v5439_v63 = vpack.c.bf16 %v5295_v52, %v5287_v44 }
0x16f4   : > { %v7961_v1 = vpop.eup %7960  ;;  %6234 = vmatpush2.bf16.msra.mxu0 %v7810_v34  ;;  %v5272_v39 = vadd.f32 1.0, %v7959_v9  ;;  %v5441_v33 = vpack.c.bf16 %v5297_v5, %v5289_v56 }
0x16f5   : > { %v7963_v40 = vpop.eup %7962  ;;  %6235 = vmatprep.subr.bf16.mxu0 %v7818_v58  ;;  %v5266_v42 = vadd.f32 1.0, %v7961_v1  ;;  %v5288_v19 = vmul.f32 %v5264_v25, %v5096_v54  ;;  %v5113_v58 = vmul.f32 0.5, %v9478_v59 }
0x16f6   : > { %v7965_v62 = vpop.eup %7964  ;;  %6285 = vmatpush2.bf16.msra.mxu1 %v7813_v61  ;;  %v5296_v6 = vmul.f32 %v5272_v39, %v5104_v46  ;;  %v5274_v48 = vadd.f32 1.0, %v7963_v40  ;;  %v5451_v40 = vld [vmem:[%s9609_s13] sm:$0x3] }
0x16f7   : > { %v7967_v20 = vpop.eup %7966  ;;  %6286 = vmatprep.subr.bf16.mxu1 %v7821_v8  ;;  %v5290_v18 = vmul.f32 %v5266_v42, %v5098_v11  ;;  %v5281_v28 = vadd.f32 1.0, %v7965_v62  ;;  %v5456_v43 = vrot.slane %v5451_v40, %v8671_v7  ;;  %v5460_v2 = vrot.slane %v5451_v40, %v8689_v17 }
0x16f8   : > { %v7969_v35 = vpop.eup %7968  ;;  %6236 = vmatpush2.bf16.msra.mxu0 %v7816_v15  ;;  %v5440_v49 = vpack.c.bf16 %v5296_v6, %v5288_v19  ;;  %v5298_v4 = vmul.f32 %v5274_v48, %v5106_v10  ;;  %v5280_v24 = vadd.f32 1.0, %v7967_v20 }
0x16f9   : > { %v7971_v38 = vpop.eup %7970  ;;  %v5282_v30 = vadd.f32 1.0, %v7969_v35  ;;  %v5305_v12 = vmul.f32 %v5281_v28, %v5113_v58 }
0x16fa   : > { %6287 = vmatpush2.bf16.msra.mxu1 %v7819_v27  ;;  %6237 = vmatprep.mubr.bf16.mxu0 %v5440_v49  ;;  %v5442_v32 = vpack.c.bf16 %v5298_v4, %v5290_v18  ;;  %v5304_v31 = vmul.f32 %v5280_v24, %v5112_v3  ;;  %v5279_v36 = vadd.f32 1.0, %v7971_v38 }
0x16fb   : > { %6238 = vmatmul.mubr.bf16.vlgmr.msra.gmra.mxu0 %v5439_v63  ;;  %v5306_v45 = vmul.f32 %v5282_v30, %v5114_v0  ;;  %v5449_v29 = vpack.c.bf16 %v5305_v12, %v5305_v12 }
0x16fc   : > { %6288 = vmatprep.mubr.bf16.mxu1 %v5442_v32  ;;  %v5448_v53 = vpack.c.bf16 %v5304_v31, %v5304_v31  ;;  %v5303_v34 = vmul.f32 %v5279_v36, %v5111_v16 }
0x16fd   : > { %6289 = vmatmul.mubr.bf16.vlgmr.msra.gmra.mxu1 %v5441_v33  ;;  %v5450_v41 = vpack.c.bf16 %v5306_v45, %v5306_v45 }
0x16fe   : > { %6247 = vmatprep.mubr.bf16.mxu0 %v5448_v53  ;;  %v5447_v21 = vpack.c.bf16 %v5303_v34, %v5303_v34 }
0x16ff   : > { %6298 = vmatprep.mubr.bf16.mxu1 %v5450_v41 }
0x1703   : > { %6248 = vmatmul.mubr.bf16.gmra.mxu0 %v5447_v21 }
0x1705   : > { %6299 = vmatmul.mubr.bf16.gmra.mxu1 %v5449_v29 }
0x177b   : > { %v6137_v60 = vpop.f32.mrf.mxu0 }
0x177c   : > { %v6138_v42 = vadd.f32 %v6137_v60, %v5456_v43 }
0x177d   : > { %v6188_v61 = vpop.f32.mrf.mxu1  ;;  %v6139_v9 = vpop.f32.mrf.mxu0 }
0x177e   : > { %v6140_v52 = vadd.f32 %v6139_v9, %v5460_v2  ;;  %v6189_v62 = vadd.f32 %v6188_v61, %v6138_v42 }
0x177f   : > { %v6190_v55 = vpop.f32.mrf.mxu1  ;;  %v6141_v13 = vpop.f32.mrf.mxu0 }
0x1780   : > { %v6142_v27 = vadd.f32 %v6141_v13, %v5456_v43  ;;  %v6191_v6 = vadd.f32 %v6190_v55, %v6140_v52 }
0x1781   : > { %v6192_v22 = vpop.f32.mrf.mxu1  ;;  %v6143_v8 = vpop.f32.mrf.mxu0 }
0x1782   : > { %v6144_v10 = vadd.f32 %v6143_v8, %v5460_v2  ;;  %v6193_v44 = vadd.f32 %v6192_v22, %v6142_v27 }
0x1783   : > { %v6194_v25 = vpop.f32.mrf.mxu1  ;;  %v6147_v26 = vpop.f32.mrf.mxu0 }
0x1784   : > { %v6148_v20 = vadd.f32 %v6147_v26, %v5456_v43  ;;  %v6195_v4 = vadd.f32 %v6194_v25, %v6144_v10 }
0x1785   : > { %v6198_v1 = vpop.f32.mrf.mxu1  ;;  %v6149_v15 = vpop.f32.mrf.mxu0 }
0x1786   : > { %v6150_v24 = vadd.f32 %v6149_v15, %v5460_v2  ;;  %v6199_v63 = vadd.f32 %v6198_v1, %v6148_v20 }
0x1787   : > { %v6200_v54 = vpop.f32.mrf.mxu1  ;;  %v6151_v59 = vpop.f32.mrf.mxu0 }
0x1788   : > { %v6201_v28 = vadd.f32 %v6200_v54, %v6150_v24  ;;  %v6313_v24 = vld [vmem:[%s9610_s14] sm:$0x3] }
0x1789   : > { %v6202_v46 = vpop.f32.mrf.mxu1  ;;  %v6152_v39 = vpop.f32.mrf.mxu0 }
0x178b   : > { %v6203_v11 = vpop.f32.mrf.mxu1 }
0x17bb   : > { %v6239_v19 = vpop.f32.mrf.mxu0 }
0x17bc   : > { %v6240_v48 = vadd.f32 %v6239_v19, %v6189_v62 }
0x17bd   : > { %v6290_v57 = vpop.f32.mrf.mxu1  ;;  %v6241_v5 = vpop.f32.mrf.mxu0 }
0x17be   : > { %v6291_v3 = vadd.f32 %v6290_v57, %v6240_v48  ;;  %v6242_v35 = vadd.f32 %v6241_v5, %v6191_v6 }
0x17bf   : > { %v6292_v49 = vpop.f32.mrf.mxu1  ;;  %v6243_v18 = vpop.f32.mrf.mxu0 }
0x17c0   : > { %v6293_v38 = vadd.f32 %v6292_v49, %v6242_v35  ;;  %v6244_v56 = vadd.f32 %v6243_v18, %v6193_v44  ;;  %v6307_v32 = vadd.f32 %v6291_v3, %v9274_v47 }
0x17c1   : > { %v6294_v0 = vpop.f32.mrf.mxu1  ;;  %v6245_v30 = vpop.f32.mrf.mxu0 }
0x17c2   : > { %v6308_v31 = vadd.f32 %v6293_v38, %v9272_v37  ;;  %v6295_v36 = vadd.f32 %v6294_v0, %v6244_v56  ;;  %v6246_v33 = vadd.f32 %v6245_v30, %v6195_v4  ;;  %v6314_v38 = vld [vmem:[%s9611_s15] sm:$0x3]  ;;  %v6367_v56 = vrot.slane %v6313_v24, %v8671_v7 }
0x17c3   : > { %v6296_v45 = vpop.f32.mrf.mxu1  ;;  %v6249_v16 = vpop.f32.mrf.mxu0  ;;  %v6384_v30 = vrot.slane %v6314_v38, %v8671_v7 }
0x17c4   : > { %v6297_v53 = vadd.f32 %v6296_v45, %v6246_v33  ;;  %v6250_v41 = vadd.f32 %v6249_v16, %v6199_v63  ;;  %v6315_v34 = vadd.f32 %v6308_v31, %v6307_v32  ;;  %v6309_v21 = vadd.f32 %v6295_v36, %v9278_v51 }
0x17c5   : > { %v6300_v58 = vpop.f32.mrf.mxu1  ;;  %v6251_v12 = vpop.f32.mrf.mxu0  ;;  %v6371_v63 = vrot.slane %v6313_v24, %v8689_v17 }
0x17c6   : > { %v6310_v29 = vadd.f32 %v6297_v53, %v9276_v23  ;;  %v6301_v60 = vadd.f32 %v6300_v58, %v6250_v41  ;;  %v6252_v61 = vadd.f32 %v6251_v12, %v6201_v28  ;;  %6316 = vadd.xlane.f32.xlu1 %v6315_v34 }
0x17c7   : > { %v6302_v47 = vpop.f32.mrf.mxu1  ;;  %v6253_v9 = vpop.f32.mrf.mxu0 }
0x17c8   : > { %v6303_v37 = vadd.f32 %v6302_v47, %v6252_v61  ;;  %v6318_v55 = vadd.f32 %v6310_v29, %v6309_v21  ;;  %v6311_v8 = vadd.f32 %v6301_v60, %v9296_v14 }
0x17c9   : > { %v6304_v13 = vpop.f32.mrf.mxu1  ;;  %v6254_v22 = vpop.f32.mrf.mxu0 }
0x17ca   : > { %v6312_v25 = vadd.f32 %v6303_v37, %v9288_v50  ;;  %6319 = vadd.xlane.f32.xlu1 %v6318_v55 }
0x17cb   : > { %v6305_v26 = vpop.f32.mrf.mxu1 }
0x17cc   : > { %v6321_v1 = vadd.f32 %v6312_v25, %v6311_v8 }
0x17ce   : > { %6322 = vadd.xlane.f32.xlu1 %v6321_v1 }
0x184f   : > { %v6317_v51 = vpop.xlane.xlu1 %6316 }
0x1850   : > { %v6324_v15 = vmul.f32 0.00390625, %v6317_v51 }
0x1852   : > { %v6327_v23 = vsub.f32 %v6307_v32, %v6324_v15  ;;  %v6328_v54 = vsub.f32 %v6308_v31, %v6324_v15  ;;  %v6388_v32 = vrot.slane %v6314_v38, %v8689_v17 }
0x1853   : > { %v6320_v59 = vpop.xlane.xlu1 %6319 }
0x1854   : > { %v6325_v46 = vmul.f32 0.00390625, %v6320_v59  ;;  %v6333_v39 = vmul.f32 %v6327_v23, %v6327_v23  ;;  %v6334_v11 = vmul.f32 %v6328_v54, %v6328_v54 }
0x1856   : > { %v6329_v40 = vsub.f32 %v6309_v21, %v6325_v46  ;;  %v6330_v43 = vsub.f32 %v6310_v29, %v6325_v46  ;;  %v6339_v2 = vadd.f32 %v6334_v11, %v6333_v39 }
0x1857   : > { %v6323_v42 = vpop.xlane.xlu1 %6322 }
0x1858   : > { %v6326_v52 = vmul.f32 0.00390625, %v6323_v42  ;;  %6340 = vadd.xlane.f32.xlu1 %v6339_v2  ;;  %v6335_v14 = vmul.f32 %v6329_v40, %v6329_v40  ;;  %v6336_v50 = vmul.f32 %v6330_v43, %v6330_v43 }
0x185a   : > { %v6331_v62 = vsub.f32 %v6311_v8, %v6326_v52  ;;  %v6332_v27 = vsub.f32 %v6312_v25, %v6326_v52  ;;  %v6342_v19 = vadd.f32 %v6336_v50, %v6335_v14 }
0x185c   : > { %v6337_v6 = vmul.f32 %v6331_v62, %v6331_v62  ;;  %v6338_v10 = vmul.f32 %v6332_v27, %v6332_v27  ;;  %6343 = vadd.xlane.f32.xlu1 %v6342_v19 }
0x185e   : > { %v6345_v48 = vadd.f32 %v6338_v10, %v6337_v6 }
0x1860   : > { %6346 = vadd.xlane.f32.xlu1 %v6345_v48 }
0x18e1   : > { %v6341_v20 = vpop.xlane.xlu1 %6340 }
0x18e2   : > { %v6348_v57 = vmul.f32 0.00390625, %v6341_v20 }
0x18e4   : > { %v6351_v5 = vadd.f32 1e-05, %v6348_v57 }
0x18e5   : > { %v6344_v44 = vpop.xlane.xlu1 %6343 }
0x18e6   : > { %7972 = vrsqrt.f32 %v6351_v5  ;;  %v6349_v3 = vmul.f32 0.00390625, %v6344_v44 }
0x18e8   : > { %v6352_v35 = vadd.f32 1e-05, %v6349_v3 }
0x18e9   : > { %v6347_v49 = vpop.xlane.xlu1 %6346 }
0x18ea   : > { %7974 = vrsqrt.f32 %v6352_v35  ;;  %v6350_v18 = vmul.f32 0.00390625, %v6347_v49 }
0x18ec   : > { %v6353_v4 = vadd.f32 1e-05, %v6350_v18 }
0x18ee   : > { %7976 = vrsqrt.f32 %v6353_v4 }
0x18f3   : > { %v7973_v0 = vpop.eup %7972 }
0x18f4   : > { %v6357_v31 = vmul.f32 %v7973_v0, %v6327_v23  ;;  %v6358_v36 = vmul.f32 %v7973_v0, %v6328_v54 }
0x18f6   : > { %v6374_v33 = vmul.f32 %v6367_v56, %v6357_v31  ;;  %v6375_v45 = vmul.f32 %v6371_v63, %v6358_v36 }
0x18f7   : > { %v7975_v16 = vpop.eup %7974 }
0x18f8   : > { %v6391_v28 = vadd.f32 %v6384_v30, %v6374_v33  ;;  %v6392_v53 = vadd.f32 %v6388_v32, %v6375_v45  ;;  %v6359_v41 = vmul.f32 %v7975_v16, %v6329_v40  ;;  %v6360_v34 = vmul.f32 %v7975_v16, %v6330_v43 }
0x18fa   : > { %6397 = vst [vmem:[%s668_s2] sm:$0xff] %v6391_v28  ;;  %6398 = vst [vmem:[%s668_s2 + $0x8] sm:$0xff] %v6392_v53  ;;  %v6376_v58 = vmul.f32 %v6367_v56, %v6359_v41  ;;  %v6377_v12 = vmul.f32 %v6371_v63, %v6360_v34 }
0x18fb   : > { %v7977_v21 = vpop.eup %7976 }
0x18fc   : > { %v6393_v7 = vadd.f32 %v6384_v30, %v6376_v58  ;;  %v6394_v17 = vadd.f32 %v6388_v32, %v6377_v12  ;;  %v6361_v29 = vmul.f32 %v7977_v21, %v6331_v62  ;;  %v6362_v60 = vmul.f32 %v7977_v21, %v6332_v27 }
0x18fe   : > { %6399 = vst [vmem:[%s668_s2 + $0x10] sm:$0xff] %v6393_v7  ;;  %6400 = vst [vmem:[%s668_s2 + $0x18] sm:$0xff] %v6394_v17  ;;  %v6378_v61 = vmul.f32 %v6367_v56, %v6361_v29  ;;  %v6379_v47 = vmul.f32 %v6371_v63, %v6362_v60 }
0x1900   : > { %v6395_v9 = vadd.f32 %v6384_v30, %v6378_v61  ;;  %v6396_v37 = vadd.f32 %v6388_v32, %v6379_v47 }
0x1902   : > { %6401 = vst [vmem:[%s668_s2 + $0x20] sm:$0xff] %v6395_v9  ;;  %6402 = vst [vmem:[%s668_s2 + $0x28] sm:$0xff] %v6396_v37 }
0x1903   : > { %8231 = shalt.err (!%p8228_p4)
}
0x1904   : > { %s8232_s19 = scalar_lea.hbm %s9551_s17, 768  ;;  %s8236_s6 = scalar_lea.hbm %s9665_s12, 1536 }
0x1905   : > { %p8233_p7 = scmp.ne.s32.totalorder %s9551_s17, %s8232_s19  ;;  %p8237_p10 = scmp.lt.s32.totalorder %s9551_s17, %s9665_s12 }
0x1906   : > { %p8238_p13 = scmp.lt.s32.totalorder %s8236_s6, %s8232_s19 }
0x1907   : > { %p8234_p9 = pnand %p8233_p7, %p9666_p3 }
0x1908   : > { %p8239_p0 = por %p8238_p13, %p8237_p10 }
0x1909   : > { %p8235_p11 = pneg %p8234_p9 }
0x190b   : > { %p8240_p8 = pnand %p8239_p0, %p8235_p11 }
0x190d   : > { %8243 = shalt.err (!%p8240_p8)
}
0x190e   : > { %s8326_s16 = smov 256   ;;  %s8327_s4 = smov 16  }
0x190f   : > { %7334 = dma.vmem_to_hbm [thread:$0]  (%p9666_p3), %s9553_s10, 768, %s9551_s17, %s6404_s27, %s8326_s16, %s8326_s16, %s8327_s4  }
0x1910 PF: > { %s6432_s9 = sand.u32 1, %s8290_s21   ;;  %p9667_p12 = scmp.ne.s32.totalorder %s9651_s25, 0 }
0x1911   : > { %p9668_p6 = scmp.ge.s32.totalorder %s8302_s24, 2  ;;  %s6433_s28 = scalar_lea.sflag [#allocation4], %s6432_s9 }
0x1913   : > { %p7366_p2 = pnand %p9668_p6, %p9667_p12 }
0x1915   : > { %p7367_p1 = pneg %p7366_p2 }
0x1917   : > { %8285 = dma.done.wait (%p7367_p1), %s6433_s28, 768  }
0x1918   : > { %8287 = vsyncadd (%p7367_p1), %s6433_s28, 4294966528  ;;  %s9669_s24 = sld [smem:[#allocation26_spill]]  ;;  %s9672_s21 = smov %s8294_s22 }
0x1919   : > { %s9670_s23 = sld [smem:[#allocation25_spill]] }
0x191a   : > { %s9671_s26 = sld [smem:[#allocation27_spill]] }
0x191e   : > { %p35_p5 = scmp.ge.s32.totalorder %s9669_s24, 4  }
0x191f   : > { %s9673_s22 = smov %s9670_s23 }
0x1920   : > { %s9674_s23 = smov %s9671_s26  ;;  %37 = sbr.rel (!%p35_p5) target bundleno = 20 (0x14), region = 170 }
0x1925   :  { %6438 = vsyncpa [#allocation3], 1 }
0x1926   :  { %6440 = vsyncpa [#allocation3 + $0x1], 1 }
0x1927   :  { %6441 = vsyncpa [#allocation6], 1 }
0x1928   :  { %6443 = vsyncpa [#allocation6 + $0x1], 1 }
0x1929   :  { %6444 = vsyncpa [#allocation9], 1 }
0x192a   :  { %6445 = vsyncpa [#allocation12], 1 }
0x192b   :  { %6446 = vsyncpa [#allocation15], 1 }
0x192c   :  { %6447 = vsyncpa [#allocation4], 1 }
0x192d   :  { %6449 = vsyncpa [#allocation4 + $0x1], 1 }

</bundles_post_ra>
